<compile_context>
chip_gen: v6e
topology: v6e:2x2x1
jax: 0.10.0
libtpu: 0.0.40
codegen_flags: <defaults>
</compile_context>

<pallas_src>
import jax
import jax.numpy as jnp
import numpy as np
from jax.experimental import pallas as pl
from jax.experimental.pallas import tpu as pltpu


def _round_up(x, m):
    return ((x + m - 1) // m) * m


# -----------------------------------------------------------------------------
# Pallas kernel: fused (conv3x3 + bias + ReLU) x 2 on one NHWC image.
#   yp_ref : (1, H+2, W+2, Cin_p)   spatially + channel padded input
#   w1_ref : (9, Cin_p, Cmid_p)     conv1 weights, tap-major (t = 3*dh + dw)
#   b1_ref : (1, Cmid_p)
#   w2_ref : (9, Cmid_p, Cout_p)    conv2 weights
#   b2_ref : (1, Cout_p)
#   o_ref  : (1, H, W, Cout_p)
#   mid_pad: VMEM (H+2, W+2, Cmid_p) scratch for the padded intermediate
# -----------------------------------------------------------------------------
def _double_conv_kernel(yp_ref, w1_ref, b1_ref, w2_ref, b2_ref, o_ref, mid_pad):
    H = o_ref.shape[1]
    W = o_ref.shape[2]
    Cin_p = yp_ref.shape[3]
    Cmid_p = w1_ref.shape[2]
    Cout_p = w2_ref.shape[2]

    # ---- conv1: 9 MXU matmuls (one per 3x3 tap), f32 accumulation ----
    yp = yp_ref[0]                                   # (H+2, W+2, Cin_p)
    acc1 = jnp.zeros((H * W, Cmid_p), jnp.float32)
    for t in range(9):
        dh, dw = divmod(t, 3)
        patch = yp[dh:dh + H, dw:dw + W, :].reshape(H * W, Cin_p)
        acc1 = acc1 + jnp.dot(patch, w1_ref[t],
                              preferred_element_type=jnp.float32)
    mid = jnp.maximum(acc1 + b1_ref[...], 0.0)       # (H*W, Cmid_p)

    # Stage the ReLU'd intermediate in a zero-padded VMEM scratch so conv2 can
    # read shifted 3x3 windows.  Full re-init every grid step keeps this
    # correct even if the (parallel) batch axis is split across TensorCores.
    mid_pad[...] = jnp.zeros_like(mid_pad)
    mid_pad[1:H + 1, 1:W + 1, :] = mid.reshape(H, W, Cmid_p)

    # ---- conv2: same structure on the intermediate ----
    mp = mid_pad[...]                                # (H+2, W+2, Cmid_p)
    acc2 = jnp.zeros((H * W, Cout_p), jnp.float32)
    for t in range(9):
        dh, dw = divmod(t, 3)
        patch = mp[dh:dh + H, dw:dw + W, :].reshape(H * W, Cmid_p)
        acc2 = acc2 + jnp.dot(patch, w2_ref[t],
                              preferred_element_type=jnp.float32)
    out = jnp.maximum(acc2 + b2_ref[...], 0.0)       # (H*W, Cout_p)

    o_ref[...] = out.reshape(1, H, W, Cout_p).astype(o_ref.dtype)


def _double_conv_pallas(y_padded, w1p, b1p, w2p, b2p, H, W):
    """y_padded: (N, H+2, W+2, Cin_p), weights tap-major, channel-padded."""
    N = y_padded.shape[0]
    Cin_p = y_padded.shape[3]
    Cmid_p = w1p.shape[2]
    Cout_p = w2p.shape[2]

    grid_spec = pltpu.PrefetchScalarGridSpec(
        num_scalar_prefetch=0,
        grid=(N,),
        in_specs=[
            pl.BlockSpec((1, H + 2, W + 2, Cin_p), lambda n: (n, 0, 0, 0)),
            pl.BlockSpec((9, Cin_p, Cmid_p), lambda n: (0, 0, 0)),
            pl.BlockSpec((1, Cmid_p), lambda n: (0, 0)),
            pl.BlockSpec((9, Cmid_p, Cout_p), lambda n: (0, 0, 0)),
            pl.BlockSpec((1, Cout_p), lambda n: (0, 0)),
        ],
        out_specs=pl.BlockSpec((1, H, W, Cout_p), lambda n: (n, 0, 0, 0)),
        scratch_shapes=[pltpu.VMEM((H + 2, W + 2, Cmid_p), jnp.float32)],
    )

    return pl.pallas_call(
        _double_conv_kernel,
        out_shape=jax.ShapeDtypeStruct((N, H, W, Cout_p), jnp.float32),
        grid_spec=grid_spec,
        compiler_params=pltpu.CompilerParams(
            dimension_semantics=("parallel",)),
    )(y_padded, w1p, b1p, w2p, b2p)


# -----------------------------------------------------------------------------
# Plain-JAX glue (NHWC): bilinear 2x upsample, align_corners=True — matches
# torch.nn.Upsample(scale_factor=2, mode='bilinear', align_corners=True).
# -----------------------------------------------------------------------------
def _upsample_bilinear2x_nhwc(x):  # x: (N, H, W, C)
    N, H, W, C = x.shape
    Ho, Wo = 2 * H, 2 * W

    def axis_coords(n_in, n_out):
        out = jnp.arange(n_out, dtype=jnp.float32)
        src = out * (n_in - 1) / (n_out - 1)
        i0 = jnp.clip(jnp.floor(src).astype(jnp.int32), 0, n_in - 2)
        frac = src - i0.astype(jnp.float32)
        return i0, frac

    h0, hf = axis_coords(H, Ho)
    w0, wf = axis_coords(W, Wo)

    top = x[:, h0, :, :]
    bot = x[:, h0 + 1, :, :]
    rows = top * (1.0 - hf)[None, :, None, None] + bot * hf[None, :, None, None]

    left = rows[:, :, w0, :]
    right = rows[:, :, w0 + 1, :]
    return left * (1.0 - wf)[None, None, :, None] + right * wf[None, None, :, None]


def upblock_forward(x1, x2, w1, b1, w2, b2):
    """UpBlock.forward.  x1/x2 in NCHW; weights in HWIO; returns NCHW."""
    N, C1, H1, W1 = x1.shape
    C2 = x2.shape[1]
    Cin = C1 + C2
    Cmid = w1.shape[3]
    Cout = w2.shape[3]
    H, W = 2 * H1, 2 * W1

    LANE = 128
    Cin_p = _round_up(Cin, LANE)
    Cmid_p = _round_up(Cmid, LANE)
    Cout_p = _round_up(Cout, LANE)

    # NCHW -> NHWC, upsample + concat in NHWC (channels on the lane axis).
    x1n = jnp.transpose(x1, (0, 2, 3, 1))
    x2n = jnp.transpose(x2, (0, 2, 3, 1))
    x1u = _upsample_bilinear2x_nhwc(x1n)                 # (N, H, W, C1)
    y = jnp.concatenate([x1u, x2n], axis=-1)             # (N, H, W, Cin)

    # Spatial halo pad for the 3x3 conv + channel pad to a dense lane width.
    y = jnp.pad(y, ((0, 0), (1, 1), (1, 1), (0, Cin_p - Cin)))

    # Pad parameters once (zeros keep the math identical) and make taps major.
    w1p = jnp.pad(w1, ((0, 0), (0, 0), (0, Cin_p - Cin), (0, Cmid_p - Cmid)))
    w1p = w1p.reshape(9, Cin_p, Cmid_p)
    w2p = jnp.pad(w2, ((0, 0), (0, 0), (0, Cmid_p - Cmid), (0, Cout_p - Cout)))
    w2p = w2p.reshape(9, Cmid_p, Cout_p)
    b1p = jnp.pad(b1, (0, Cmid_p - Cmid)).reshape(1, Cmid_p)
    b2p = jnp.pad(b2, (0, Cout_p - Cout)).reshape(1, Cout_p)

    out_p = _double_conv_pallas(y, w1p, b1p, w2p, b2p, H, W)  # (N, H, W, Cout_p)
    out = out_p[..., :Cout]
    return jnp.transpose(out, (0, 3, 1, 2))              # back to NCHW


# -----------------------------------------------------------------------------
# Pure-JAX reference (XLA conv) for verification.
# -----------------------------------------------------------------------------
def upblock_reference(x1, x2, w1, b1, w2, b2):
    x1n = jnp.transpose(x1, (0, 2, 3, 1))
    x1_up = jnp.transpose(_upsample_bilinear2x_nhwc(x1n), (0, 3, 1, 2))
    y = jnp.concatenate([x1_up, x2], axis=1)

    def conv_relu(x, w_hwio, b):
        w_oihw = jnp.transpose(w_hwio, (3, 2, 0, 1))
        out = jax.lax.conv_general_dilated(
            x, w_oihw, window_strides=(1, 1), padding="SAME",
            dimension_numbers=("NCHW", "OIHW", "NCHW"))
        return jnp.maximum(out + b[None, :, None, None], 0.0)

    return conv_relu(conv_relu(y, w1, b1), w2, b2)


if __name__ == "__main__":
    # Small shapes: channels_in = 8 (4 from upsampled x1 + 4 from skip x2),
    # channels_out = 4, spatial 8 -> 16 after upsample.
    N = 2
    C1 = 4          # channels of x1 (pre-upsample)
    C2 = 4          # channels of x2 (skip connection)
    H1 = W1 = 8     # x1 spatial
    H2 = W2 = 16    # x2 spatial (= 2 * x1 spatial)
    channels_in = C1 + C2
    channels_mid = channels_in // 2
    channels_out = 4

    key = jax.random.PRNGKey(0)
    k_x1, k_x2, k_w1, k_b1, k_w2, k_b2 = jax.random.split(key, 6)

    x1 = jax.random.normal(k_x1, (N, C1, H1, W1), dtype=jnp.float32)
    x2 = jax.random.normal(k_x2, (N, C2, H2, W2), dtype=jnp.float32)

    # Synthetic parameters in HWIO layout (torch OIHW -> HWIO is (2,3,1,0)).
    w1 = 0.1 * jax.random.normal(k_w1, (3, 3, channels_in, channels_mid), dtype=jnp.float32)
    b1 = 0.1 * jax.random.normal(k_b1, (channels_mid,), dtype=jnp.float32)
    w2 = 0.1 * jax.random.normal(k_w2, (3, 3, channels_mid, channels_out), dtype=jnp.float32)
    b2 = 0.1 * jax.random.normal(k_b2, (channels_out,), dtype=jnp.float32)

    out = jax.block_until_ready(upblock_forward(x1, x2, w1, b1, w2, b2))
    ref = jax.block_until_ready(upblock_reference(x1, x2, w1, b1, w2, b2))

    assert out.shape == (N, channels_out, H2, W2), out.shape
    np.testing.assert_allclose(np.asarray(out), np.asarray(ref), rtol=2e-4, atol=2e-4)

    print("KERNEL_OK")
</pallas_src>

<mosaic_0001>
module attributes {stable_mosaic.version = 11 : i64} {
  func.func @_double_conv_kernel(%arg0: i32, %arg1: memref<1x18x18x128xf32, #tpu.memory_space<vmem>>, %arg2: memref<9x128x128xf32, #tpu.memory_space<vmem>>, %arg3: memref<1x128xf32, #tpu.memory_space<vmem>>, %arg4: memref<9x128x128xf32, #tpu.memory_space<vmem>>, %arg5: memref<1x128xf32, #tpu.memory_space<vmem>>, %arg6: memref<1x16x16x128xf32, #tpu.memory_space<vmem>>, %arg7: memref<18x18x128xf32, #tpu.memory_space<vmem>>) attributes {dimension_semantics = [#tpu.dimension_semantics<parallel>], iteration_bounds = array<i64: 2>, scalar_prefetch = 0 : i64, scratch_operands = 1 : i64, tpu.core_type = #tpu.core_type<tc>, window_params = [{transform_indices = @transform_0, window_bounds = array<i64: 1, 18, 18, 128>}, {pipeline_mode = #tpu.pipeline_mode<synchronous>, transform_indices = @transform_1, window_bounds = array<i64: 9, 128, 128>}, {pipeline_mode = #tpu.pipeline_mode<synchronous>, transform_indices = @transform_2, window_bounds = array<i64: 1, 128>}, {pipeline_mode = #tpu.pipeline_mode<synchronous>, transform_indices = @transform_3, window_bounds = array<i64: 9, 128, 128>}, {pipeline_mode = #tpu.pipeline_mode<synchronous>, transform_indices = @transform_4, window_bounds = array<i64: 1, 128>}, {transform_indices = @transform_5, window_bounds = array<i64: 1, 16, 16, 128>}]} {
    %c0 = arith.constant 0 : index
    %c0_0 = arith.constant 0 : index
    %c0_1 = arith.constant 0 : index
    %c0_2 = arith.constant 0 : index
    %0 = vector.load %arg1[%c0, %c0_0, %c0_1, %c0_2] : memref<1x18x18x128xf32, #tpu.memory_space<vmem>>, vector<1x18x18x128xf32>
    %1 = vector.shape_cast %0 : vector<1x18x18x128xf32> to vector<18x18x128xf32>
    %cst = arith.constant 0.000000e+00 : f32
    %2 = vector.broadcast %cst : f32 to vector<256x128xf32>
    %3 = vector.extract_strided_slice %1 {offsets = [0, 0, 0], sizes = [16, 16, 128], strides = [1, 1, 1]} : vector<18x18x128xf32> to vector<16x16x128xf32>
    %4 = vector.shape_cast %3 : vector<16x16x128xf32> to vector<256x128xf32>
    %c0_3 = arith.constant 0 : index
    %c0_4 = arith.constant 0 : index
    %c0_5 = arith.constant 0 : index
    %5 = vector.load %arg2[%c0_3, %c0_4, %c0_5] : memref<9x128x128xf32, #tpu.memory_space<vmem>>, vector<1x128x128xf32>
    %6 = vector.shape_cast %5 : vector<1x128x128xf32> to vector<128x128xf32>
    %cst_6 = arith.constant dense<0.000000e+00> : vector<256x128xf32>
    %7 = tpu.matmul %4, %6, %cst_6 {dimension_numbers = #tpu.dot_dimension_numbers<[1], [0], [0], [1], [0, 0, 1, 1], [], []>} : vector<256x128xf32>, vector<128x128xf32>, vector<256x128xf32> -> vector<256x128xf32>
    %8 = arith.addf %2, %7 : vector<256x128xf32>
    %9 = vector.extract_strided_slice %1 {offsets = [0, 1, 0], sizes = [16, 16, 128], strides = [1, 1, 1]} : vector<18x18x128xf32> to vector<16x16x128xf32>
    %10 = vector.shape_cast %9 : vector<16x16x128xf32> to vector<256x128xf32>
    %c1 = arith.constant 1 : index
    %c0_7 = arith.constant 0 : index
    %c0_8 = arith.constant 0 : index
    %11 = vector.load %arg2[%c1, %c0_7, %c0_8] : memref<9x128x128xf32, #tpu.memory_space<vmem>>, vector<1x128x128xf32>
    %12 = vector.shape_cast %11 : vector<1x128x128xf32> to vector<128x128xf32>
    %cst_9 = arith.constant dense<0.000000e+00> : vector<256x128xf32>
    %13 = tpu.matmul %10, %12, %cst_9 {dimension_numbers = #tpu.dot_dimension_numbers<[1], [0], [0], [1], [0, 0, 1, 1], [], []>} : vector<256x128xf32>, vector<128x128xf32>, vector<256x128xf32> -> vector<256x128xf32>
    %14 = arith.addf %8, %13 : vector<256x128xf32>
    %15 = vector.extract_strided_slice %1 {offsets = [0, 2, 0], sizes = [16, 16, 128], strides = [1, 1, 1]} : vector<18x18x128xf32> to vector<16x16x128xf32>
    %16 = vector.shape_cast %15 : vector<16x16x128xf32> to vector<256x128xf32>
    %c2 = arith.constant 2 : index
    %c0_10 = arith.constant 0 : index
    %c0_11 = arith.constant 0 : index
    %17 = vector.load %arg2[%c2, %c0_10, %c0_11] : memref<9x128x128xf32, #tpu.memory_space<vmem>>, vector<1x128x128xf32>
    %18 = vector.shape_cast %17 : vector<1x128x128xf32> to vector<128x128xf32>
    %cst_12 = arith.constant dense<0.000000e+00> : vector<256x128xf32>
    %19 = tpu.matmul %16, %18, %cst_12 {dimension_numbers = #tpu.dot_dimension_numbers<[1], [0], [0], [1], [0, 0, 1, 1], [], []>} : vector<256x128xf32>, vector<128x128xf32>, vector<256x128xf32> -> vector<256x128xf32>
    %20 = arith.addf %14, %19 : vector<256x128xf32>
    %21 = vector.extract_strided_slice %1 {offsets = [1, 0, 0], sizes = [16, 16, 128], strides = [1, 1, 1]} : vector<18x18x128xf32> to vector<16x16x128xf32>
    %22 = vector.shape_cast %21 : vector<16x16x128xf32> to vector<256x128xf32>
    %c3 = arith.constant 3 : index
    %c0_13 = arith.constant 0 : index
    %c0_14 = arith.constant 0 : index
    %23 = vector.load %arg2[%c3, %c0_13, %c0_14] : memref<9x128x128xf32, #tpu.memory_space<vmem>>, vector<1x128x128xf32>
    %24 = vector.shape_cast %23 : vector<1x128x128xf32> to vector<128x128xf32>
    %cst_15 = arith.constant dense<0.000000e+00> : vector<256x128xf32>
    %25 = tpu.matmul %22, %24, %cst_15 {dimension_numbers = #tpu.dot_dimension_numbers<[1], [0], [0], [1], [0, 0, 1, 1], [], []>} : vector<256x128xf32>, vector<128x128xf32>, vector<256x128xf32> -> vector<256x128xf32>
    %26 = arith.addf %20, %25 : vector<256x128xf32>
    %27 = vector.extract_strided_slice %1 {offsets = [1, 1, 0], sizes = [16, 16, 128], strides = [1, 1, 1]} : vector<18x18x128xf32> to vector<16x16x128xf32>
    %28 = vector.shape_cast %27 : vector<16x16x128xf32> to vector<256x128xf32>
    %c4 = arith.constant 4 : index
    %c0_16 = arith.constant 0 : index
    %c0_17 = arith.constant 0 : index
    %29 = vector.load %arg2[%c4, %c0_16, %c0_17] : memref<9x128x128xf32, #tpu.memory_space<vmem>>, vector<1x128x128xf32>
    %30 = vector.shape_cast %29 : vector<1x128x128xf32> to vector<128x128xf32>
    %cst_18 = arith.constant dense<0.000000e+00> : vector<256x128xf32>
    %31 = tpu.matmul %28, %30, %cst_18 {dimension_numbers = #tpu.dot_dimension_numbers<[1], [0], [0], [1], [0, 0, 1, 1], [], []>} : vector<256x128xf32>, vector<128x128xf32>, vector<256x128xf32> -> vector<256x128xf32>
    %32 = arith.addf %26, %31 : vector<256x128xf32>
    %33 = vector.extract_strided_slice %1 {offsets = [1, 2, 0], sizes = [16, 16, 128], strides = [1, 1, 1]} : vector<18x18x128xf32> to vector<16x16x128xf32>
    %34 = vector.shape_cast %33 : vector<16x16x128xf32> to vector<256x128xf32>
    %c5 = arith.constant 5 : index
    %c0_19 = arith.constant 0 : index
    %c0_20 = arith.constant 0 : index
    %35 = vector.load %arg2[%c5, %c0_19, %c0_20] : memref<9x128x128xf32, #tpu.memory_space<vmem>>, vector<1x128x128xf32>
    %36 = vector.shape_cast %35 : vector<1x128x128xf32> to vector<128x128xf32>
    %cst_21 = arith.constant dense<0.000000e+00> : vector<256x128xf32>
    %37 = tpu.matmul %34, %36, %cst_21 {dimension_numbers = #tpu.dot_dimension_numbers<[1], [0], [0], [1], [0, 0, 1, 1], [], []>} : vector<256x128xf32>, vector<128x128xf32>, vector<256x128xf32> -> vector<256x128xf32>
    %38 = arith.addf %32, %37 : vector<256x128xf32>
    %39 = vector.extract_strided_slice %1 {offsets = [2, 0, 0], sizes = [16, 16, 128], strides = [1, 1, 1]} : vector<18x18x128xf32> to vector<16x16x128xf32>
    %40 = vector.shape_cast %39 : vector<16x16x128xf32> to vector<256x128xf32>
    %c6 = arith.constant 6 : index
    %c0_22 = arith.constant 0 : index
    %c0_23 = arith.constant 0 : index
    %41 = vector.load %arg2[%c6, %c0_22, %c0_23] : memref<9x128x128xf32, #tpu.memory_space<vmem>>, vector<1x128x128xf32>
    %42 = vector.shape_cast %41 : vector<1x128x128xf32> to vector<128x128xf32>
    %cst_24 = arith.constant dense<0.000000e+00> : vector<256x128xf32>
    %43 = tpu.matmul %40, %42, %cst_24 {dimension_numbers = #tpu.dot_dimension_numbers<[1], [0], [0], [1], [0, 0, 1, 1], [], []>} : vector<256x128xf32>, vector<128x128xf32>, vector<256x128xf32> -> vector<256x128xf32>
    %44 = arith.addf %38, %43 : vector<256x128xf32>
    %45 = vector.extract_strided_slice %1 {offsets = [2, 1, 0], sizes = [16, 16, 128], strides = [1, 1, 1]} : vector<18x18x128xf32> to vector<16x16x128xf32>
    %46 = vector.shape_cast %45 : vector<16x16x128xf32> to vector<256x128xf32>
    %c7 = arith.constant 7 : index
    %c0_25 = arith.constant 0 : index
    %c0_26 = arith.constant 0 : index
    %47 = vector.load %arg2[%c7, %c0_25, %c0_26] : memref<9x128x128xf32, #tpu.memory_space<vmem>>, vector<1x128x128xf32>
    %48 = vector.shape_cast %47 : vector<1x128x128xf32> to vector<128x128xf32>
    %cst_27 = arith.constant dense<0.000000e+00> : vector<256x128xf32>
    %49 = tpu.matmul %46, %48, %cst_27 {dimension_numbers = #tpu.dot_dimension_numbers<[1], [0], [0], [1], [0, 0, 1, 1], [], []>} : vector<256x128xf32>, vector<128x128xf32>, vector<256x128xf32> -> vector<256x128xf32>
    %50 = arith.addf %44, %49 : vector<256x128xf32>
    %51 = vector.extract_strided_slice %1 {offsets = [2, 2, 0], sizes = [16, 16, 128], strides = [1, 1, 1]} : vector<18x18x128xf32> to vector<16x16x128xf32>
    %52 = vector.shape_cast %51 : vector<16x16x128xf32> to vector<256x128xf32>
    %c8 = arith.constant 8 : index
    %c0_28 = arith.constant 0 : index
    %c0_29 = arith.constant 0 : index
    %53 = vector.load %arg2[%c8, %c0_28, %c0_29] : memref<9x128x128xf32, #tpu.memory_space<vmem>>, vector<1x128x128xf32>
    %54 = vector.shape_cast %53 : vector<1x128x128xf32> to vector<128x128xf32>
    %cst_30 = arith.constant dense<0.000000e+00> : vector<256x128xf32>
    %55 = tpu.matmul %52, %54, %cst_30 {dimension_numbers = #tpu.dot_dimension_numbers<[1], [0], [0], [1], [0, 0, 1, 1], [], []>} : vector<256x128xf32>, vector<128x128xf32>, vector<256x128xf32> -> vector<256x128xf32>
    %56 = arith.addf %50, %55 : vector<256x128xf32>
    %c0_31 = arith.constant 0 : index
    %c0_32 = arith.constant 0 : index
    %57 = vector.load %arg3[%c0_31, %c0_32] : memref<1x128xf32, #tpu.memory_space<vmem>>, vector<1x128xf32>
    %58 = vector.broadcast %57 : vector<1x128xf32> to vector<256x128xf32>
    %59 = arith.addf %56, %58 : vector<256x128xf32>
    %cst_33 = arith.constant 0.000000e+00 : f32
    %60 = vector.broadcast %cst_33 : f32 to vector<256x128xf32>
    %61 = arith.maximumf %59, %60 : vector<256x128xf32>
    %cst_34 = arith.constant 0.000000e+00 : f32
    %62 = vector.broadcast %cst_34 : f32 to vector<18x18x128xf32>
    %c0_35 = arith.constant 0 : index
    %c0_36 = arith.constant 0 : index
    %c0_37 = arith.constant 0 : index
    %63 = vector.load %arg7[%c0_35, %c0_36, %c0_37] : memref<18x18x128xf32, #tpu.memory_space<vmem>>, vector<18x18x128xf32>
    tpu.vector_store %arg7[%c0_35, %c0_36, %c0_37], %62 {strides = array<i32>} : memref<18x18x128xf32, #tpu.memory_space<vmem>>, vector<18x18x128xf32>,
    %64 = vector.shape_cast %61 : vector<256x128xf32> to vector<16x16x128xf32>
    %c1_38 = arith.constant 1 : index
    %c1_39 = arith.constant 1 : index
    %c0_40 = arith.constant 0 : index
    %65 = vector.load %arg7[%c1_38, %c1_39, %c0_40] : memref<18x18x128xf32, #tpu.memory_space<vmem>>, vector<16x16x128xf32>
    tpu.vector_store %arg7[%c1_38, %c1_39, %c0_40], %64 {strides = array<i32>} : memref<18x18x128xf32, #tpu.memory_space<vmem>>, vector<16x16x128xf32>,
    %c0_41 = arith.constant 0 : index
    %c0_42 = arith.constant 0 : index
    %c0_43 = arith.constant 0 : index
    %66 = vector.load %arg7[%c0_41, %c0_42, %c0_43] : memref<18x18x128xf32, #tpu.memory_space<vmem>>, vector<18x18x128xf32>
    %cst_44 = arith.constant 0.000000e+00 : f32
    %67 = vector.broadcast %cst_44 : f32 to vector<256x128xf32>
    %68 = vector.extract_strided_slice %66 {offsets = [0, 0, 0], sizes = [16, 16, 128], strides = [1, 1, 1]} : vector<18x18x128xf32> to vector<16x16x128xf32>
    %69 = vector.shape_cast %68 : vector<16x16x128xf32> to vector<256x128xf32>
    %c0_45 = arith.constant 0 : index
    %c0_46 = arith.constant 0 : index
    %c0_47 = arith.constant 0 : index
    %70 = vector.load %arg4[%c0_45, %c0_46, %c0_47] : memref<9x128x128xf32, #tpu.memory_space<vmem>>, vector<1x128x128xf32>
    %71 = vector.shape_cast %70 : vector<1x128x128xf32> to vector<128x128xf32>
    %cst_48 = arith.constant dense<0.000000e+00> : vector<256x128xf32>
    %72 = tpu.matmul %69, %71, %cst_48 {dimension_numbers = #tpu.dot_dimension_numbers<[1], [0], [0], [1], [0, 0, 1, 1], [], []>} : vector<256x128xf32>, vector<128x128xf32>, vector<256x128xf32> -> vector<256x128xf32>
    %73 = arith.addf %67, %72 : vector<256x128xf32>
    %74 = vector.extract_strided_slice %66 {offsets = [0, 1, 0], sizes = [16, 16, 128], strides = [1, 1, 1]} : vector<18x18x128xf32> to vector<16x16x128xf32>
    %75 = vector.shape_cast %74 : vector<16x16x128xf32> to vector<256x128xf32>
    %c1_49 = arith.constant 1 : index
    %c0_50 = arith.constant 0 : index
    %c0_51 = arith.constant 0 : index
    %76 = vector.load %arg4[%c1_49, %c0_50, %c0_51] : memref<9x128x128xf32, #tpu.memory_space<vmem>>, vector<1x128x128xf32>
    %77 = vector.shape_cast %76 : vector<1x128x128xf32> to vector<128x128xf32>
    %cst_52 = arith.constant dense<0.000000e+00> : vector<256x128xf32>
    %78 = tpu.matmul %75, %77, %cst_52 {dimension_numbers = #tpu.dot_dimension_numbers<[1], [0], [0], [1], [0, 0, 1, 1], [], []>} : vector<256x128xf32>, vector<128x128xf32>, vector<256x128xf32> -> vector<256x128xf32>
    %79 = arith.addf %73, %78 : vector<256x128xf32>
    %80 = vector.extract_strided_slice %66 {offsets = [0, 2, 0], sizes = [16, 16, 128], strides = [1, 1, 1]} : vector<18x18x128xf32> to vector<16x16x128xf32>
    %81 = vector.shape_cast %80 : vector<16x16x128xf32> to vector<256x128xf32>
    %c2_53 = arith.constant 2 : index
    %c0_54 = arith.constant 0 : index
    %c0_55 = arith.constant 0 : index
    %82 = vector.load %arg4[%c2_53, %c0_54, %c0_55] : memref<9x128x128xf32, #tpu.memory_space<vmem>>, vector<1x128x128xf32>
    %83 = vector.shape_cast %82 : vector<1x128x128xf32> to vector<128x128xf32>
    %cst_56 = arith.constant dense<0.000000e+00> : vector<256x128xf32>
    %84 = tpu.matmul %81, %83, %cst_56 {dimension_numbers = #tpu.dot_dimension_numbers<[1], [0], [0], [1], [0, 0, 1, 1], [], []>} : vector<256x128xf32>, vector<128x128xf32>, vector<256x128xf32> -> vector<256x128xf32>
    %85 = arith.addf %79, %84 : vector<256x128xf32>
    %86 = vector.extract_strided_slice %66 {offsets = [1, 0, 0], sizes = [16, 16, 128], strides = [1, 1, 1]} : vector<18x18x128xf32> to vector<16x16x128xf32>
    %87 = vector.shape_cast %86 : vector<16x16x128xf32> to vector<256x128xf32>
    %c3_57 = arith.constant 3 : index
    %c0_58 = arith.constant 0 : index
    %c0_59 = arith.constant 0 : index
    %88 = vector.load %arg4[%c3_57, %c0_58, %c0_59] : memref<9x128x128xf32, #tpu.memory_space<vmem>>, vector<1x128x128xf32>
    %89 = vector.shape_cast %88 : vector<1x128x128xf32> to vector<128x128xf32>
    %cst_60 = arith.constant dense<0.000000e+00> : vector<256x128xf32>
    %90 = tpu.matmul %87, %89, %cst_60 {dimension_numbers = #tpu.dot_dimension_numbers<[1], [0], [0], [1], [0, 0, 1, 1], [], []>} : vector<256x128xf32>, vector<128x128xf32>, vector<256x128xf32> -> vector<256x128xf32>
    %91 = arith.addf %85, %90 : vector<256x128xf32>
    %92 = vector.extract_strided_slice %66 {offsets = [1, 1, 0], sizes = [16, 16, 128], strides = [1, 1, 1]} : vector<18x18x128xf32> to vector<16x16x128xf32>
    %93 = vector.shape_cast %92 : vector<16x16x128xf32> to vector<256x128xf32>
    %c4_61 = arith.constant 4 : index
    %c0_62 = arith.constant 0 : index
    %c0_63 = arith.constant 0 : index
    %94 = vector.load %arg4[%c4_61, %c0_62, %c0_63] : memref<9x128x128xf32, #tpu.memory_space<vmem>>, vector<1x128x128xf32>
    %95 = vector.shape_cast %94 : vector<1x128x128xf32> to vector<128x128xf32>
    %cst_64 = arith.constant dense<0.000000e+00> : vector<256x128xf32>
    %96 = tpu.matmul %93, %95, %cst_64 {dimension_numbers = #tpu.dot_dimension_numbers<[1], [0], [0], [1], [0, 0, 1, 1], [], []>} : vector<256x128xf32>, vector<128x128xf32>, vector<256x128xf32> -> vector<256x128xf32>
    %97 = arith.addf %91, %96 : vector<256x128xf32>
    %98 = vector.extract_strided_slice %66 {offsets = [1, 2, 0], sizes = [16, 16, 128], strides = [1, 1, 1]} : vector<18x18x128xf32> to vector<16x16x128xf32>
    %99 = vector.shape_cast %98 : vector<16x16x128xf32> to vector<256x128xf32>
    %c5_65 = arith.constant 5 : index
    %c0_66 = arith.constant 0 : index
    %c0_67 = arith.constant 0 : index
    %100 = vector.load %arg4[%c5_65, %c0_66, %c0_67] : memref<9x128x128xf32, #tpu.memory_space<vmem>>, vector<1x128x128xf32>
    %101 = vector.shape_cast %100 : vector<1x128x128xf32> to vector<128x128xf32>
    %cst_68 = arith.constant dense<0.000000e+00> : vector<256x128xf32>
    %102 = tpu.matmul %99, %101, %cst_68 {dimension_numbers = #tpu.dot_dimension_numbers<[1], [0], [0], [1], [0, 0, 1, 1], [], []>} : vector<256x128xf32>, vector<128x128xf32>, vector<256x128xf32> -> vector<256x128xf32>
    %103 = arith.addf %97, %102 : vector<256x128xf32>
    %104 = vector.extract_strided_slice %66 {offsets = [2, 0, 0], sizes = [16, 16, 128], strides = [1, 1, 1]} : vector<18x18x128xf32> to vector<16x16x128xf32>
    %105 = vector.shape_cast %104 : vector<16x16x128xf32> to vector<256x128xf32>
    %c6_69 = arith.constant 6 : index
    %c0_70 = arith.constant 0 : index
    %c0_71 = arith.constant 0 : index
    %106 = vector.load %arg4[%c6_69, %c0_70, %c0_71] : memref<9x128x128xf32, #tpu.memory_space<vmem>>, vector<1x128x128xf32>
    %107 = vector.shape_cast %106 : vector<1x128x128xf32> to vector<128x128xf32>
    %cst_72 = arith.constant dense<0.000000e+00> : vector<256x128xf32>
    %108 = tpu.matmul %105, %107, %cst_72 {dimension_numbers = #tpu.dot_dimension_numbers<[1], [0], [0], [1], [0, 0, 1, 1], [], []>} : vector<256x128xf32>, vector<128x128xf32>, vector<256x128xf32> -> vector<256x128xf32>
    %109 = arith.addf %103, %108 : vector<256x128xf32>
    %110 = vector.extract_strided_slice %66 {offsets = [2, 1, 0], sizes = [16, 16, 128], strides = [1, 1, 1]} : vector<18x18x128xf32> to vector<16x16x128xf32>
    %111 = vector.shape_cast %110 : vector<16x16x128xf32> to vector<256x128xf32>
    %c7_73 = arith.constant 7 : index
    %c0_74 = arith.constant 0 : index
    %c0_75 = arith.constant 0 : index
    %112 = vector.load %arg4[%c7_73, %c0_74, %c0_75] : memref<9x128x128xf32, #tpu.memory_space<vmem>>, vector<1x128x128xf32>
    %113 = vector.shape_cast %112 : vector<1x128x128xf32> to vector<128x128xf32>
    %cst_76 = arith.constant dense<0.000000e+00> : vector<256x128xf32>
    %114 = tpu.matmul %111, %113, %cst_76 {dimension_numbers = #tpu.dot_dimension_numbers<[1], [0], [0], [1], [0, 0, 1, 1], [], []>} : vector<256x128xf32>, vector<128x128xf32>, vector<256x128xf32> -> vector<256x128xf32>
    %115 = arith.addf %109, %114 : vector<256x128xf32>
    %116 = vector.extract_strided_slice %66 {offsets = [2, 2, 0], sizes = [16, 16, 128], strides = [1, 1, 1]} : vector<18x18x128xf32> to vector<16x16x128xf32>
    %117 = vector.shape_cast %116 : vector<16x16x128xf32> to vector<256x128xf32>
    %c8_77 = arith.constant 8 : index
    %c0_78 = arith.constant 0 : index
    %c0_79 = arith.constant 0 : index
    %118 = vector.load %arg4[%c8_77, %c0_78, %c0_79] : memref<9x128x128xf32, #tpu.memory_space<vmem>>, vector<1x128x128xf32>
    %119 = vector.shape_cast %118 : vector<1x128x128xf32> to vector<128x128xf32>
    %cst_80 = arith.constant dense<0.000000e+00> : vector<256x128xf32>
    %120 = tpu.matmul %117, %119, %cst_80 {dimension_numbers = #tpu.dot_dimension_numbers<[1], [0], [0], [1], [0, 0, 1, 1], [], []>} : vector<256x128xf32>, vector<128x128xf32>, vector<256x128xf32> -> vector<256x128xf32>
    %121 = arith.addf %115, %120 : vector<256x128xf32>
    %c0_81 = arith.constant 0 : index
    %c0_82 = arith.constant 0 : index
    %122 = vector.load %arg5[%c0_81, %c0_82] : memref<1x128xf32, #tpu.memory_space<vmem>>, vector<1x128xf32>
    %123 = vector.broadcast %122 : vector<1x128xf32> to vector<256x128xf32>
    %124 = arith.addf %121, %123 : vector<256x128xf32>
    %cst_83 = arith.constant 0.000000e+00 : f32
    %125 = vector.broadcast %cst_83 : f32 to vector<256x128xf32>
    %126 = arith.maximumf %124, %125 : vector<256x128xf32>
    %127 = vector.shape_cast %126 : vector<256x128xf32> to vector<1x16x16x128xf32>
    %c0_84 = arith.constant 0 : index
    %c0_85 = arith.constant 0 : index
    %c0_86 = arith.constant 0 : index
    %c0_87 = arith.constant 0 : index
    %128 = vector.load %arg6[%c0_84, %c0_85, %c0_86, %c0_87] : memref<1x16x16x128xf32, #tpu.memory_space<vmem>>, vector<1x16x16x128xf32>
    tpu.vector_store %arg6[%c0_84, %c0_85, %c0_86, %c0_87], %127 {strides = array<i32>} : memref<1x16x16x128xf32, #tpu.memory_space<vmem>>, vector<1x16x16x128xf32>,
    return
  }
  func.func @transform_0(%arg0: i32) -> (i32, i32, i32, i32) {
    %c0_i32 = arith.constant 0 : i32
    %c0_i32_0 = arith.constant 0 : i32
    %c0_i32_1 = arith.constant 0 : i32
    %c0_i32_2 = arith.constant 0 : i32
    return %arg0, %c0_i32, %c0_i32_0, %c0_i32_1 : i32, i32, i32, i32
  }
  func.func @transform_1(%arg0: i32) -> (i32, i32, i32) {
    %c0_i32 = arith.constant 0 : i32
    %c0_i32_0 = arith.constant 0 : i32
    %c0_i32_1 = arith.constant 0 : i32
    %c0_i32_2 = arith.constant 0 : i32
    return %c0_i32, %c0_i32_0, %c0_i32_1 : i32, i32, i32
  }
  func.func @transform_2(%arg0: i32) -> (i32, i32) {
    %c0_i32 = arith.constant 0 : i32
    %c0_i32_0 = arith.constant 0 : i32
    %c0_i32_1 = arith.constant 0 : i32
    return %c0_i32, %c0_i32_0 : i32, i32
  }
  func.func @transform_3(%arg0: i32) -> (i32, i32, i32) {
    %c0_i32 = arith.constant 0 : i32
    %c0_i32_0 = arith.constant 0 : i32
    %c0_i32_1 = arith.constant 0 : i32
    %c0_i32_2 = arith.constant 0 : i32
    return %c0_i32, %c0_i32_0, %c0_i32_1 : i32, i32, i32
  }
  func.func @transform_4(%arg0: i32) -> (i32, i32) {
    %c0_i32 = arith.constant 0 : i32
    %c0_i32_0 = arith.constant 0 : i32
    %c0_i32_1 = arith.constant 0 : i32
    return %c0_i32, %c0_i32_0 : i32, i32
  }
  func.func @transform_5(%arg0: i32) -> (i32, i32, i32, i32) {
    %c0_i32 = arith.constant 0 : i32
    %c0_i32_0 = arith.constant 0 : i32
    %c0_i32_1 = arith.constant 0 : i32
    %c0_i32_2 = arith.constant 0 : i32
    return %arg0, %c0_i32, %c0_i32_0, %c0_i32_1 : i32, i32, i32, i32
  }
}

</mosaic_0001>

<bundles_post_ra>
// kernel: tpu_custom_call.1
= control target key start
LH: loop header
LB: loop body
LE: loop exit
PB: predicated region body
PF: predicated region fallthrough
CT: control target
= control target key end

     0   :  { %10 = vsyncpa [#allocation4], 0  ;;  %s12162_s0 = inlined_call_operand.vmem [shape: f32[2,18,18,128], index: 0, kind: input, shape index: {}]   ;;  %s12163_s1 = inlined_call_operand.vmem [shape: f32[9,128,128], index: 1, kind: input, shape index: {}]   ;;  %s12164_s2 = inlined_call_operand.vmem [shape: f32[1,128], index: 2, kind: input, shape index: {}]   ;;  %s12165_s3 = inlined_call_operand.hbm [shape: f32[9,128,128], index: 3, kind: input, shape index: {}]   ;;  %s12166_s4 = inlined_call_operand.vmem [shape: f32[1,128], index: 4, kind: input, shape index: {}]   ;;  %s12167_s5 = inlined_call_operand.hbm [shape: f32[2,16,16,128], index: 5, kind: output, shape index: {}]  }
   0x1   :  { %11 = vsyncpa [#allocation5], 0 }
   0x2   :  { %13 = vsyncpa [#allocation5 + $0x1], 0  ;;  %s8805_s18 = smov 0   ;;  %s8807_s19 = smov 0  }
   0x3   :  { %s8809_s20 = smov 0   ;;  %s8811_s21 = smov 0  }
   0x4 LB: > { %s8826_s22 = sadd.s32 4294967295, %s8766_s21   ;;  %s6111_s23 = sadd.s32 4294967294, %s8766_s21   ;;  %s8766_s21 = sphi %s8811_s21, %s12746_s21   ;;  %s8762_s20 = sphi %s8809_s20, %s12745_s20   ;;  %s8758_s19 = sphi %s8807_s19, %s12744_s19   ;;  %s8754_s18 = sphi %s8805_s18, %s12743_s18  }
   0x5   : > { %s8830_s24 = sadd.s32 1, %s8766_s21   ;;  %s136_s25 = sadd.s32 1, %s8762_s20 }
   0x6   : > { %s133_s26 = ssub.s32 %s8766_s21, %s8830_s24  ;;  %p146_p0 = scmp.ne.s32.totalorder %s8762_s20, %s8758_s19 }
   0x7   : > { %p134_p1 = scmp.eq.s32.totalorder %s133_s26, 0  ;;  %p147_p2 = scmp.eq.s32.totalorder %s8826_s22, 1 }
   0x8   : > { %p152_p3 = scmp.ne.s32.totalorder %s8758_s19, %s8754_s18  ;;  %p153_p4 = scmp.eq.s32.totalorder %s6111_s23, 1 }
   0x9   : > { %s8841_s27 = scalar_select %p134_p1, %s8762_s20, %s136_s25  }
   0xa   : > { %p8843_p5 = por %p147_p2, %p146_p0  ;;  %p8847_p6 = por %p153_p4, %p152_p3 }
   0xb   : > { %p6112_p7 = scmp.ge.s32.totalorder %s8766_s21, 1  ;;  %p160_p8 = scmp.lt.s32.totalorder %s8766_s21, 3 }
   0xc   : > { %s12285_s29 = scalar_select %p8847_p6, 1, 0 }
   0xd   : > { %p8574_p9 = scmp.eq.s32.totalorder %s8826_s22, 0  ;;  %p8854_p10 = pnand %p6112_p7, %p160_p8 }
   0xe   : > { %s8768_s6 = smov [#allocation3]  }
   0xf   : > { %s178_s7 = sshll.u32 %s8768_s6, 4  ;;  %p8566_p11 = pneg %p8854_p10  ;;  %s179_s7 = int_to_ptr.vmem [resolvable:$true] %s178_s7 }
  0x10   : > { %s8687_s8 = scalar_lea.vmem %s179_s7, 18432  ;;  %p8695_p3 = scmp.lt.s32.totalorder %s179_s7, %s179_s7 }
  0x11   : > { %p8567_p12 = pnand %p8574_p9, %p8566_p11  ;;  %p8688_p0 = scmp.ne.s32.totalorder %s179_s7, %s8687_s8 }
  0x12   : > { %p8696_p4 = scmp.lt.s32.totalorder %s8687_s8, %s8687_s8 }
  0x13   : > { %p8678_p13 = pneg %p8567_p12 }
  0x14   : > { %p8697_p6 = por %p8696_p4, %p8695_p3 }
  0x15   : > { %p8690_p1 = pnand %p8688_p0, %p8678_p13 }
  0x17   : > { %p8691_p2 = pneg %p8690_p1 }
  0x19   : > { %p8698_p7 = pnand %p8697_p6, %p8691_p2 }
  0x1b   : > { %8701 = shalt.err (!%p8698_p7)
}
  0x1c   : > { %s8769_s9 = smov 128   ;;  %s8770_s10 = smov 8  }
  0x1d   : > { %8569 = dma.hbm_to_vmem [thread:$0]  (!%p8567_p12), %s12165_s3, 18432, %s179_s7, [#allocation4], %s8769_s9, %s8769_s9, %s8770_s10  }
  0x1e   : > { %205 = sbr.rel (%p8854_p10) target bundleno = 1081 (0x439), region = 40 }
  0x23   : > { %8745 = dma.done.wait (%p8574_p9), [#allocation4], 18432  }
  0x24   : > { %8747 = vsyncadd (%p8574_p9), [#allocation4], 4294948864  ;;  %v6134_v0 = vld [vmem:[%s12163_s1 + $0xf8] sm:$0xff]  ;;  %v6133_v2 = vld [vmem:[%s12163_s1 + $0xf0] sm:$0xff]  ;;  %p233_p6 = scmp.lt.s32.totalorder %s8826_s22, 1  ;;  %vm356_vm0 = vcmask 1046528  }
  0x25   : > { %v307_v1 = vld [vmem:[%s12163_s1 + $0x78] sm:$0xff]  ;;  %7119 = vmatprep.subr.mxu0 %v6134_v0  ;;  %v306_v3 = vld [vmem:[%s12163_s1 + $0x70] sm:$0xff]  ;;  %v6132_v4 = vld [vmem:[%s12163_s1 + $0xe8] sm:$0xff]  ;;  %vm936_vm1 = vcmask 1045504   ;;  %s230_s26 = sand.u32 1, %s8758_s19   ;;  %s6254_s8 = sshll.u32 %s8826_s22, 12 }
  0x26   : > { %7199 = vmatprep.subr.mxu1 %v307_v1  ;;  %7120 = vmatpush3.msra.mxu0 %v6134_v0  ;;  %v305_v5 = vld [vmem:[%s12163_s1 + $0x68] sm:$0xff]  ;;  %v6131_v6 = vld [vmem:[%s12163_s1 + $0xe0] sm:$0xff]  ;;  %v6130_v8 = vld [vmem:[%s12163_s1 + $0xd8] sm:$0xff]  ;;  %s234_s9 = scalar_select %p233_p6, %s8826_s22, 1 }
  0x27   : > { %7200 = vmatpush3.msra.mxu1 %v307_v1  ;;  %7121 = vmatprep.subr.mxu0 %v6133_v2  ;;  %v304_v7 = vld [vmem:[%s12163_s1 + $0x60] sm:$0xff]  ;;  %v303_v9 = vld [vmem:[%s12163_s1 + $0x58] sm:$0xff]  ;;  %v6129_v10 = vld [vmem:[%s12163_s1 + $0xd0] sm:$0xff]  ;;  %s6117_s6 = sshll.u32 %s230_s26, 8  ;;  %s12114_s12 = scalar_lea.hbm %s12167_s5, %s6254_s8 }
  0x28   : > { %7201 = vmatprep.subr.mxu1 %v306_v3  ;;  %7122 = vmatpush3.msra.mxu0 %v6133_v2  ;;  %v302_v11 = vld [vmem:[%s12163_s1 + $0x50] sm:$0xff]  ;;  %v6128_v12 = vld [vmem:[%s12163_s1 + $0xc8] sm:$0xff]  ;;  %v6127_v14 = vld [vmem:[%s12163_s1 + $0xc0] sm:$0xff]  ;;  %s8559_s23 = smul.u32 432, %s234_s9  ;;  %s11943_s7 = scalar_lea.vmem [#allocation6], %s6117_s6 }
  0x29   : > { %7202 = vmatpush3.msra.mxu1 %v306_v3  ;;  %7123 = vmatprep.subr.mxu0 %v6132_v4  ;;  %v301_v13 = vld [vmem:[%s12163_s1 + $0x48] sm:$0xff]  ;;  %v300_v15 = vld [vmem:[%s12163_s1 + $0x40] sm:$0xff]  ;;  %v6126_v16 = vld [vmem:[%s12163_s1 + $0xb8] sm:$0xff]  ;;  %s6037_s10 = sshll.u32 %s11943_s7, 4  ;;  %s12122_s22 = scalar_lea.sflag [#allocation5], %s230_s26  ;;  %s12116_s10 = int_to_ptr.vmem [resolvable:$true] %s6037_s10 }
  0x2a   : > { %7203 = vmatprep.subr.mxu1 %v305_v5  ;;  %7124 = vmatpush3.msra.mxu0 %v6132_v4  ;;  %v299_v17 = vld [vmem:[%s12163_s1 + $0x38] sm:$0xff]  ;;  %v6125_v18 = vld [vmem:[%s12163_s1 + $0xb0] sm:$0xff]  ;;  %v6124_v20 = vld [vmem:[%s12163_s1 + $0xa8] sm:$0xff]  ;;  %s8942_s13 = scalar_lea.vmem %s12162_s0, %s8559_s23  ;;  %s8702_s14 = scalar_lea.vmem %s12116_s10, 4096 }
  0x2b   : > { %7204 = vmatpush3.msra.mxu1 %v305_v5  ;;  %7125 = vmatprep.subr.mxu0 %v6131_v6  ;;  %v298_v19 = vld [vmem:[%s12163_s1 + $0x30] sm:$0xff]  ;;  %v297_v21 = vld [vmem:[%s12163_s1 + $0x28] sm:$0xff]  ;;  %v6123_v22 = vld [vmem:[%s12163_s1 + $0xa0] sm:$0xff]  ;;  %p8703_p8 = scmp.ne.s32.totalorder %s12116_s10, %s8702_s14  ;;  %s8772_s15 = smov [#allocation6]  }
  0x2c   : > { %7205 = vmatprep.subr.mxu1 %v304_v7  ;;  %7126 = vmatpush3.msra.mxu0 %v6131_v6  ;;  %v296_v23 = vld [vmem:[%s12163_s1 + $0x20] sm:$0xff]  ;;  %v6122_v24 = vld [vmem:[%s12163_s1 + $0x98] sm:$0xff]  ;;  %v8960_v27 = vld [vmem:[%s8942_s13 + $0x8] sm:$0xff]  ;;  %s8706_s16 = sshll.u32 %s8772_s15, 4  ;;  %s8707_s16 = int_to_ptr.vmem [resolvable:$false] %s8706_s16 }
  0x2d   : > { %7206 = vmatpush3.msra.mxu1 %v304_v7  ;;  %7127 = vmatprep.subr.mxu0 %v6130_v8  ;;  %v295_v25 = vld [vmem:[%s12163_s1 + $0x18] sm:$0xff]  ;;  %v8957_v26 = vld [vmem:[%s8942_s13] sm:$0xff]  ;;  %v6121_v28 = vld [vmem:[%s12163_s1 + $0x90] sm:$0xff]  ;;  %v358_v32 = vrot.slane %v8960_v27, 1  ;;  %p8704_p9 = pnand %p8703_p8, %p8843_p5  ;;  %s8708_s17 = scalar_lea.vmem %s8707_s16, 8192 }
  0x2e   : > { %7207 = vmatprep.subr.mxu1 %v303_v9  ;;  %7128 = vmatpush3.msra.mxu0 %v6130_v8  ;;  %v294_v29 = vld [vmem:[%s12163_s1 + $0x10] sm:$0xff]  ;;  %v357_v31 = vrot.slane %v8957_v26, 1  ;;  %v8974_v33 = vld [vmem:[%s8942_s13 + $0x18] sm:$0xff]  ;;  %v8977_v34 = vld [vmem:[%s8942_s13 + $0x20] sm:$0xff]  ;;  %p8709_p11 = scmp.lt.s32.totalorder %s12116_s10, %s8707_s16  ;;  %p8710_p12 = scmp.lt.s32.totalorder %s8708_s17, %s8702_s14 }
  0x2f   : > { %7208 = vmatpush3.msra.mxu1 %v303_v9  ;;  %7129 = vmatprep.subr.mxu0 %v6129_v10  ;;  %v8969_v30 = vld [vmem:[%s8942_s13 + $0x10] sm:$0x3]  ;;  %v6120_v35 = vld [vmem:[%s12163_s1 + $0x88] sm:$0xff]  ;;  %v6119_v38 = vld [vmem:[%s12163_s1 + $0x80] sm:$0xff]  ;;  %v362_v40 = vrot.slane %v8974_v33, 1  ;;  %v363_v41 = vrot.slane %v8977_v34, 1  ;;  %p8705_p10 = pneg %p8704_p9 }
  0x30   : > { %7209 = vmatprep.subr.mxu1 %v302_v11  ;;  %7130 = vmatpush3.msra.mxu0 %v6129_v10  ;;  %v293_v36 = vld [vmem:[%s12163_s1 + $0x8] sm:$0xff]  ;;  %v360_v37 = vrot.slane %v8969_v30, 1  ;;  %v292_v39 = vld [vmem:[%s12163_s1] sm:$0xff]  ;;  %v359_v43 = vsel %vm356_vm0, %v357_v31, %v358_v32  ;;  %v8999_v44 = vld [vmem:[%s8942_s13 + $0x30] sm:$0xff]  ;;  %p8711_p13 = por %p8710_p12, %p8709_p11 }
  0x31   : > { %7210 = vmatpush3.msra.mxu1 %v302_v11  ;;  %7131 = vmatprep.subr.mxu0 %v6128_v12  ;;  %v8995_v42 = vld [vmem:[%s8942_s13 + $0x28] sm:$0x3]  ;;  %v9002_v45 = vld [vmem:[%s8942_s13 + $0x38] sm:$0xff]  ;;  %v9010_v49 = vsel %vm356_vm0, %v362_v40, %v363_v41  ;;  %v367_v50 = vrot.slane %v8999_v44, 1  ;;  %v9015_v52 = vld [vmem:[%s8942_s13 + $0x40] sm:$0x3] }
  0x32   : > { %7211 = vmatprep.subr.mxu1 %v301_v13  ;;  %7132 = vmatpush3.msra.mxu0 %v6128_v12  ;;  %v361_v46 = vsel %vm356_vm0, %v358_v32, %v360_v37  ;;  %v365_v47 = vrot.slane %v8995_v42, 1  ;;  %v6150_v48 = vld [vmem:[%s12163_s1 + $0x178] sm:$0xff]  ;;  %v368_v51 = vrot.slane %v9002_v45, 1  ;;  %v9019_v53 = vld [vmem:[%s8942_s13 + $0x48] sm:$0xff]  ;;  %v9022_v54 = vld [vmem:[%s8942_s13 + $0x50] sm:$0xff]  ;;  %v370_v58 = vrot.slane %v9015_v52, 1  ;;  %p8712_p0 = pnand %p8711_p13, %p8705_p10 }
  0x33   : > { %7212 = vmatpush3.msra.mxu1 %v301_v13  ;;  %7133 = vmatprep.subr.mxu0 %v6127_v14  ;;  %v6149_v55 = vld [vmem:[%s12163_s1 + $0x170] sm:$0xff]  ;;  %v6166_v56 = vld [vmem:[%s12163_s1 + $0x1f8] sm:$0xff]  ;;  %v372_v60 = vrot.slane %v9019_v53, 1  ;;  %v373_v61 = vrot.slane %v9022_v54, 1  ;;  %v6148_v63 = vld [vmem:[%s12163_s1 + $0x168] sm:$0xff] }
  0x34   : > { %7213 = vmatprep.subr.mxu1 %v300_v15  ;;  %7134 = vmatpush3.msra.mxu0 %v6127_v14  ;;  %v9033_v57 = vsel %vm356_vm0, %v363_v41, %v365_v47  ;;  %v9038_v59 = vsel %vm356_vm0, %v367_v50, %v368_v51  ;;  %v9043_v62 = vld [vmem:[%s8942_s13 + $0x58] sm:$0x3]  ;;  %v9049_v0 = vld [vmem:[%s8942_s13 + $0x60] sm:$0xff]  ;;  %v9052_v1 = vld [vmem:[%s8942_s13 + $0x68] sm:$0xff]  ;;  %v9058_v2 = vsel %vm356_vm0, %v368_v51, %v370_v58 }
  0x35   : > { %7214 = vmatpush3.msra.mxu1 %v300_v15  ;;  %7135 = vmatprep.subr.mxu0 %v6126_v16  ;;  %v375_v3 = vrot.slane %v9043_v62, 1  ;;  %v9063_v4 = vsel %vm356_vm0, %v372_v60, %v373_v61  ;;  %v6147_v5 = vld [vmem:[%s12163_s1 + $0x160] sm:$0xff]  ;;  %v377_v6 = vrot.slane %v9049_v0, 1  ;;  %v378_v7 = vrot.slane %v9052_v1, 1  ;;  %v9071_v8 = vld [vmem:[%s8942_s13 + $0x70] sm:$0x3] }
  0x36   : > { %7215 = vmatprep.subr.mxu1 %v299_v17  ;;  %7136 = vmatpush3.msra.mxu0 %v6126_v16  ;;  %12287 = vst [vmem:[#allocation9_spill] sm:$0xff] %v9063_v4  ;;  %v9074_v9 = vld [vmem:[%s8942_s13 + $0x78] sm:$0xff]  ;;  %v9077_v10 = vld [vmem:[%s8942_s13 + $0x80] sm:$0xff]  ;;  %v6165_v11 = vld [vmem:[%s12163_s1 + $0x1f0] sm:$0xff]  ;;  %v380_v13 = vrot.slane %v9071_v8, 1 }
  0x37   : > { %7216 = vmatpush3.msra.mxu1 %v299_v17  ;;  %7137 = vmatprep.subr.mxu0 %v6125_v18  ;;  %v9087_v12 = vsel %vm356_vm0, %v373_v61, %v375_v3  ;;  %v9091_v14 = vsel %vm356_vm0, %v377_v6, %v378_v7  ;;  %v6146_v15 = vld [vmem:[%s12163_s1 + $0x158] sm:$0xff]  ;;  %v382_v16 = vrot.slane %v9074_v9, 1  ;;  %v383_v17 = vrot.slane %v9077_v10, 1  ;;  %v9127_v31 = vld [vmem:[%s8942_s13 + $0xa0] sm:$0x3]  ;;  %v9130_v32 = vld [vmem:[%s8942_s13 + $0xa8] sm:$0xff] }
  0x38   : > { %7217 = vmatprep.subr.mxu1 %v298_v19  ;;  %7138 = vmatpush3.msra.mxu0 %v6125_v18  ;;  %12288 = vst [vmem:[#allocation10_spill] sm:$0xff] %v9087_v12  ;;  %12289 = vst [vmem:[#allocation11_spill] sm:$0xff] %v9091_v14  ;;  %v9099_v18 = vld [vmem:[%s8942_s13 + $0x88] sm:$0x3]  ;;  %v392_v41 = vrot.slane %v9130_v32, 1  ;;  %v9158_v47 = vld [vmem:[%s8942_s13 + $0xc0] sm:$0xff] }
  0x39   : > { %7218 = vmatpush3.msra.mxu1 %v298_v19  ;;  %7139 = vmatprep.subr.mxu0 %v6124_v20  ;;  %v9102_v19 = vld [vmem:[%s8942_s13 + $0x90] sm:$0xff]  ;;  %v6144_v40 = vld [vmem:[%s12163_s1 + $0x148] sm:$0xff]  ;;  %v6162_v50 = vld [vmem:[%s12163_s1 + $0x1d8] sm:$0xff]  ;;  %v397_v60 = vrot.slane %v9158_v47, 1 }
  0x3a   : > { %7219 = vmatprep.subr.mxu1 %v297_v21  ;;  %7140 = vmatpush3.msra.mxu0 %v6124_v20  ;;  %v9105_v20 = vld [vmem:[%s8942_s13 + $0x98] sm:$0xff]  ;;  %v6143_v58 = vld [vmem:[%s12163_s1 + $0x140] sm:$0xff]  ;;  %v6161_v6 = vld [vmem:[%s12163_s1 + $0x1d0] sm:$0xff] }
  0x3b   : > { %7220 = vmatpush3.msra.mxu1 %v297_v21  ;;  %7141 = vmatprep.subr.mxu0 %v6123_v22  ;;  %v6164_v21 = vld [vmem:[%s12163_s1 + $0x1e8] sm:$0xff]  ;;  %v9186_v3 = vld [vmem:[%s8942_s13 + $0xd8] sm:$0xff] }
  0x3c   : > { %7221 = vmatprep.subr.mxu1 %v296_v23  ;;  %7142 = vmatpush3.msra.mxu0 %v6123_v22  ;;  %v9115_v22 = vsel %vm356_vm0, %v378_v7, %v380_v13 }
  0x3d   : > { %7222 = vmatpush3.msra.mxu1 %v296_v23  ;;  %7143 = vmatprep.subr.mxu0 %v6122_v24  ;;  %12290 = vst [vmem:[#allocation12_spill] sm:$0xff] %v9115_v22  ;;  %v385_v23 = vrot.slane %v9099_v18, 1 }
  0x3e   : > { %7223 = vmatprep.subr.mxu1 %v295_v25  ;;  %7144 = vmatpush3.msra.mxu0 %v6122_v24  ;;  %v9119_v24 = vsel %vm356_vm0, %v382_v16, %v383_v17  ;;  %v402_v16 = vrot.slane %v9186_v3, 1 }
  0x3f   : > { %7224 = vmatpush3.msra.mxu1 %v295_v25  ;;  %7145 = vmatprep.subr.mxu0 %v6121_v28  ;;  %12291 = vst [vmem:[#allocation13_spill] sm:$0xff] %v9119_v24  ;;  %v6145_v25 = vld [vmem:[%s12163_s1 + $0x150] sm:$0xff]  ;;  %v9143_v37 = vsel %vm356_vm0, %v383_v17, %v385_v23 }
  0x40   : > { %7225 = vmatprep.subr.mxu1 %v294_v29  ;;  %7146 = vmatpush3.msra.mxu0 %v6121_v28  ;;  %v387_v28 = vrot.slane %v9102_v19, 1  ;;  %12292 = vst [vmem:[#allocation14_spill] sm:$0xff] %v9143_v37  ;;  %v9214_v23 = vld [vmem:[%s8942_s13 + $0xf0] sm:$0xff] }
  0x41   : > { %7226 = vmatpush3.msra.mxu1 %v294_v29  ;;  %7147 = vmatprep.subr.mxu0 %v6120_v35  ;;  %v388_v29 = vrot.slane %v9105_v20, 1 }
  0x42   : > { %7227 = vmatprep.subr.mxu1 %v293_v36  ;;  %7148 = vmatpush3.msra.mxu0 %v6120_v35  ;;  %v9133_v35 = vld [vmem:[%s8942_s13 + $0xb0] sm:$0xff] }
  0x43   : > { %7228 = vmatpush3.msra.mxu1 %v293_v36  ;;  %7149 = vmatprep.subr.mxu0 %v6119_v38  ;;  %v6163_v36 = vld [vmem:[%s12163_s1 + $0x1e0] sm:$0xff] }
  0x44   : > { %7229 = vmatprep.subr.mxu1 %v292_v39  ;;  %7150 = vmatpush3.msra.mxu0 %v6119_v38  ;;  %v390_v38 = vrot.slane %v9127_v31, 1 }
  0x45   : > { %7151 = vmatprep.mubr.f32.mxu0 %v359_v43  ;;  %7230 = vmatpush3.msra.mxu1 %v292_v39  ;;  %v9147_v39 = vsel %vm356_vm0, %v387_v28, %v388_v29  ;;  %v393_v43 = vrot.slane %v9133_v35, 1  ;;  %v6160_v28 = vld [vmem:[%s12163_s1 + $0x1c8] sm:$0xff] }
  0x46   : > { %7231 = vmatprep.mubr.f32.mxu1 %v8957_v26  ;;  %7152 = vmatmul.mubr.f32.vlgmr.msra.gmra.mxu0 %v361_v46  ;;  %12293 = vst [vmem:[#allocation15_spill] sm:$0xff] %v9147_v39  ;;  %v9155_v46 = vld [vmem:[%s8942_s13 + $0xb8] sm:$0x3]  ;;  %v9171_v51 = vsel %vm356_vm0, %v388_v29, %v390_v38 }
  0x47   : > { %7232 = vmatmul.mubr.f32.vlgmr.msra.gmra.mxu1 %v8960_v27  ;;  %7279 = vmatprep.subr.mxu0 %v6150_v48  ;;  %12294 = vst [vmem:[#allocation16_spill] sm:$0xff] %v9171_v51 }
  0x48   : > { %7154 = vmatprep.mubr.f32.mxu0 %v9010_v49  ;;  %7280 = vmatpush3.msra.mxu0 %v6150_v48  ;;  %v9161_v48 = vld [vmem:[%s8942_s13 + $0xc8] sm:$0xff] }
  0x49   : > { %7234 = vmatprep.mubr.f32.mxu1 %v8974_v33  ;;  %7281 = vmatprep.subr.mxu0 %v6149_v55  ;;  %v398_v61 = vrot.slane %v9161_v48, 1 }
  0x4a   : > { %7359 = vmatprep.subr.mxu1 %v6166_v56  ;;  %7155 = vmatmul.mubr.f32.gmra.mxu0 %v9033_v57 }
  0x4b   : > { %7235 = vmatmul.mubr.f32.gmra.mxu1 %v8977_v34  ;;  %7282 = vmatpush3.msra.mxu0 %v6149_v55  ;;  %v395_v55 = vrot.slane %v9155_v46, 1  ;;  %v9203_v13 = vsel %vm356_vm0, %v397_v60, %v398_v61  ;;  %v6159_v60 = vld [vmem:[%s12163_s1 + $0x1c0] sm:$0xff] }
  0x4c   : > { %7157 = vmatprep.mubr.f32.mxu0 %v9038_v59  ;;  %7237 = vmatprep.mubr.f32.mxu1 %v8999_v44  ;;  %12297 = vst [vmem:[#allocation19_spill] sm:$0xff] %v9203_v13 }
  0x4d   : > { %7283 = vmatprep.subr.mxu0 %v6148_v63  ;;  %7360 = vmatpush3.msra.mxu1 %v6166_v56  ;;  %v9175_v56 = vsel %vm356_vm0, %v392_v41, %v393_v43  ;;  %v9199_v7 = vsel %vm356_vm0, %v393_v43, %v395_v55  ;;  %v407_v41 = vrot.slane %v9214_v23, 1  ;;  %v9242_v55 = vld [vmem:[%s8942_s13 + $0x108] sm:$0xff] }
  0x4e   : > { %7284 = vmatpush3.msra.mxu0 %v6148_v63  ;;  %7361 = vmatprep.subr.mxu1 %v6165_v11  ;;  %12295 = vst [vmem:[#allocation17_spill] sm:$0xff] %v9175_v56  ;;  %v9183_v63 = vld [vmem:[%s8942_s13 + $0xd0] sm:$0x3]  ;;  %12296 = vst [vmem:[#allocation18_spill] sm:$0xff] %v9199_v7 }
  0x4f   : > { %7158 = vmatmul.mubr.f32.gmra.mxu0 %v9058_v2  ;;  %7238 = vmatmul.mubr.f32.gmra.mxu1 %v9002_v45 }
  0x50   : > { %7160 = vmatprep.mubr.f32.mxu0 %v9063_v4  ;;  %7240 = vmatprep.mubr.f32.mxu1 %v9019_v53  ;;  %v9376_v4 = vld [vmem:[%s8942_s13 + $0x178] sm:$0x3] }
  0x51   : > { %7285 = vmatprep.subr.mxu0 %v6147_v5  ;;  %7362 = vmatpush3.msra.mxu1 %v6165_v11  ;;  %v400_v11 = vrot.slane %v9183_v63, 1 }
  0x52   : > { %7286 = vmatpush3.msra.mxu0 %v6147_v5  ;;  %7363 = vmatprep.subr.mxu1 %v6164_v21  ;;  %v9189_v5 = vld [vmem:[%s8942_s13 + $0xe0] sm:$0xff] }
  0x53   : > { %7161 = vmatmul.mubr.f32.gmra.mxu0 %v9087_v12  ;;  %7241 = vmatmul.mubr.f32.gmra.mxu1 %v9022_v54  ;;  %v403_v17 = vrot.slane %v9189_v5, 1  ;;  %v9227_v29 = vsel %vm356_vm0, %v398_v61, %v400_v11 }
  0x54   : > { %7163 = vmatprep.mubr.f32.mxu0 %v9091_v14  ;;  %7243 = vmatprep.mubr.f32.mxu1 %v9049_v0  ;;  %12298 = vst [vmem:[#allocation20_spill] sm:$0xff] %v9227_v29 }
  0x55   : > { %7287 = vmatprep.subr.mxu0 %v6146_v15  ;;  %7364 = vmatpush3.msra.mxu1 %v6164_v21  ;;  %v9211_v21 = vld [vmem:[%s8942_s13 + $0xe8] sm:$0x3]  ;;  %v9231_v38 = vsel %vm356_vm0, %v402_v16, %v403_v17  ;;  %v412_v16 = vrot.slane %v9242_v55, 1 }
  0x56   : > { %7288 = vmatpush3.msra.mxu0 %v6146_v15  ;;  %7365 = vmatprep.subr.mxu1 %v6163_v36  ;;  %v6142_v15 = vld [vmem:[%s12163_s1 + $0x138] sm:$0xff]  ;;  %12299 = vst [vmem:[#allocation21_spill] sm:$0xff] %v9231_v38 }
  0x57   : > { %7164 = vmatmul.mubr.f32.gmra.mxu0 %v9115_v22  ;;  %7244 = vmatmul.mubr.f32.gmra.mxu1 %v9052_v1  ;;  %v9351_v22 = vld [vmem:[%s8942_s13 + $0x160] sm:$0x3] }
  0x58   : > { %7166 = vmatprep.mubr.f32.mxu0 %v9119_v24  ;;  %7246 = vmatprep.mubr.f32.mxu1 %v9074_v9 }
  0x59   : > { %7289 = vmatprep.subr.mxu0 %v6145_v25  ;;  %7366 = vmatpush3.msra.mxu1 %v6163_v36  ;;  %v405_v36 = vrot.slane %v9211_v21, 1 }
  0x5a   : > { %7290 = vmatpush3.msra.mxu0 %v6145_v25  ;;  %7367 = vmatprep.subr.mxu1 %v6162_v50  ;;  %v9217_v25 = vld [vmem:[%s8942_s13 + $0xf8] sm:$0xff] }
  0x5b   : > { %7167 = vmatmul.mubr.f32.gmra.mxu0 %v9143_v37  ;;  %7247 = vmatmul.mubr.f32.gmra.mxu1 %v9077_v10  ;;  %v408_v43 = vrot.slane %v9217_v25, 1  ;;  %v9255_v61 = vsel %vm356_vm0, %v403_v17, %v405_v36  ;;  %v9270_v17 = vld [vmem:[%s8942_s13 + $0x120] sm:$0xff]  ;;  %v9273_v36 = vld [vmem:[%s8942_s13 + $0x128] sm:$0xff] }
  0x5c   : > { %7169 = vmatprep.mubr.f32.mxu0 %v9147_v39  ;;  %7249 = vmatprep.mubr.f32.mxu1 %v9102_v19  ;;  %12300 = vst [vmem:[#allocation22_spill] sm:$0xff] %v9255_v61 }
  0x5d   : > { %7291 = vmatprep.subr.mxu0 %v6144_v40  ;;  %7368 = vmatpush3.msra.mxu1 %v6162_v50  ;;  %v9239_v50 = vld [vmem:[%s8942_s13 + $0x100] sm:$0x3]  ;;  %v9259_v11 = vsel %vm356_vm0, %v407_v41, %v408_v43  ;;  %v6158_v41 = vld [vmem:[%s12163_s1 + $0x1b8] sm:$0xff] }
  0x5e   : > { %7292 = vmatpush3.msra.mxu0 %v6144_v40  ;;  %7369 = vmatprep.subr.mxu1 %v6161_v6  ;;  %v6141_v40 = vld [vmem:[%s12163_s1 + $0x130] sm:$0xff]  ;;  %12301 = vst [vmem:[#allocation23_spill] sm:$0xff] %v9259_v11 }
  0x5f   : > { %7170 = vmatmul.mubr.f32.gmra.mxu0 %v9171_v51  ;;  %7250 = vmatmul.mubr.f32.gmra.mxu1 %v9105_v20 }
  0x60   : > { %7172 = vmatprep.mubr.f32.mxu0 %v9175_v56  ;;  %7252 = vmatprep.mubr.f32.mxu1 %v9130_v32 }
  0x61   : > { %7293 = vmatprep.subr.mxu0 %v6143_v58  ;;  %7370 = vmatpush3.msra.mxu1 %v6161_v6  ;;  %v410_v6 = vrot.slane %v9239_v50, 1 }
  0x62   : > { %7294 = vmatpush3.msra.mxu0 %v6143_v58  ;;  %7371 = vmatprep.subr.mxu1 %v6160_v28  ;;  %v9245_v58 = vld [vmem:[%s8942_s13 + $0x110] sm:$0xff] }
  0x63   : > { %7173 = vmatmul.mubr.f32.gmra.mxu0 %v9199_v7  ;;  %7253 = vmatmul.mubr.f32.gmra.mxu1 %v9133_v35  ;;  %v418_v7 = vrot.slane %v9273_v36, 1 }
  0x64   : > { %7175 = vmatprep.mubr.f32.mxu0 %v9203_v13  ;;  %7255 = vmatprep.mubr.f32.mxu1 %v9158_v47  ;;  %v6139_v13 = vld [vmem:[%s12163_s1 + $0x120] sm:$0xff] }
  0x65   : > { %7295 = vmatprep.subr.mxu0 %v6142_v15  ;;  %7372 = vmatpush3.msra.mxu1 %v6160_v28  ;;  %v413_v28 = vrot.slane %v9245_v58, 1 }
  0x66   : > { %7296 = vmatpush3.msra.mxu0 %v6142_v15  ;;  %v6140_v15 = vld [vmem:[%s12163_s1 + $0x128] sm:$0xff]  ;;  %7373 = vmatprep.subr.mxu1 %v6159_v60 }
  0x67   : > { %7176 = vmatmul.mubr.f32.gmra.mxu0 %v9227_v29  ;;  %7256 = vmatmul.mubr.f32.gmra.mxu1 %v9161_v48 }
  0x68   : > { %7178 = vmatprep.mubr.f32.mxu0 %v9231_v38  ;;  %7258 = vmatprep.mubr.f32.mxu1 %v9186_v3  ;;  %v9267_v38 = vld [vmem:[%s8942_s13 + $0x118] sm:$0x3] }
  0x69   : > { %7297 = vmatprep.subr.mxu0 %v6141_v40  ;;  %7374 = vmatpush3.msra.mxu1 %v6159_v60  ;;  %v415_v29 = vrot.slane %v9267_v38, 1  ;;  %v9287_v60 = vsel %vm356_vm0, %v412_v16, %v413_v28  ;;  %v6157_v16 = vld [vmem:[%s12163_s1 + $0x1b0] sm:$0xff] }
  0x6a   : > { %7298 = vmatpush3.msra.mxu0 %v6141_v40  ;;  %v9283_v40 = vsel %vm356_vm0, %v408_v43, %v410_v6  ;;  %12303 = vst [vmem:[#allocation25_spill] sm:$0xff] %v9287_v60  ;;  %7375 = vmatprep.subr.mxu1 %v6158_v41  ;;  %v9298_v43 = vld [vmem:[%s8942_s13 + $0x138] sm:$0xff]  ;;  %v9301_v6 = vld [vmem:[%s8942_s13 + $0x140] sm:$0xff] }
  0x6b   : > { %7179 = vmatmul.mubr.f32.gmra.mxu0 %v9255_v61  ;;  %7259 = vmatmul.mubr.f32.gmra.mxu1 %v9189_v5  ;;  %12302 = vst [vmem:[#allocation24_spill] sm:$0xff] %v9283_v40  ;;  %v417_v61 = vrot.slane %v9270_v17, 1  ;;  %v422_v51 = vrot.slane %v9298_v43, 1  ;;  %v423_v39 = vrot.slane %v9301_v6, 1 }
  0x6c   : > { %7181 = vmatprep.mubr.f32.mxu0 %v9259_v11  ;;  %7261 = vmatprep.mubr.f32.mxu1 %v9214_v23  ;;  %v9295_v11 = vld [vmem:[%s8942_s13 + $0x130] sm:$0x3] }
  0x6d   : > { %7299 = vmatprep.subr.mxu0 %v6140_v15  ;;  %7376 = vmatpush3.msra.mxu1 %v6158_v41  ;;  %v420_v56 = vrot.slane %v9295_v11, 1  ;;  %v9315_v41 = vsel %vm356_vm0, %v417_v61, %v418_v7  ;;  %v9329_v61 = vld [vmem:[%s8942_s13 + $0x150] sm:$0xff]  ;;  %v9343_v37 = vsel %vm356_vm0, %v422_v51, %v423_v39  ;;  %v9357_v51 = vld [vmem:[%s8942_s13 + $0x168] sm:$0xff] }
  0x6e   : > { %7300 = vmatpush3.msra.mxu0 %v6140_v15  ;;  %v9311_v15 = vsel %vm356_vm0, %v413_v28, %v415_v29  ;;  %12305 = vst [vmem:[#allocation27_spill] sm:$0xff] %v9315_v41  ;;  %7377 = vmatprep.subr.mxu1 %v6157_v16  ;;  %v6156_v29 = vld [vmem:[%s12163_s1 + $0x1a8] sm:$0xff]  ;;  %v9332_v28 = vld [vmem:[%s8942_s13 + $0x158] sm:$0xff]  ;;  %12307 = vst [vmem:[#allocation29_spill] sm:$0xff] %v9343_v37  ;;  %v427_v24 = vrot.slane %v9329_v61, 1  ;;  %v432_v12 = vrot.slane %v9357_v51, 1 }
  0x6f   : > { %7182 = vmatmul.mubr.f32.gmra.mxu0 %v9283_v40  ;;  %7262 = vmatmul.mubr.f32.gmra.mxu1 %v9217_v25  ;;  %12304 = vst [vmem:[#allocation26_spill] sm:$0xff] %v9311_v15  ;;  %v6138_v40 = vld [vmem:[%s12163_s1 + $0x118] sm:$0xff] }
  0x70   : > { %7184 = vmatprep.mubr.f32.mxu0 %v9287_v60  ;;  %7264 = vmatprep.mubr.f32.mxu1 %v9242_v55  ;;  %v9323_v60 = vld [vmem:[%s8942_s13 + $0x148] sm:$0x3] }
  0x71   : > { %7301 = vmatprep.subr.mxu0 %v6139_v13  ;;  %7378 = vmatpush3.msra.mxu1 %v6157_v16  ;;  %v425_v16 = vrot.slane %v9323_v60, 1 }
  0x72   : > { %7302 = vmatpush3.msra.mxu0 %v6139_v13  ;;  %v9339_v13 = vsel %vm356_vm0, %v418_v7, %v420_v56  ;;  %7379 = vmatprep.subr.mxu1 %v6156_v29  ;;  %v6155_v56 = vld [vmem:[%s12163_s1 + $0x1a0] sm:$0xff]  ;;  %v9360_v7 = vld [vmem:[%s8942_s13 + $0x170] sm:$0xff] }
  0x73   : > { %7185 = vmatmul.mubr.f32.gmra.mxu0 %v9311_v15  ;;  %7265 = vmatmul.mubr.f32.gmra.mxu1 %v9245_v58  ;;  %12306 = vst [vmem:[#allocation28_spill] sm:$0xff] %v9339_v13  ;;  %v6137_v15 = vld [vmem:[%s12163_s1 + $0x110] sm:$0xff] }
  0x74   : > { %7187 = vmatprep.mubr.f32.mxu0 %v9315_v41  ;;  %7267 = vmatprep.mubr.f32.mxu1 %v9270_v17  ;;  %v428_v41 = vrot.slane %v9332_v28, 1 }
  0x75   : > { %7303 = vmatprep.subr.mxu0 %v6138_v40  ;;  %7380 = vmatpush3.msra.mxu1 %v6156_v29  ;;  %v430_v29 = vrot.slane %v9351_v22, 1 }
  0x76   : > { %7304 = vmatpush3.msra.mxu0 %v6138_v40  ;;  %v9367_v40 = vsel %vm356_vm0, %v423_v39, %v425_v16  ;;  %v9371_v14 = vsel %vm356_vm0, %v427_v24, %v428_v41  ;;  %7381 = vmatprep.subr.mxu1 %v6155_v56  ;;  %v6154_v39 = vld [vmem:[%s12163_s1 + $0x198] sm:$0xff] }
  0x77   : > { %7188 = vmatmul.mubr.f32.gmra.mxu0 %v9339_v13  ;;  %7268 = vmatmul.mubr.f32.gmra.mxu1 %v9273_v36  ;;  %12308 = vst [vmem:[#allocation30_spill] sm:$0xff] %v9367_v40  ;;  %12309 = vst [vmem:[#allocation31_spill] sm:$0xff] %v9371_v14  ;;  %v433_v13 = vrot.slane %v9360_v7, 1  ;;  %v9389_v24 = vsel %vm356_vm0, %v428_v41, %v430_v29  ;;  %v6153_v41 = vld [vmem:[%s12163_s1 + $0x190] sm:$0xff]  ;;  %v942_v29 = vrot.slane %v8974_v33, 2 }
  0x78   : > { %7190 = vmatprep.mubr.f32.mxu0 %v9343_v37  ;;  %7270 = vmatprep.mubr.f32.mxu1 %v9298_v43  ;;  %v6136_v37 = vld [vmem:[%s12163_s1 + $0x108] sm:$0xff] }
  0x79   : > { %7305 = vmatprep.subr.mxu0 %v6137_v15  ;;  %7382 = vmatpush3.msra.mxu1 %v6155_v56  ;;  %v9393_v16 = vsel %vm356_vm0, %v432_v12, %v433_v13  ;;  %v937_v56 = vrot.slane %v8957_v26, 2  ;;  %v940_v12 = vrot.slane %v8969_v30, 2  ;;  %v6182_v30 = vld [vmem:[%s12163_s1 + $0x278] sm:$0xff] }
  0x7a   : > { %7306 = vmatpush3.msra.mxu0 %v6137_v15  ;;  %v435_v15 = vrot.slane %v9376_v4, 1  ;;  %7383 = vmatprep.subr.mxu1 %v6154_v39 }
  0x7b   : > { %7191 = vmatmul.mubr.f32.gmra.mxu0 %v9367_v40  ;;  %7271 = vmatmul.mubr.f32.gmra.mxu1 %v9301_v6  ;;  %v938_v40 = vrot.slane %v8960_v27, 2  ;;  %v6152_v27 = vld [vmem:[%s12163_s1 + $0x188] sm:$0xff] }
  0x7c   : > { %7193 = vmatprep.mubr.f32.mxu0 %v9371_v14  ;;  %7273 = vmatprep.mubr.f32.mxu1 %v9329_v61  ;;  %v6135_v14 = vld [vmem:[%s12163_s1 + $0x100] sm:$0xff]  ;;  %v9409_v26 = vsel %vm356_vm0, %v433_v13, %v435_v15  ;;  %v945_v15 = vrot.slane %v8995_v42, 2 }
  0x7d   : > { %7307 = vmatprep.subr.mxu0 %v6136_v37  ;;  %7384 = vmatpush3.msra.mxu1 %v6154_v39  ;;  %12310 = vst [vmem:[#allocation32_spill] sm:$0xff] %v9409_v26  ;;  %v943_v39 = vrot.slane %v8977_v34, 2  ;;  %v6151_v13 = vld [vmem:[%s12163_s1 + $0x180] sm:$0xff] }
  0x7e   : > { %7308 = vmatpush3.msra.mxu0 %v6136_v37  ;;  %7385 = vmatprep.subr.mxu1 %v6153_v41  ;;  %v939_v37 = vsel %vm936_vm1, %v937_v56, %v938_v40  ;;  %v947_v56 = vrot.slane %v8999_v44, 2 }
  0x7f   : > { %7194 = vmatmul.mubr.f32.gmra.mxu0 %v9389_v24  ;;  %7274 = vmatmul.mubr.f32.gmra.mxu1 %v9332_v28  ;;  %v9438_v42 = vsel %vm936_vm1, %v943_v39, %v945_v15  ;;  %v960_v15 = vrot.slane %v9071_v8, 2 }
  0x80   : > { %7196 = vmatprep.mubr.f32.mxu0 %v9393_v16  ;;  %7276 = vmatprep.mubr.f32.mxu1 %v9357_v51 }
  0x81   : > { %7309 = vmatprep.subr.mxu0 %v6135_v14  ;;  %7386 = vmatpush3.msra.mxu1 %v6153_v41  ;;  %v948_v41 = vrot.slane %v9002_v45, 2 }
  0x82   : > { %7310 = vmatpush3.msra.mxu0 %v6135_v14  ;;  %7387 = vmatprep.subr.mxu1 %v6152_v27  ;;  %v941_v14 = vsel %vm936_vm1, %v938_v40, %v940_v12  ;;  %v950_v40 = vrot.slane %v9015_v52, 2  ;;  %v6198_v52 = vld [vmem:[%s12163_s1 + $0x2f8] sm:$0xff] }
  0x83   : > { %7197 = vmatmul.mubr.f32.gmra.mxu0 %v9409_v26  ;;  %7277 = vmatmul.mubr.f32.gmra.mxu1 %v9360_v7  ;;  %v9431_v26 = vsel %vm936_vm1, %v942_v29, %v943_v39  ;;  %v9446_v12 = vsel %vm936_vm1, %v947_v56, %v948_v41 }
  0x84   : > { %7311 = vmatprep.mubr.f32.mxu0 %v939_v37  ;;  %7388 = vmatpush3.msra.mxu1 %v6152_v27  ;;  %v6181_v37 = vld [vmem:[%s12163_s1 + $0x270] sm:$0xff]  ;;  %v952_v27 = vrot.slane %v9019_v53, 2  ;;  %v9461_v29 = vsel %vm936_vm1, %v948_v41, %v950_v40  ;;  %v962_v41 = vrot.slane %v9074_v9, 2  ;;  %v965_v40 = vrot.slane %v9099_v18, 2 }
  0x85   : > { %7439 = vmatprep.subr.mxu0 %v6182_v30  ;;  %7389 = vmatprep.subr.mxu1 %v6151_v13 }
  0x86   : > { %7391 = vmatprep.mubr.f32.mxu1 %v8974_v33  ;;  %7390 = vmatpush3.msra.mxu1 %v6151_v13  ;;  %v6180_v33 = vld [vmem:[%s12163_s1 + $0x268] sm:$0xff]  ;;  %v957_v13 = vrot.slane %v9049_v0, 2 }
  0x87   : > { %7312 = vmatmul.mubr.f32.vlgmr.msra.gmra.mxu0 %v941_v14  ;;  %7392 = vmatmul.mubr.f32.vlgmr.msra.gmra.mxu1 %v8977_v34  ;;  %v6179_v34 = vld [vmem:[%s12163_s1 + $0x260] sm:$0xff]  ;;  %v958_v14 = vrot.slane %v9052_v1, 2 }
  0x88   : > { %7440 = vmatpush3.msra.mxu0 %v6182_v30  ;;  %7314 = vmatprep.mubr.f32.mxu0 %v9431_v26  ;;  %v953_v30 = vrot.slane %v9022_v54, 2 }
  0x89   : > { %7441 = vmatprep.subr.mxu0 %v6181_v37  ;;  %7394 = vmatprep.mubr.f32.mxu1 %v8999_v44  ;;  %v955_v44 = vrot.slane %v9043_v62, 2  ;;  %v9485_v56 = vsel %vm936_vm1, %v957_v13, %v958_v14  ;;  %v9499_v8 = vsel %vm936_vm1, %v958_v14, %v960_v15  ;;  %v973_v13 = vrot.slane %v9133_v35, 2 }
  0x8a   : > { %7442 = vmatpush3.msra.mxu0 %v6181_v37  ;;  %v9466_v39 = vsel %vm936_vm1, %v952_v27, %v953_v30  ;;  %7519 = vmatprep.subr.mxu1 %v6198_v52  ;;  %v963_v37 = vrot.slane %v9077_v10, 2  ;;  %v967_v27 = vrot.slane %v9102_v19, 2  ;;  %v975_v14 = vrot.slane %v9155_v46, 2 }
  0x8b   : > { %7315 = vmatmul.mubr.f32.gmra.mxu0 %v9438_v42  ;;  %7443 = vmatprep.subr.mxu0 %v6180_v33  ;;  %v9480_v62 = vsel %vm936_vm1, %v953_v30, %v955_v44  ;;  %v968_v30 = vrot.slane %v9105_v20, 2  ;;  %v972_v44 = vrot.slane %v9130_v32, 2  ;;  %v978_v15 = vrot.slane %v9161_v48, 2 }
  0x8c   : > { %7395 = vmatmul.mubr.f32.gmra.mxu1 %v9002_v45  ;;  %7317 = vmatprep.mubr.f32.mxu0 %v9446_v12  ;;  %v6178_v45 = vld [vmem:[%s12163_s1 + $0x258] sm:$0xff]  ;;  %v9518_v18 = vsel %vm936_vm1, %v963_v37, %v965_v40  ;;  %v9556_v46 = vsel %vm936_vm1, %v973_v13, %v975_v14  ;;  %v985_v40 = vrot.slane %v9211_v21, 2  ;;  %v997_v14 = vrot.slane %v9270_v17, 2 }
  0x8d   : > { %7397 = vmatprep.mubr.f32.mxu1 %v9019_v53  ;;  %7444 = vmatpush3.msra.mxu0 %v6180_v33  ;;  %v6197_v53 = vld [vmem:[%s12163_s1 + $0x2f0] sm:$0xff]  ;;  %v9504_v33 = vsel %vm936_vm1, %v962_v41, %v963_v37  ;;  %v980_v41 = vrot.slane %v9183_v63, 2 }
  0x8e   : > { %7445 = vmatprep.subr.mxu0 %v6179_v34  ;;  %7520 = vmatpush3.msra.mxu1 %v6198_v52  ;;  %v9523_v52 = vsel %vm936_vm1, %v967_v27, %v968_v30 }
  0x8f   : > { %7318 = vmatmul.mubr.f32.gmra.mxu0 %v9461_v29  ;;  %7521 = vmatprep.subr.mxu1 %v6197_v53  ;;  %v9575_v63 = vsel %vm936_vm1, %v978_v15, %v980_v41  ;;  %v1003_v41 = vrot.slane %v9301_v6, 2 }
  0x90   : > { %7398 = vmatmul.mubr.f32.gmra.mxu1 %v9022_v54  ;;  %7320 = vmatprep.mubr.f32.mxu0 %v9466_v39  ;;  %v6177_v54 = vld [vmem:[%s12163_s1 + $0x250] sm:$0xff] }
  0x91   : > { %7400 = vmatprep.mubr.f32.mxu1 %v9049_v0  ;;  %7446 = vmatpush3.msra.mxu0 %v6179_v34  ;;  %v6196_v0 = vld [vmem:[%s12163_s1 + $0x2e8] sm:$0xff]  ;;  %v970_v34 = vrot.slane %v9127_v31, 2 }
  0x92   : > { %7447 = vmatprep.subr.mxu0 %v6178_v45  ;;  %7522 = vmatpush3.msra.mxu1 %v6197_v53  ;;  %v977_v53 = vrot.slane %v9158_v47, 2 }
  0x93   : > { %7321 = vmatmul.mubr.f32.gmra.mxu0 %v9480_v62  ;;  %7523 = vmatprep.subr.mxu1 %v6196_v0  ;;  %v9537_v31 = vsel %vm936_vm1, %v968_v30, %v970_v34  ;;  %v987_v30 = vrot.slane %v9214_v23, 2 }
  0x94   : > { %7401 = vmatmul.mubr.f32.gmra.mxu1 %v9052_v1  ;;  %7323 = vmatprep.mubr.f32.mxu0 %v9485_v56  ;;  %v6176_v1 = vld [vmem:[%s12163_s1 + $0x248] sm:$0xff]  ;;  %v9561_v37 = vsel %vm936_vm1, %v977_v53, %v978_v15  ;;  %v998_v53 = vrot.slane %v9273_v36, 2  ;;  %v1000_v15 = vrot.slane %v9295_v11, 2 }
  0x95   : > { %7403 = vmatprep.mubr.f32.mxu1 %v9074_v9  ;;  %7448 = vmatpush3.msra.mxu0 %v6178_v45  ;;  %v6195_v9 = vld [vmem:[%s12163_s1 + $0x2e0] sm:$0xff]  ;;  %v9542_v45 = vsel %vm936_vm1, %v972_v44, %v973_v13  ;;  %v992_v44 = vrot.slane %v9242_v55, 2  ;;  %v993_v13 = vrot.slane %v9245_v58, 2  ;;  %v6188_v11 = vld [vmem:[%s12163_s1 + $0x2a8] sm:$0xff] }
  0x96   : > { %7449 = vmatprep.subr.mxu0 %v6177_v54  ;;  %7524 = vmatpush3.msra.mxu1 %v6196_v0  ;;  %v983_v0 = vrot.slane %v9189_v5, 2 }
  0x97   : > { %7324 = vmatmul.mubr.f32.gmra.mxu0 %v9499_v8  ;;  %7525 = vmatprep.subr.mxu1 %v6195_v9 }
  0x98   : > { %7404 = vmatmul.mubr.f32.gmra.mxu1 %v9077_v10  ;;  %7326 = vmatprep.mubr.f32.mxu0 %v9504_v33  ;;  %v6175_v10 = vld [vmem:[%s12163_s1 + $0x240] sm:$0xff]  ;;  %v9594_v21 = vsel %vm936_vm1, %v983_v0, %v985_v40  ;;  %v1010_v40 = vrot.slane %v9351_v22, 2  ;;  %v6186_v22 = vld [vmem:[%s12163_s1 + $0x298] sm:$0xff] }
  0x99   : > { %7406 = vmatprep.mubr.f32.mxu1 %v9102_v19  ;;  %7450 = vmatpush3.msra.mxu0 %v6177_v54  ;;  %v6194_v19 = vld [vmem:[%s12163_s1 + $0x2d8] sm:$0xff]  ;;  %v982_v54 = vrot.slane %v9186_v3, 2 }
  0x9a   : > { %7451 = vmatprep.subr.mxu0 %v6176_v1  ;;  %7526 = vmatpush3.msra.mxu1 %v6195_v9  ;;  %v990_v9 = vrot.slane %v9239_v50, 2 }
  0x9b   : > { %7327 = vmatmul.mubr.f32.gmra.mxu0 %v9518_v18  ;;  %7527 = vmatprep.subr.mxu1 %v6194_v19  ;;  %v9580_v27 = vsel %vm936_vm1, %v982_v54, %v983_v0  ;;  %v1005_v54 = vrot.slane %v9323_v60, 2  ;;  %v6187_v60 = vld [vmem:[%s12163_s1 + $0x2a0] sm:$0xff] }
  0x9c   : > { %7407 = vmatmul.mubr.f32.gmra.mxu1 %v9105_v20  ;;  %7329 = vmatprep.mubr.f32.mxu0 %v9523_v52  ;;  %v6174_v20 = vld [vmem:[%s12163_s1 + $0x238] sm:$0xff] }
  0x9d   : > { %7409 = vmatprep.mubr.f32.mxu1 %v9130_v32  ;;  %7452 = vmatpush3.msra.mxu0 %v6176_v1  ;;  %v6193_v32 = vld [vmem:[%s12163_s1 + $0x2d0] sm:$0xff]  ;;  %v988_v1 = vrot.slane %v9217_v25, 2 }
  0x9e   : > { %7453 = vmatprep.subr.mxu0 %v6175_v10  ;;  %7528 = vmatpush3.msra.mxu1 %v6194_v19  ;;  %v9618_v19 = vsel %vm936_vm1, %v992_v44, %v993_v13  ;;  %v9700_v44 = vld [vmem:[%s8942_s13 + $0x180] sm:$0xff] }
  0x9f   : > { %7330 = vmatmul.mubr.f32.gmra.mxu0 %v9537_v31  ;;  %7529 = vmatprep.subr.mxu1 %v6193_v32  ;;  %v9599_v34 = vsel %vm936_vm1, %v987_v30, %v988_v1  ;;  %v9613_v50 = vsel %vm936_vm1, %v988_v1, %v990_v9  ;;  %v1012_v1 = vrot.slane %v9357_v51, 2 }
  0xa0   : > { %7410 = vmatmul.mubr.f32.gmra.mxu1 %v9133_v35  ;;  %7332 = vmatprep.mubr.f32.mxu0 %v9542_v45  ;;  %v6173_v35 = vld [vmem:[%s12163_s1 + $0x230] sm:$0xff] }
  0xa1   : > { %7412 = vmatprep.mubr.f32.mxu1 %v9158_v47  ;;  %7454 = vmatpush3.msra.mxu0 %v6175_v10  ;;  %v6192_v47 = vld [vmem:[%s12163_s1 + $0x2c8] sm:$0xff]  ;;  %v995_v10 = vrot.slane %v9267_v38, 2  ;;  %v6189_v38 = vld [vmem:[%s12163_s1 + $0x2b0] sm:$0xff] }
  0xa2   : > { %7455 = vmatprep.subr.mxu0 %v6174_v20  ;;  %7530 = vmatpush3.msra.mxu1 %v6193_v32  ;;  %v1002_v32 = vrot.slane %v9298_v43, 2 }
  0xa3   : > { %7333 = vmatmul.mubr.f32.gmra.mxu0 %v9556_v46  ;;  %7531 = vmatprep.subr.mxu1 %v6192_v47 }
  0xa4   : > { %7413 = vmatmul.mubr.f32.gmra.mxu1 %v9161_v48  ;;  %7335 = vmatprep.mubr.f32.mxu0 %v9561_v37  ;;  %v6172_v48 = vld [vmem:[%s12163_s1 + $0x228] sm:$0xff]  ;;  %v9656_v0 = vsel %vm936_vm1, %v1002_v32, %v1003_v41 }
  0xa5   : > { %7415 = vmatprep.mubr.f32.mxu1 %v9186_v3  ;;  %7456 = vmatpush3.msra.mxu0 %v6174_v20  ;;  %v6191_v3 = vld [vmem:[%s12163_s1 + $0x2c0] sm:$0xff]  ;;  %v9637_v20 = vsel %vm936_vm1, %v997_v14, %v998_v53  ;;  %12314 = vst [vmem:[#allocation36_spill] sm:$0xff] %v9656_v0  ;;  %v6210_v14 = vld [vmem:[%s12163_s1 + $0x358] sm:$0xff]  ;;  %v6228_v32 = vld [vmem:[%s12163_s1 + $0x3e8] sm:$0xff] }
  0xa6   : > { %7457 = vmatprep.subr.mxu0 %v6173_v35  ;;  %7532 = vmatpush3.msra.mxu1 %v6192_v47  ;;  %12312 = vst [vmem:[#allocation34_spill] sm:$0xff] %v9637_v20  ;;  %v1008_v47 = vrot.slane %v9332_v28, 2 }
  0xa7   : > { %7336 = vmatmul.mubr.f32.gmra.mxu0 %v9575_v63  ;;  %7533 = vmatprep.subr.mxu1 %v6191_v3 }
  0xa8   : > { %7416 = vmatmul.mubr.f32.gmra.mxu1 %v9189_v5  ;;  %7338 = vmatprep.mubr.f32.mxu0 %v9580_v27  ;;  %v6171_v5 = vld [vmem:[%s12163_s1 + $0x220] sm:$0xff] }
  0xa9   : > { %7418 = vmatprep.mubr.f32.mxu1 %v9214_v23  ;;  %7458 = vmatpush3.msra.mxu0 %v6173_v35  ;;  %v6190_v23 = vld [vmem:[%s12163_s1 + $0x2b8] sm:$0xff]  ;;  %v1007_v35 = vrot.slane %v9329_v61, 2 }
  0xaa   : > { %7459 = vmatprep.subr.mxu0 %v6172_v48  ;;  %7534 = vmatpush3.msra.mxu1 %v6191_v3  ;;  %v1015_v3 = vrot.slane %v9376_v4, 2 }
  0xab   : > { %7339 = vmatmul.mubr.f32.gmra.mxu0 %v9594_v21  ;;  %7535 = vmatprep.subr.mxu1 %v6190_v23  ;;  %v9675_v30 = vsel %vm936_vm1, %v1007_v35, %v1008_v47  ;;  %v12325_v35 = vld [vmem:[#allocation15_spill] sm:$0xff] }
  0xac   : > { %7419 = vmatmul.mubr.f32.gmra.mxu1 %v9217_v25  ;;  %7341 = vmatprep.mubr.f32.mxu0 %v9599_v34  ;;  %v6170_v25 = vld [vmem:[%s12163_s1 + $0x218] sm:$0xff]  ;;  %12316 = vst [vmem:[#allocation38_spill] sm:$0xff] %v9675_v30 }
  0xad   : > { %7421 = vmatprep.mubr.f32.mxu1 %v9242_v55  ;;  %7460 = vmatpush3.msra.mxu0 %v6172_v48  ;;  %v9632_v55 = vsel %vm936_vm1, %v993_v13, %v995_v10  ;;  %v1013_v48 = vrot.slane %v9360_v7, 2  ;;  %v9713_v13 = vld [vmem:[%s8942_s13 + $0x188] sm:$0xff] }
  0xae   : > { %7461 = vmatprep.subr.mxu0 %v6171_v5  ;;  %7536 = vmatpush3.msra.mxu1 %v6190_v23  ;;  %12311 = vst [vmem:[#allocation33_spill] sm:$0xff] %v9632_v55  ;;  %v6213_v23 = vld [vmem:[%s12163_s1 + $0x370] sm:$0xff]  ;;  %v6212_v10 = vld [vmem:[%s12163_s1 + $0x368] sm:$0xff] }
  0xaf   : > { %7342 = vmatmul.mubr.f32.gmra.mxu0 %v9613_v50  ;;  %7537 = vmatprep.subr.mxu1 %v6189_v38  ;;  %v9694_v9 = vsel %vm936_vm1, %v1012_v1, %v1013_v48  ;;  %v9706_v4 = vsel %vm936_vm1, %v1013_v48, %v1015_v3  ;;  %v12328_v1 = vld [vmem:[#allocation18_spill] sm:$0xff]  ;;  %v12330_v3 = vld [vmem:[#allocation20_spill] sm:$0xff] }
  0xb0   : > { %7422 = vmatmul.mubr.f32.gmra.mxu1 %v9245_v58  ;;  %7344 = vmatprep.mubr.f32.mxu0 %v9618_v19  ;;  %v6169_v58 = vld [vmem:[%s12163_s1 + $0x210] sm:$0xff]  ;;  %12318 = vst [vmem:[#allocation40_spill] sm:$0xff] %v9706_v4  ;;  %v6206_v48 = vld [vmem:[%s12163_s1 + $0x338] sm:$0xff] }
  0xb1   : > { %7424 = vmatprep.mubr.f32.mxu1 %v9270_v17  ;;  %7462 = vmatpush3.msra.mxu0 %v6171_v5  ;;  %v9651_v17 = vsel %vm936_vm1, %v998_v53, %v1000_v15  ;;  %v6183_v5 = vld [vmem:[%s12163_s1 + $0x280] sm:$0xff]  ;;  %v6229_v53 = vld [vmem:[%s12163_s1 + $0x3f0] sm:$0xff] }
  0xb2   : > { %7463 = vmatprep.subr.mxu0 %v6170_v25  ;;  %7538 = vmatpush3.msra.mxu1 %v6189_v38  ;;  %12313 = vst [vmem:[#allocation35_spill] sm:$0xff] %v9651_v17  ;;  %v12322_v38 = vld [vmem:[#allocation12_spill] sm:$0xff]  ;;  %v6209_v15 = vld [vmem:[%s12163_s1 + $0x350] sm:$0xff] }
  0xb3   : > { %7345 = vmatmul.mubr.f32.gmra.mxu0 %v9632_v55  ;;  %7539 = vmatprep.subr.mxu1 %v6188_v11 }
  0xb4   : > { %7425 = vmatmul.mubr.f32.gmra.mxu1 %v9273_v36  ;;  %7347 = vmatprep.mubr.f32.mxu0 %v9637_v20  ;;  %v6168_v36 = vld [vmem:[%s12163_s1 + $0x208] sm:$0xff] }
  0xb5   : > { %7427 = vmatprep.mubr.f32.mxu1 %v9298_v43  ;;  %7464 = vmatpush3.msra.mxu0 %v6170_v25  ;;  %v9670_v43 = vsel %vm936_vm1, %v1003_v41, %v1005_v54  ;;  %v12321_v25 = vld [vmem:[#allocation11_spill] sm:$0xff]  ;;  %v12323_v41 = vld [vmem:[#allocation13_spill] sm:$0xff] }
  0xb6   : > { %7465 = vmatprep.subr.mxu0 %v6169_v58  ;;  %7540 = vmatpush3.msra.mxu1 %v6188_v11  ;;  %12315 = vst [vmem:[#allocation37_spill] sm:$0xff] %v9670_v43  ;;  %v6208_v11 = vld [vmem:[%s12163_s1 + $0x348] sm:$0xff]  ;;  %v6227_v54 = vld [vmem:[%s12163_s1 + $0x3e0] sm:$0xff] }
  0xb7   : > { %7348 = vmatmul.mubr.f32.gmra.mxu0 %v9651_v17  ;;  %7541 = vmatprep.subr.mxu1 %v6187_v60 }
  0xb8   : > { %7428 = vmatmul.mubr.f32.gmra.mxu1 %v9301_v6  ;;  %7350 = vmatprep.mubr.f32.mxu0 %v9656_v0  ;;  %v6167_v6 = vld [vmem:[%s12163_s1 + $0x200] sm:$0xff] }
  0xb9   : > { %7430 = vmatprep.mubr.f32.mxu1 %v9329_v61  ;;  %7466 = vmatpush3.msra.mxu0 %v6169_v58  ;;  %v9689_v61 = vsel %vm936_vm1, %v1008_v47, %v1010_v40  ;;  %v12324_v58 = vld [vmem:[#allocation14_spill] sm:$0xff]  ;;  %v12326_v47 = vld [vmem:[#allocation16_spill] sm:$0xff]  ;;  %v12327_v40 = vld [vmem:[#allocation17_spill] sm:$0xff] }
  0xba   : > { %7467 = vmatprep.subr.mxu0 %v6168_v36  ;;  %7542 = vmatpush3.msra.mxu1 %v6187_v60  ;;  %12317 = vst [vmem:[#allocation39_spill] sm:$0xff] %v9689_v61  ;;  %v6226_v60 = vld [vmem:[%s12163_s1 + $0x3d8] sm:$0xff] }
  0xbb   : > { %7351 = vmatmul.mubr.f32.gmra.mxu0 %v9670_v43  ;;  %7543 = vmatprep.subr.mxu1 %v6186_v22 }
  0xbc   : > { %7431 = vmatmul.mubr.f32.gmra.mxu1 %v9332_v28  ;;  %7353 = vmatprep.mubr.f32.mxu0 %v9675_v30  ;;  %v6185_v28 = vld [vmem:[%s12163_s1 + $0x290] sm:$0xff] }
  0xbd   : > { %7433 = vmatprep.mubr.f32.mxu1 %v9357_v51  ;;  %7468 = vmatpush3.msra.mxu0 %v6168_v36  ;;  %v6184_v51 = vld [vmem:[%s12163_s1 + $0x288] sm:$0xff]  ;;  %v6207_v36 = vld [vmem:[%s12163_s1 + $0x340] sm:$0xff] }
  0xbe   : > { %7469 = vmatprep.subr.mxu0 %v6167_v6  ;;  %7544 = vmatpush3.msra.mxu1 %v6186_v22  ;;  %v6225_v22 = vld [vmem:[%s12163_s1 + $0x3d0] sm:$0xff] }
  0xbf   : > { %7354 = vmatmul.mubr.f32.gmra.mxu0 %v9689_v61  ;;  %7545 = vmatprep.subr.mxu1 %v6185_v28 }
  0xc0   : > { %7434 = vmatmul.mubr.f32.gmra.mxu1 %v9360_v7  ;;  %7356 = vmatprep.mubr.f32.mxu0 %v9694_v9  ;;  %v6214_v7 = vld [vmem:[%s12163_s1 + $0x378] sm:$0xff] }
  0xc1   : > { %7436 = vmatprep.mubr.f32.mxu1 %v9700_v44  ;;  %7470 = vmatpush3.msra.mxu0 %v6167_v6  ;;  %v12329_v6 = vld [vmem:[#allocation19_spill] sm:$0xff] }
  0xc2   : > { %7546 = vmatpush3.msra.mxu1 %v6185_v28  ;;  %7599 = vmatprep.subr.mxu0 %v6214_v7  ;;  %v6205_v28 = vld [vmem:[%s12163_s1 + $0x330] sm:$0xff] }
  0xc3   : > { %7357 = vmatmul.mubr.f32.gmra.mxu0 %v9706_v4  ;;  %7547 = vmatprep.subr.mxu1 %v6184_v51 }
  0xc4   : > { %7437 = vmatmul.mubr.f32.gmra.mxu1 %v9713_v13  ;;  %7471 = vmatprep.mubr.f32.mxu0 %v9010_v49  ;;  %v6211_v49 = vld [vmem:[%s12163_s1 + $0x360] sm:$0xff] }
  0xc5   : > { %7548 = vmatpush3.msra.mxu1 %v6184_v51  ;;  %7551 = vmatprep.mubr.f32.mxu1 %v9431_v26  ;;  %v12319_v26 = vld [vmem:[#allocation9_spill] sm:$0xff]  ;;  %v6224_v51 = vld [vmem:[%s12163_s1 + $0x3c8] sm:$0xff] }
  0xc6   : > { %7549 = vmatprep.subr.mxu1 %v6183_v5 }
  0xc7   : > { %7472 = vmatmul.mubr.f32.vlgmr.msra.gmra.mxu0 %v9033_v57  ;;  %7550 = vmatpush3.msra.mxu1 %v6183_v5  ;;  %v6230_v57 = vld [vmem:[%s12163_s1 + $0x3f8] sm:$0xff] }
  0xc8   : > { %7600 = vmatpush3.msra.mxu0 %v6214_v7  ;;  %7552 = vmatmul.mubr.f32.vlgmr.msra.gmra.mxu1 %v9438_v42  ;;  %v12320_v42 = vld [vmem:[#allocation10_spill] sm:$0xff]  ;;  %v12331_v7 = vld [vmem:[#allocation21_spill] sm:$0xff] }
  0xc9   : > { %7474 = vmatprep.mubr.f32.mxu0 %v9038_v59  ;;  %7601 = vmatprep.subr.mxu0 %v6213_v23  ;;  %v12332_v5 = vld [vmem:[#allocation22_spill] sm:$0xff] }
  0xca   : > { %7554 = vmatprep.mubr.f32.mxu1 %v9446_v12  ;;  %7602 = vmatpush3.msra.mxu0 %v6213_v23  ;;  %v6204_v23 = vld [vmem:[%s12163_s1 + $0x328] sm:$0xff] }
  0xcb   : > { %7475 = vmatmul.mubr.f32.gmra.mxu0 %v9058_v2  ;;  %7603 = vmatprep.subr.mxu0 %v6212_v10 }
  0xcc   : > { %7555 = vmatmul.mubr.f32.gmra.mxu1 %v9461_v29  ;;  %7477 = vmatprep.mubr.f32.mxu0 %v12319_v26 }
  0xcd   : > { %7557 = vmatprep.mubr.f32.mxu1 %v9466_v39  ;;  %7604 = vmatpush3.msra.mxu0 %v6212_v10  ;;  %v6223_v10 = vld [vmem:[%s12163_s1 + $0x3c0] sm:$0xff] }
  0xce   : > { %7605 = vmatprep.subr.mxu0 %v6211_v49  ;;  %7679 = vmatprep.subr.mxu1 %v6230_v57 }
  0xcf   : > { %7478 = vmatmul.mubr.f32.gmra.mxu0 %v12320_v42  ;;  %7680 = vmatpush3.msra.mxu1 %v6230_v57  ;;  %v12334_v57 = vld [vmem:[#allocation24_spill] sm:$0xff] }
  0xd0   : > { %7558 = vmatmul.mubr.f32.gmra.mxu1 %v9480_v62  ;;  %7480 = vmatprep.mubr.f32.mxu0 %v12321_v25 }
  0xd1   : > { %7560 = vmatprep.mubr.f32.mxu1 %v9485_v56  ;;  %7606 = vmatpush3.msra.mxu0 %v6211_v49  ;;  %v12333_v49 = vld [vmem:[#allocation23_spill] sm:$0xff] }
  0xd2   : > { %7607 = vmatprep.subr.mxu0 %v6210_v14  ;;  %7681 = vmatprep.subr.mxu1 %v6229_v53 }
  0xd3   : > { %7481 = vmatmul.mubr.f32.gmra.mxu0 %v12322_v38  ;;  %7682 = vmatpush3.msra.mxu1 %v6229_v53  ;;  %v6222_v53 = vld [vmem:[%s12163_s1 + $0x3b8] sm:$0xff] }
  0xd4   : > { %7561 = vmatmul.mubr.f32.gmra.mxu1 %v9499_v8  ;;  %7483 = vmatprep.mubr.f32.mxu0 %v12323_v41 }
  0xd5   : > { %7563 = vmatprep.mubr.f32.mxu1 %v9504_v33  ;;  %7608 = vmatpush3.msra.mxu0 %v6210_v14  ;;  %v6203_v14 = vld [vmem:[%s12163_s1 + $0x320] sm:$0xff] }
  0xd6   : > { %7609 = vmatprep.subr.mxu0 %v6209_v15  ;;  %7683 = vmatprep.subr.mxu1 %v6228_v32 }
  0xd7   : > { %7484 = vmatmul.mubr.f32.gmra.mxu0 %v12324_v58  ;;  %7684 = vmatpush3.msra.mxu1 %v6228_v32  ;;  %v12336_v32 = vld [vmem:[#allocation26_spill] sm:$0xff] }
  0xd8   : > { %7564 = vmatmul.mubr.f32.gmra.mxu1 %v9518_v18  ;;  %7486 = vmatprep.mubr.f32.mxu0 %v12325_v35 }
  0xd9   : > { %7566 = vmatprep.mubr.f32.mxu1 %v9523_v52  ;;  %7610 = vmatpush3.msra.mxu0 %v6209_v15  ;;  %v12335_v15 = vld [vmem:[#allocation25_spill] sm:$0xff] }
  0xda   : > { %7611 = vmatprep.subr.mxu0 %v6208_v11  ;;  %7685 = vmatprep.subr.mxu1 %v6227_v54 }
  0xdb   : > { %7487 = vmatmul.mubr.f32.gmra.mxu0 %v12326_v47  ;;  %7686 = vmatpush3.msra.mxu1 %v6227_v54  ;;  %v6221_v54 = vld [vmem:[%s12163_s1 + $0x3b0] sm:$0xff] }
  0xdc   : > { %7567 = vmatmul.mubr.f32.gmra.mxu1 %v9537_v31  ;;  %7489 = vmatprep.mubr.f32.mxu0 %v12327_v40 }
  0xdd   : > { %7569 = vmatprep.mubr.f32.mxu1 %v9542_v45  ;;  %7612 = vmatpush3.msra.mxu0 %v6208_v11  ;;  %v6202_v11 = vld [vmem:[%s12163_s1 + $0x318] sm:$0xff] }
  0xde   : > { %7613 = vmatprep.subr.mxu0 %v6207_v36  ;;  %7687 = vmatprep.subr.mxu1 %v6226_v60 }
  0xdf   : > { %7490 = vmatmul.mubr.f32.gmra.mxu0 %v12328_v1  ;;  %7688 = vmatpush3.msra.mxu1 %v6226_v60  ;;  %v12338_v60 = vld [vmem:[#allocation28_spill] sm:$0xff] }
  0xe0   : > { %7570 = vmatmul.mubr.f32.gmra.mxu1 %v9556_v46  ;;  %7492 = vmatprep.mubr.f32.mxu0 %v12329_v6 }
  0xe1   : > { %7572 = vmatprep.mubr.f32.mxu1 %v9561_v37  ;;  %7614 = vmatpush3.msra.mxu0 %v6207_v36  ;;  %v12337_v36 = vld [vmem:[#allocation27_spill] sm:$0xff] }
  0xe2   : > { %7615 = vmatprep.subr.mxu0 %v6206_v48  ;;  %7689 = vmatprep.subr.mxu1 %v6225_v22 }
  0xe3   : > { %7493 = vmatmul.mubr.f32.gmra.mxu0 %v12330_v3  ;;  %7690 = vmatpush3.msra.mxu1 %v6225_v22  ;;  %v6220_v22 = vld [vmem:[%s12163_s1 + $0x3a8] sm:$0xff] }
  0xe4   : > { %7573 = vmatmul.mubr.f32.gmra.mxu1 %v9575_v63  ;;  %7495 = vmatprep.mubr.f32.mxu0 %v12331_v7 }
  0xe5   : > { %7575 = vmatprep.mubr.f32.mxu1 %v9580_v27  ;;  %7616 = vmatpush3.msra.mxu0 %v6206_v48  ;;  %v6201_v48 = vld [vmem:[%s12163_s1 + $0x310] sm:$0xff] }
  0xe6   : > { %7617 = vmatprep.subr.mxu0 %v6205_v28  ;;  %7691 = vmatprep.subr.mxu1 %v6224_v51 }
  0xe7   : > { %7496 = vmatmul.mubr.f32.gmra.mxu0 %v12332_v5  ;;  %7692 = vmatpush3.msra.mxu1 %v6224_v51  ;;  %v12340_v51 = vld [vmem:[#allocation30_spill] sm:$0xff] }
  0xe8   : > { %7576 = vmatmul.mubr.f32.gmra.mxu1 %v9594_v21  ;;  %7498 = vmatprep.mubr.f32.mxu0 %v12333_v49 }
  0xe9   : > { %7578 = vmatprep.mubr.f32.mxu1 %v9599_v34  ;;  %7618 = vmatpush3.msra.mxu0 %v6205_v28  ;;  %v12339_v28 = vld [vmem:[#allocation29_spill] sm:$0xff] }
  0xea   : > { %7619 = vmatprep.subr.mxu0 %v6204_v23  ;;  %7693 = vmatprep.subr.mxu1 %v6223_v10 }
  0xeb   : > { %7499 = vmatmul.mubr.f32.gmra.mxu0 %v12334_v57  ;;  %7694 = vmatpush3.msra.mxu1 %v6223_v10  ;;  %v6219_v10 = vld [vmem:[%s12163_s1 + $0x3a0] sm:$0xff] }
  0xec   : > { %7579 = vmatmul.mubr.f32.gmra.mxu1 %v9613_v50  ;;  %7501 = vmatprep.mubr.f32.mxu0 %v12335_v15 }
  0xed   : > { %7581 = vmatprep.mubr.f32.mxu1 %v9618_v19  ;;  %7620 = vmatpush3.msra.mxu0 %v6204_v23  ;;  %v6200_v23 = vld [vmem:[%s12163_s1 + $0x308] sm:$0xff] }
  0xee   : > { %7621 = vmatprep.subr.mxu0 %v6203_v14  ;;  %7695 = vmatprep.subr.mxu1 %v6222_v53 }
  0xef   : > { %7502 = vmatmul.mubr.f32.gmra.mxu0 %v12336_v32  ;;  %7696 = vmatpush3.msra.mxu1 %v6222_v53  ;;  %v1600_v53 = vrot.slane %v9700_v44, 1 }
  0xf0   : > { %7582 = vmatmul.mubr.f32.gmra.mxu1 %v9632_v55  ;;  %7504 = vmatprep.mubr.f32.mxu0 %v12337_v36 }
  0xf1   : > { %7584 = vmatprep.mubr.f32.mxu1 %v9637_v20  ;;  %7622 = vmatpush3.msra.mxu0 %v6203_v14  ;;  %v12341_v14 = vld [vmem:[#allocation31_spill] sm:$0xff]  ;;  %v6217_v20 = vld [vmem:[%s12163_s1 + $0x390] sm:$0xff] }
  0xf2   : > { %7623 = vmatprep.subr.mxu0 %v6202_v11  ;;  %7697 = vmatprep.subr.mxu1 %v6221_v54 }
  0xf3   : > { %7505 = vmatmul.mubr.f32.gmra.mxu0 %v12338_v60  ;;  %7698 = vmatpush3.msra.mxu1 %v6221_v54  ;;  %v288_v54 = vld [vmem:[%s8942_s13 + $0x190] sm:$0x3] }
  0xf4   : > { %7585 = vmatmul.mubr.f32.gmra.mxu1 %v9651_v17  ;;  %7507 = vmatprep.mubr.f32.mxu0 %v12339_v28 }
  0xf5   : > { %7587 = vmatprep.mubr.f32.mxu1 %v9656_v0  ;;  %7624 = vmatpush3.msra.mxu0 %v6202_v11  ;;  %v1601_v11 = vrot.slane %v9713_v13, 1  ;;  %v1882_v0 = vrot.slane %v9713_v13, 2 }
  0xf6   : > { %7625 = vmatprep.subr.mxu0 %v6201_v48  ;;  %7699 = vmatprep.subr.mxu1 %v6220_v22 }
  0xf7   : > { %7508 = vmatmul.mubr.f32.gmra.mxu0 %v12340_v51  ;;  %7700 = vmatpush3.msra.mxu1 %v6220_v22  ;;  %v1881_v22 = vrot.slane %v9700_v44, 2  ;;  %v9871_v17 = vsel %vm356_vm0, %v1600_v53, %v1601_v11  ;;  %v6216_v53 = vld [vmem:[%s12163_s1 + $0x388] sm:$0xff] }
  0xf8   : > { %7588 = vmatmul.mubr.f32.gmra.mxu1 %v9670_v43  ;;  %7510 = vmatprep.mubr.f32.mxu0 %v12341_v14  ;;  %v6218_v43 = vld [vmem:[%s12163_s1 + $0x398] sm:$0xff] }
  0xf9   : > { %7590 = vmatprep.mubr.f32.mxu1 %v9675_v30  ;;  %7626 = vmatpush3.msra.mxu0 %v6201_v48  ;;  %v6199_v48 = vld [vmem:[%s12163_s1 + $0x300] sm:$0xff]  ;;  %v1603_v30 = vrot.slane %v288_v54, 1  ;;  %v9877_v55 = vsel %vm936_vm1, %v1881_v22, %v1882_v0 }
  0xfa   : > { %7627 = vmatprep.subr.mxu0 %v6200_v23  ;;  %7701 = vmatprep.subr.mxu1 %v6219_v10  ;;  %12342 = vst [vmem:[#allocation9_spill] sm:$0xff] %v9877_v55 }
  0xfb   : > { %7511 = vmatmul.mubr.f32.gmra.mxu0 %v9389_v24  ;;  %7702 = vmatpush3.msra.mxu1 %v6219_v10  ;;  %v1884_v10 = vrot.slane %v288_v54, 2 }
  0xfc   : > { %7591 = vmatmul.mubr.f32.gmra.mxu1 %v9689_v61  ;;  %7513 = vmatprep.mubr.f32.mxu0 %v9393_v16  ;;  %v12343_v61 = vld [vmem:[#allocation32_spill] sm:$0xff] }
  0xfd   : > { %7593 = vmatprep.mubr.f32.mxu1 %v9694_v9  ;;  %7628 = vmatpush3.msra.mxu0 %v6200_v23  ;;  %v9883_v23 = vsel %vm356_vm0, %v1601_v11, %v1603_v30  ;;  %v9890_v54 = vsel %vm936_vm1, %v1882_v0, %v1884_v10  ;;  %v6215_v30 = vld [vmem:[%s12163_s1 + $0x380] sm:$0xff]  ;;  %v8615_v11 = vld [vmem:[%s8942_s13 + $0x30] sm:$0xff] }
  0xfe   : > { %7703 = vmatprep.subr.mxu1 %v6218_v43  ;;  %7629 = vmatprep.subr.mxu0 %v6199_v48  ;;  %12344 = vst [vmem:[#allocation10_spill] sm:$0xff] %v9890_v54 }
  0xff   : > { %7514 = vmatmul.mubr.f32.gmra.mxu0 %v12343_v61  ;;  %7704 = vmatpush3.msra.mxu1 %v6218_v43  ;;  %v6246_v43 = vld [vmem:[%s12163_s1 + $0x478] sm:$0xff] }
 0x100   : > { %7594 = vmatmul.mubr.f32.gmra.mxu1 %v9706_v4  ;;  %7516 = vmatprep.mubr.f32.mxu0 %v9871_v17 }
 0x101   : > { %7705 = vmatprep.subr.mxu1 %v6217_v20  ;;  %7596 = vmatprep.mubr.f32.mxu1 %v9877_v55 }
 0x102   : > { %7630 = vmatpush3.msra.mxu0 %v6199_v48  ;;  %7706 = vmatpush3.msra.mxu1 %v6217_v20  ;;  %v6245_v20 = vld [vmem:[%s12163_s1 + $0x470] sm:$0xff]  ;;  %v8616_v48 = vld [vmem:[%s8942_s13 + $0x38] sm:$0xff] }
 0x103   : > { %7517 = vmatmul.mubr.f32.gmra.mxu0 %v9883_v23  ;;  %7707 = vmatprep.subr.mxu1 %v6216_v53 }
 0x104   : > { %7597 = vmatmul.mubr.f32.gmra.mxu1 %v9890_v54  ;;  %7631 = vmatprep.mubr.f32.mxu0 %v8615_v11  ;;  %v8617_v54 = vld [vmem:[%s8942_s13 + $0x48] sm:$0xff] }
 0x105   : > { %7708 = vmatpush3.msra.mxu1 %v6216_v53  ;;  %7759 = vmatprep.subr.mxu0 %v6246_v43  ;;  %v6244_v53 = vld [vmem:[%s12163_s1 + $0x468] sm:$0xff] }
 0x106   : > { %7709 = vmatprep.subr.mxu1 %v6215_v30  ;;  %7711 = vmatprep.mubr.f32.mxu1 %v9038_v59  ;;  %v7153_v0 = vpop.f32.mrf.mxu0 }
 0x107   : > { %v7233_v22 = vpop.f32.mrf.mxu1  ;;  %7632 = vmatmul.mubr.f32.vlgmr.msra.gmra.mxu0 %v8616_v48  ;;  %7710 = vmatpush3.msra.mxu1 %v6215_v30 }
 0x108   : > { %v9906_v10 = vadd.f32 %v7233_v22, %v7153_v0  ;;  %7760 = vmatpush3.msra.mxu0 %v6246_v43  ;;  %7712 = vmatmul.mubr.f32.vlgmr.msra.gmra.mxu1 %v9058_v2  ;;  %v552_v59 = vpop.f32.mrf.mxu0  ;;  %v8618_v43 = vld [vmem:[%s8942_s13 + $0x50] sm:$0xff]  ;;  %v6243_v2 = vld [vmem:[%s12163_s1 + $0x460] sm:$0xff] }
 0x109   : > { %v777_v11 = vpop.f32.mrf.mxu1  ;;  %7634 = vmatprep.mubr.f32.mxu0 %v8617_v54  ;;  %7761 = vmatprep.subr.mxu0 %v6245_v20  ;;  %v8619_v54 = vld [vmem:[%s8942_s13 + $0x60] sm:$0xff] }
 0x10a   : > { %v9913_v55 = vadd.f32 %v777_v11, %v552_v59  ;;  %7714 = vmatprep.mubr.f32.mxu1 %v12319_v26  ;;  %7762 = vmatpush3.msra.mxu0 %v6245_v20  ;;  %v7156_v30 = vpop.f32.mrf.mxu0 }
 0x10b   : > { %v7236_v0 = vpop.f32.mrf.mxu1  ;;  %7635 = vmatmul.mubr.f32.gmra.mxu0 %v8618_v43  ;;  %7763 = vmatprep.subr.mxu0 %v6244_v53  ;;  %v8620_v43 = vld [vmem:[%s8942_s13 + $0x68] sm:$0xff] }
 0x10c   : > { %v9920_v22 = vadd.f32 %v7236_v0, %v7156_v30  ;;  %7715 = vmatmul.mubr.f32.gmra.mxu1 %v12320_v42  ;;  %7637 = vmatprep.mubr.f32.mxu0 %v8619_v54  ;;  %v562_v48 = vpop.f32.mrf.mxu0  ;;  %v6242_v42 = vld [vmem:[%s12163_s1 + $0x458] sm:$0xff] }
 0x10d   : > { %v787_v26 = vpop.f32.mrf.mxu1  ;;  %7717 = vmatprep.mubr.f32.mxu1 %v12321_v25  ;;  %7764 = vmatpush3.msra.mxu0 %v6244_v53  ;;  %v8621_v0 = vld [vmem:[%s8942_s13 + $0x78] sm:$0xff] }
 0x10e   : > { %v9925_v20 = vadd.f32 %v787_v26, %v562_v48  ;;  %7765 = vmatprep.subr.mxu0 %v6243_v2 }
 0x10f   : > { %v7159_v59 = vpop.f32.mrf.mxu0  ;;  %v7239_v11 = vpop.f32.mrf.mxu1  ;;  %7638 = vmatmul.mubr.f32.gmra.mxu0 %v8620_v43  ;;  %v8622_v43 = vld [vmem:[%s8942_s13 + $0x80] sm:$0xff] }
 0x110   : > { %v9931_v30 = vadd.f32 %v7239_v11, %v7159_v59  ;;  %7718 = vmatmul.mubr.f32.gmra.mxu1 %v12322_v38  ;;  %7640 = vmatprep.mubr.f32.mxu0 %v8621_v0  ;;  %v6241_v38 = vld [vmem:[%s12163_s1 + $0x450] sm:$0xff] }
 0x111   : > { %v572_v25 = vpop.f32.mrf.mxu0  ;;  %v797_v53 = vpop.f32.mrf.mxu1  ;;  %7720 = vmatprep.mubr.f32.mxu1 %v12323_v41  ;;  %7766 = vmatpush3.msra.mxu0 %v6243_v2  ;;  %v8623_v11 = vld [vmem:[%s8942_s13 + $0x90] sm:$0xff] }
 0x112   : > { %v9936_v54 = vadd.f32 %v797_v53, %v572_v25  ;;  %7767 = vmatprep.subr.mxu0 %v6242_v42 }
 0x113   : > { %v7162_v48 = vpop.f32.mrf.mxu0  ;;  %v7242_v26 = vpop.f32.mrf.mxu1  ;;  %7641 = vmatmul.mubr.f32.gmra.mxu0 %v8622_v43  ;;  %v8624_v43 = vld [vmem:[%s8942_s13 + $0x98] sm:$0xff] }
 0x114   : > { %v9942_v59 = vadd.f32 %v7242_v26, %v7162_v48  ;;  %7721 = vmatmul.mubr.f32.gmra.mxu1 %v12324_v58  ;;  %7643 = vmatprep.mubr.f32.mxu0 %v8623_v11  ;;  %v6240_v58 = vld [vmem:[%s12163_s1 + $0x448] sm:$0xff] }
 0x115   : > { %v582_v41 = vpop.f32.mrf.mxu0  ;;  %v807_v2 = vpop.f32.mrf.mxu1  ;;  %7723 = vmatprep.mubr.f32.mxu1 %v12325_v35  ;;  %7768 = vmatpush3.msra.mxu0 %v6242_v42  ;;  %v8625_v26 = vld [vmem:[%s8942_s13 + $0xa8] sm:$0xff] }
 0x116   : > { %v9947_v0 = vadd.f32 %v807_v2, %v582_v41  ;;  %7769 = vmatprep.subr.mxu0 %v6241_v38 }
 0x117   : > { %v7165_v25 = vpop.f32.mrf.mxu0  ;;  %v7245_v53 = vpop.f32.mrf.mxu1  ;;  %7644 = vmatmul.mubr.f32.gmra.mxu0 %v8624_v43  ;;  %v8626_v43 = vld [vmem:[%s8942_s13 + $0xb0] sm:$0xff] }
 0x118   : > { %v9953_v48 = vadd.f32 %v7245_v53, %v7165_v25  ;;  %7724 = vmatmul.mubr.f32.gmra.mxu1 %v12326_v47  ;;  %7646 = vmatprep.mubr.f32.mxu0 %v8625_v26  ;;  %v6239_v47 = vld [vmem:[%s12163_s1 + $0x440] sm:$0xff] }
 0x119   : > { %v592_v35 = vpop.f32.mrf.mxu0  ;;  %v817_v42 = vpop.f32.mrf.mxu1  ;;  %7726 = vmatprep.mubr.f32.mxu1 %v12327_v40  ;;  %7770 = vmatpush3.msra.mxu0 %v6241_v38  ;;  %v8627_v53 = vld [vmem:[%s8942_s13 + $0xc0] sm:$0xff] }
 0x11a   : > { %v9958_v11 = vadd.f32 %v817_v42, %v592_v35  ;;  %7771 = vmatprep.subr.mxu0 %v6240_v58 }
 0x11b   : > { %v7168_v41 = vpop.f32.mrf.mxu0  ;;  %v7248_v2 = vpop.f32.mrf.mxu1  ;;  %7647 = vmatmul.mubr.f32.gmra.mxu0 %v8626_v43  ;;  %v8628_v43 = vld [vmem:[%s8942_s13 + $0xc8] sm:$0xff] }
 0x11c   : > { %v9964_v25 = vadd.f32 %v7248_v2, %v7168_v41  ;;  %7727 = vmatmul.mubr.f32.gmra.mxu1 %v12328_v1  ;;  %7649 = vmatprep.mubr.f32.mxu0 %v8627_v53  ;;  %v6238_v1 = vld [vmem:[%s12163_s1 + $0x438] sm:$0xff] }
 0x11d   : > { %v602_v40 = vpop.f32.mrf.mxu0  ;;  %v827_v38 = vpop.f32.mrf.mxu1  ;;  %7729 = vmatprep.mubr.f32.mxu1 %v12329_v6  ;;  %7772 = vmatpush3.msra.mxu0 %v6240_v58  ;;  %v8629_v2 = vld [vmem:[%s8942_s13 + $0xd8] sm:$0xff] }
 0x11e   : > { %v9969_v26 = vadd.f32 %v827_v38, %v602_v40  ;;  %7773 = vmatprep.subr.mxu0 %v6239_v47 }
 0x11f   : > { %v7171_v35 = vpop.f32.mrf.mxu0  ;;  %v7251_v42 = vpop.f32.mrf.mxu1  ;;  %7650 = vmatmul.mubr.f32.gmra.mxu0 %v8628_v43  ;;  %v8630_v43 = vld [vmem:[%s8942_s13 + $0xe0] sm:$0xff] }
 0x120   : > { %v9975_v41 = vadd.f32 %v7251_v42, %v7171_v35  ;;  %7730 = vmatmul.mubr.f32.gmra.mxu1 %v12330_v3  ;;  %7652 = vmatprep.mubr.f32.mxu0 %v8629_v2  ;;  %v6237_v3 = vld [vmem:[%s12163_s1 + $0x430] sm:$0xff] }
 0x121   : > { %v612_v6 = vpop.f32.mrf.mxu0  ;;  %v837_v58 = vpop.f32.mrf.mxu1  ;;  %7732 = vmatprep.mubr.f32.mxu1 %v12331_v7  ;;  %7774 = vmatpush3.msra.mxu0 %v6239_v47  ;;  %v8631_v42 = vld [vmem:[%s8942_s13 + $0xf0] sm:$0xff] }
 0x122   : > { %v9980_v53 = vadd.f32 %v837_v58, %v612_v6  ;;  %7775 = vmatprep.subr.mxu0 %v6238_v1 }
 0x123   : > { %v7174_v40 = vpop.f32.mrf.mxu0  ;;  %v7254_v38 = vpop.f32.mrf.mxu1  ;;  %7653 = vmatmul.mubr.f32.gmra.mxu0 %v8630_v43  ;;  %v8632_v43 = vld [vmem:[%s8942_s13 + $0xf8] sm:$0xff] }
 0x124   : > { %v9986_v35 = vadd.f32 %v7254_v38, %v7174_v40  ;;  %7733 = vmatmul.mubr.f32.gmra.mxu1 %v12332_v5  ;;  %7655 = vmatprep.mubr.f32.mxu0 %v8631_v42  ;;  %v6236_v5 = vld [vmem:[%s12163_s1 + $0x428] sm:$0xff] }
 0x125   : > { %v622_v7 = vpop.f32.mrf.mxu0  ;;  %v847_v47 = vpop.f32.mrf.mxu1  ;;  %7735 = vmatprep.mubr.f32.mxu1 %v12333_v49  ;;  %7776 = vmatpush3.msra.mxu0 %v6238_v1  ;;  %v8633_v38 = vld [vmem:[%s8942_s13 + $0x108] sm:$0xff] }
 0x126   : > { %v9991_v2 = vadd.f32 %v847_v47, %v622_v7  ;;  %7777 = vmatprep.subr.mxu0 %v6237_v3  ;;  %v8634_v47 = vld [vmem:[%s8942_s13 + $0x110] sm:$0xff] }
 0x127   : > { %v7177_v6 = vpop.f32.mrf.mxu0  ;;  %v7257_v58 = vpop.f32.mrf.mxu1  ;;  %7656 = vmatmul.mubr.f32.gmra.mxu0 %v8632_v43 }
 0x128   : > { %v9997_v40 = vadd.f32 %v7257_v58, %v7177_v6  ;;  %7736 = vmatmul.mubr.f32.gmra.mxu1 %v12334_v57  ;;  %7658 = vmatprep.mubr.f32.mxu0 %v8633_v38  ;;  %v6235_v6 = vld [vmem:[%s12163_s1 + $0x420] sm:$0xff] }
 0x129   : > { %v10001_v49 = vpop.f32.mrf.mxu0  ;;  %v10003_v1 = vpop.f32.mrf.mxu1  ;;  %7738 = vmatprep.mubr.f32.mxu1 %v12335_v15  ;;  %7778 = vmatpush3.msra.mxu0 %v6237_v3  ;;  %v8635_v58 = vld [vmem:[%s8942_s13 + $0x120] sm:$0xff] }
 0x12a   : > { %7779 = vmatprep.subr.mxu0 %v6236_v5 }
 0x12b   : > { %v7180_v42 = vpop.f32.mrf.mxu0  ;;  %v7260_v7 = vpop.f32.mrf.mxu1  ;;  %7659 = vmatmul.mubr.f32.gmra.mxu0 %v8634_v47  ;;  %v8636_v47 = vld [vmem:[%s8942_s13 + $0x128] sm:$0xff] }
 0x12c   : > { %v10010_v57 = vadd.f32 %v7260_v7, %v7180_v42  ;;  %7739 = vmatmul.mubr.f32.gmra.mxu1 %v12336_v32  ;;  %7661 = vmatprep.mubr.f32.mxu0 %v8635_v58  ;;  %v6234_v42 = vld [vmem:[%s12163_s1 + $0x418] sm:$0xff] }
 0x12d   : > { %v10014_v43 = vpop.f32.mrf.mxu0  ;;  %v10016_v15 = vpop.f32.mrf.mxu1  ;;  %7741 = vmatprep.mubr.f32.mxu1 %v12337_v36  ;;  %7780 = vmatpush3.msra.mxu0 %v6236_v5  ;;  %v8637_v7 = vld [vmem:[%s8942_s13 + $0x138] sm:$0xff] }
 0x12e   : > { %12345 = vst [vmem:[#allocation11_spill] sm:$0xff] %v10014_v43  ;;  %12346 = vst [vmem:[#allocation12_spill] sm:$0xff] %v10016_v15  ;;  %7781 = vmatprep.subr.mxu0 %v6235_v6  ;;  %v8638_v15 = vld [vmem:[%s8942_s13 + $0x140] sm:$0xff]  ;;  %v8642_v43 = vld [vmem:[%s8942_s13 + $0x170] sm:$0xff] }
 0x12f   : > { %v7183_v3 = vpop.f32.mrf.mxu0  ;;  %v7263_v38 = vpop.f32.mrf.mxu1  ;;  %7662 = vmatmul.mubr.f32.gmra.mxu0 %v8636_v47 }
 0x130   : > { %v10023_v32 = vadd.f32 %v7263_v38, %v7183_v3  ;;  %7742 = vmatmul.mubr.f32.gmra.mxu1 %v12338_v60  ;;  %7664 = vmatprep.mubr.f32.mxu0 %v8637_v7  ;;  %v6233_v60 = vld [vmem:[%s12163_s1 + $0x410] sm:$0xff] }
 0x131   : > { %v10027_v58 = vpop.f32.mrf.mxu0  ;;  %v10029_v36 = vpop.f32.mrf.mxu1  ;;  %7744 = vmatprep.mubr.f32.mxu1 %v12339_v28  ;;  %7782 = vmatpush3.msra.mxu0 %v6235_v6  ;;  %v8639_v38 = vld [vmem:[%s8942_s13 + $0x150] sm:$0xff] }
 0x132   : > { %12347 = vst [vmem:[#allocation13_spill] sm:$0xff] %v10027_v58  ;;  %12348 = vst [vmem:[#allocation14_spill] sm:$0xff] %v10029_v36  ;;  %7783 = vmatprep.subr.mxu0 %v6234_v42  ;;  %v8640_v36 = vld [vmem:[%s8942_s13 + $0x158] sm:$0xff]  ;;  %v10067_v58 = vld [vmem:[%s8942_s13 + $0x1a8] sm:$0x3] }
 0x133   : > { %v7186_v5 = vpop.f32.mrf.mxu0  ;;  %v7266_v47 = vpop.f32.mrf.mxu1  ;;  %7665 = vmatmul.mubr.f32.gmra.mxu0 %v8638_v15 }
 0x134   : > { %v10036_v3 = vadd.f32 %v7266_v47, %v7186_v5  ;;  %7745 = vmatmul.mubr.f32.gmra.mxu1 %v12340_v51  ;;  %7667 = vmatprep.mubr.f32.mxu0 %v8639_v38  ;;  %v6232_v51 = vld [vmem:[%s12163_s1 + $0x408] sm:$0xff]  ;;  %v10050_v5 = vld [vmem:[%s8942_s13 + $0x198] sm:$0xff]  ;;  %v10053_v47 = vld [vmem:[%s8942_s13 + $0x1a0] sm:$0xff] }
 0x135   : > { %v10040_v28 = vpop.f32.mrf.mxu0  ;;  %v10042_v6 = vpop.f32.mrf.mxu1  ;;  %7747 = vmatprep.mubr.f32.mxu1 %v12341_v14  ;;  %7784 = vmatpush3.msra.mxu0 %v6234_v42  ;;  %v8641_v14 = vld [vmem:[%s8942_s13 + $0x168] sm:$0xff] }
 0x136   : > { %12349 = vst [vmem:[#allocation15_spill] sm:$0xff] %v10040_v28  ;;  %12350 = vst [vmem:[#allocation16_spill] sm:$0xff] %v10042_v6  ;;  %7785 = vmatprep.subr.mxu0 %v6233_v60  ;;  %v2440_v28 = vrot.slane %v10053_v47, 1 }
 0x137   : > { %v7189_v15 = vpop.f32.mrf.mxu0  ;;  %v7269_v7 = vpop.f32.mrf.mxu1  ;;  %7668 = vmatmul.mubr.f32.gmra.mxu0 %v8640_v36  ;;  %v2439_v36 = vrot.slane %v10050_v5, 1 }
 0x138   : > { %v10055_v38 = vadd.f32 %v7269_v7, %v7189_v15  ;;  %7748 = vmatmul.mubr.f32.gmra.mxu1 %v9389_v24  ;;  %7670 = vmatprep.mubr.f32.mxu0 %v8641_v14  ;;  %v6231_v24 = vld [vmem:[%s12163_s1 + $0x400] sm:$0xff] }
 0x139   : > { %v10059_v42 = vpop.f32.mrf.mxu0  ;;  %v10061_v6 = vpop.f32.mrf.mxu1  ;;  %7750 = vmatprep.mubr.f32.mxu1 %v9393_v16  ;;  %7786 = vmatpush3.msra.mxu0 %v6233_v60 }
 0x13a   : > { %12351 = vst [vmem:[#allocation17_spill] sm:$0xff] %v10059_v42  ;;  %12352 = vst [vmem:[#allocation18_spill] sm:$0xff] %v10061_v6  ;;  %7787 = vmatprep.subr.mxu0 %v6232_v51  ;;  %v2442_v6 = vrot.slane %v10067_v58, 1 }
 0x13b   : > { %v7192_v15 = vpop.f32.mrf.mxu0  ;;  %v7272_v7 = vpop.f32.mrf.mxu1  ;;  %7671 = vmatmul.mubr.f32.gmra.mxu0 %v8642_v43  ;;  %v2441_v43 = vsel %vm356_vm0, %v2439_v36, %v2440_v28 }
 0x13c   : > { %v10073_v14 = vadd.f32 %v7272_v7, %v7192_v15  ;;  %7751 = vmatmul.mubr.f32.gmra.mxu1 %v12343_v61  ;;  %7673 = vmatprep.mubr.f32.mxu0 %v9700_v44 }
 0x13d   : > { %v10077_v16 = vpop.f32.mrf.mxu0  ;;  %v10079_v60 = vpop.f32.mrf.mxu1  ;;  %7753 = vmatprep.mubr.f32.mxu1 %v9871_v17  ;;  %7788 = vmatpush3.msra.mxu0 %v6232_v51  ;;  %v2443_v17 = vsel %vm356_vm0, %v2440_v28, %v2442_v6 }
 0x13e   : > { %7789 = vmatprep.subr.mxu0 %v6231_v24 }
 0x13f   : > { %v7195_v42 = vpop.f32.mrf.mxu0  ;;  %v7275_v4 = vpop.f32.mrf.mxu1  ;;  %7674 = vmatmul.mubr.f32.gmra.mxu0 %v9713_v13 }
 0x140   : > { %v10085_v15 = vadd.f32 %v7275_v4, %v7195_v42  ;;  %7754 = vmatmul.mubr.f32.gmra.mxu1 %v9883_v23  ;;  %7676 = vmatprep.mubr.f32.mxu0 %v10050_v5 }
 0x141   : > { %v10089_v61 = vpop.f32.mrf.mxu0  ;;  %v10091_v44 = vpop.f32.mrf.mxu1  ;;  %7756 = vmatprep.mubr.f32.mxu1 %v2441_v43  ;;  %7790 = vmatpush3.msra.mxu0 %v6231_v24 }
 0x143   : > { %v7198_v51 = vpop.f32.mrf.mxu0  ;;  %v7278_v36 = vpop.f32.mrf.mxu1  ;;  %7677 = vmatmul.mubr.f32.gmra.mxu0 %v10053_v47 }
 0x144   : > { %v10095_v7 = vadd.f32 %v7278_v36, %v7198_v51  ;;  %7757 = vmatmul.mubr.f32.gmra.mxu1 %v2443_v17  ;;  %7791 = vmatprep.mubr.f32.mxu0 %v9446_v12 }
 0x145   : > { %v10098_v4 = vpop.f32.mrf.mxu0  ;;  %v10100_v13 = vpop.f32.mrf.mxu1 }
 0x147   : > { %v7313_v23 = vpop.f32.mrf.mxu0  ;;  %7792 = vmatmul.mubr.f32.vlgmr.msra.gmra.mxu0 %v9461_v29  ;;  %v7393_v24 = vpop.f32.mrf.mxu1 }
 0x148   : > { %v1292_v42 = vadd.f32 %v7313_v23, %v9906_v10  ;;  %7794 = vmatprep.mubr.f32.mxu0 %v9466_v39 }
 0x149   : > { %v1132_v28 = vpop.f32.mrf.mxu0  ;;  %v10110_v17 = vpop.f32.mrf.mxu1 }
 0x14a   : > { %v10106_v6 = vadd.f32 %v1132_v28, %v9913_v55  ;;  %v10108_v43 = vadd.f32 %v7393_v24, %v1292_v42 }
 0x14b   : > { %v7316_v12 = vpop.f32.mrf.mxu0  ;;  %7795 = vmatmul.mubr.f32.gmra.mxu0 %v9480_v62 }
 0x14c   : > { %v1294_v51 = vadd.f32 %v7316_v12, %v9920_v22  ;;  %v7396_v36 = vpop.f32.mrf.mxu1  ;;  %7797 = vmatprep.mubr.f32.mxu0 %v9485_v56 }
 0x14d   : > { %v1142_v29 = vpop.f32.mrf.mxu0 }
 0x14e   : > { %v10116_v10 = vadd.f32 %v1142_v29, %v9925_v20  ;;  %v10118_v39 = vadd.f32 %v7396_v36, %v1294_v51  ;;  %v10120_v55 = vpop.f32.mrf.mxu1 }
 0x14f   : > { %v7319_v23 = vpop.f32.mrf.mxu0  ;;  %7798 = vmatmul.mubr.f32.gmra.mxu0 %v9499_v8 }
 0x150   : > { %v1296_v42 = vadd.f32 %v7319_v23, %v9931_v30  ;;  %v7399_v24 = vpop.f32.mrf.mxu1  ;;  %7800 = vmatprep.mubr.f32.mxu0 %v9504_v33 }
 0x151   : > { %v1152_v62 = vpop.f32.mrf.mxu0 }
 0x152   : > { %v10126_v22 = vadd.f32 %v1152_v62, %v9936_v54  ;;  %v10128_v56 = vadd.f32 %v7399_v24, %v1296_v42  ;;  %v10130_v20 = vpop.f32.mrf.mxu1 }
 0x153   : > { %v7322_v28 = vpop.f32.mrf.mxu0  ;;  %7801 = vmatmul.mubr.f32.gmra.mxu0 %v9518_v18  ;;  %v3405_v18 = vld [vmem:[#allocation3 + $0xf8] sm:$0xff] }
 0x154   : > { %v1298_v12 = vadd.f32 %v7322_v28, %v9942_v59  ;;  %v7402_v51 = vpop.f32.mrf.mxu1  ;;  %7803 = vmatprep.mubr.f32.mxu0 %v9523_v52  ;;  %7839 = vmatprep.subr.mxu1 %v3405_v18 }
 0x155   : > { %v1162_v8 = vpop.f32.mrf.mxu0  ;;  %7840 = vmatpush3.msra.mxu1 %v3405_v18 }
 0x156   : > { %v10136_v30 = vadd.f32 %v1162_v8, %v9947_v0  ;;  %v10138_v33 = vadd.f32 %v7402_v51, %v1298_v12  ;;  %v10140_v54 = vpop.f32.mrf.mxu1 }
 0x157   : > { %v7325_v36 = vpop.f32.mrf.mxu0  ;;  %7804 = vmatmul.mubr.f32.gmra.mxu0 %v9537_v31 }
 0x158   : > { %v1300_v29 = vadd.f32 %v7325_v36, %v9953_v48  ;;  %v7405_v23 = vpop.f32.mrf.mxu1  ;;  %7806 = vmatprep.mubr.f32.mxu0 %v9542_v45  ;;  %v3404_v45 = vld [vmem:[#allocation3 + $0xf0] sm:$0xff] }
 0x159   : > { %v1172_v59 = vpop.f32.mrf.mxu0  ;;  %7841 = vmatprep.subr.mxu1 %v3404_v45 }
 0x15a   : > { %v10146_v52 = vadd.f32 %v1172_v59, %v9958_v11  ;;  %v10148_v0 = vadd.f32 %v7405_v23, %v1300_v29  ;;  %v10150_v42 = vpop.f32.mrf.mxu1  ;;  %7842 = vmatpush3.msra.mxu1 %v3404_v45 }
 0x15b   : > { %v7328_v24 = vpop.f32.mrf.mxu0  ;;  %7807 = vmatmul.mubr.f32.gmra.mxu0 %v9556_v46 }
 0x15c   : > { %v1302_v31 = vadd.f32 %v7328_v24, %v9964_v25  ;;  %v7408_v48 = vpop.f32.mrf.mxu1  ;;  %7809 = vmatprep.mubr.f32.mxu0 %v9561_v37  ;;  %v3403_v37 = vld [vmem:[#allocation3 + $0xe8] sm:$0xff] }
 0x15d   : > { %v1182_v62 = vpop.f32.mrf.mxu0  ;;  %7843 = vmatprep.subr.mxu1 %v3403_v37 }
 0x15e   : > { %v10156_v28 = vadd.f32 %v1182_v62, %v9969_v26  ;;  %v10158_v11 = vadd.f32 %v7408_v48, %v1302_v31  ;;  %v10160_v12 = vpop.f32.mrf.mxu1  ;;  %7844 = vmatpush3.msra.mxu1 %v3403_v37  ;;  %v3401_v48 = vld [vmem:[#allocation3 + $0xd8] sm:$0xff] }
 0x15f   : > { %v7331_v51 = vpop.f32.mrf.mxu0  ;;  %7810 = vmatmul.mubr.f32.gmra.mxu0 %v9575_v63 }
 0x160   : > { %v1304_v46 = vadd.f32 %v7331_v51, %v9975_v41  ;;  %v7411_v25 = vpop.f32.mrf.mxu1  ;;  %7812 = vmatprep.mubr.f32.mxu0 %v9580_v27  ;;  %v3402_v27 = vld [vmem:[#allocation3 + $0xe0] sm:$0xff] }
 0x161   : > { %v1192_v8 = vpop.f32.mrf.mxu0  ;;  %7845 = vmatprep.subr.mxu1 %v3402_v27 }
 0x162   : > { %v10166_v36 = vadd.f32 %v1192_v8, %v9980_v53  ;;  %v10168_v26 = vadd.f32 %v7411_v25, %v1304_v46  ;;  %v10170_v29 = vpop.f32.mrf.mxu1  ;;  %7846 = vmatpush3.msra.mxu1 %v3402_v27  ;;  %v3400_v25 = vld [vmem:[#allocation3 + $0xd0] sm:$0xff] }
 0x163   : > { %v7334_v23 = vpop.f32.mrf.mxu0  ;;  %7813 = vmatmul.mubr.f32.gmra.mxu0 %v9594_v21  ;;  %v858_v21 = vadd.f32 %v10003_v1, %v10001_v49  ;;  %7847 = vmatprep.subr.mxu1 %v3401_v48 }
 0x164   : > { %v1306_v63 = vadd.f32 %v7334_v23, %v9986_v35  ;;  %v7414_v41 = vpop.f32.mrf.mxu1  ;;  %7815 = vmatprep.mubr.f32.mxu0 %v9599_v34  ;;  %7848 = vmatpush3.msra.mxu1 %v3401_v48  ;;  %v12358_v48 = vld [vmem:[#allocation37_spill] sm:$0xff] }
 0x165   : > { %v1202_v18 = vpop.f32.mrf.mxu0  ;;  %7849 = vmatprep.subr.mxu1 %v3400_v25 }
 0x166   : > { %v10176_v59 = vadd.f32 %v1202_v18, %v9991_v2  ;;  %v10178_v53 = vadd.f32 %v7414_v41, %v1306_v63  ;;  %v10180_v24 = vpop.f32.mrf.mxu1  ;;  %7850 = vmatpush3.msra.mxu1 %v3400_v25  ;;  %v12355_v63 = vld [vmem:[#allocation35_spill] sm:$0xff]  ;;  %v12356_v18 = vld [vmem:[#allocation36_spill] sm:$0xff] }
 0x167   : > { %v7337_v31 = vpop.f32.mrf.mxu0  ;;  %7816 = vmatmul.mubr.f32.gmra.mxu0 %v9613_v50  ;;  %v12353_v50 = vld [vmem:[#allocation33_spill] sm:$0xff] }
 0x168   : > { %v1308_v35 = vadd.f32 %v7337_v31, %v9997_v40  ;;  %v7417_v34 = vpop.f32.mrf.mxu1  ;;  %7818 = vmatprep.mubr.f32.mxu0 %v9618_v19  ;;  %v12354_v40 = vld [vmem:[#allocation34_spill] sm:$0xff] }
 0x169   : > { %v1212_v45 = vpop.f32.mrf.mxu0 }
 0x16a   : > { %v10187_v2 = vadd.f32 %v1212_v45, %v858_v21  ;;  %v10189_v62 = vadd.f32 %v7417_v34, %v1308_v35  ;;  %v10191_v51 = vpop.f32.mrf.mxu1 }
 0x16b   : > { %v7340_v46 = vpop.f32.mrf.mxu0  ;;  %7819 = vmatmul.mubr.f32.gmra.mxu0 %v12353_v50  ;;  %v12359_v50 = vld [vmem:[#allocation38_spill] sm:$0xff] }
 0x16c   : > { %v1310_v49 = vadd.f32 %v7340_v46, %v10010_v57  ;;  %v7420_v1 = vpop.f32.mrf.mxu1  ;;  %7821 = vmatprep.mubr.f32.mxu0 %v12354_v40  ;;  %v3399_v57 = vld [vmem:[#allocation3 + $0xc8] sm:$0xff] }
 0x16d   : > { %v10196_v19 = vpop.f32.mrf.mxu0  ;;  %7851 = vmatprep.subr.mxu1 %v3399_v57 }
 0x16e   : > { %v10198_v37 = vadd.f32 %v7420_v1, %v1310_v49  ;;  %v10200_v8 = vpop.f32.mrf.mxu1  ;;  %7852 = vmatpush3.msra.mxu1 %v3399_v57  ;;  %v3228_v49 = vld [vmem:[#allocation3 + $0x78] sm:$0xff]  ;;  %v3226_v57 = vld [vmem:[#allocation3 + $0x68] sm:$0xff] }
 0x16f   : > { %v7343_v23 = vpop.f32.mrf.mxu0  ;;  %7822 = vmatmul.mubr.f32.gmra.mxu0 %v12355_v63  ;;  %7919 = vmatprep.subr.mxu0 %v3228_v49 }
 0x170   : > { %v1312_v41 = vadd.f32 %v7343_v23, %v10023_v32  ;;  %v7423_v27 = vpop.f32.mrf.mxu1  ;;  %7824 = vmatprep.mubr.f32.mxu0 %v12356_v18  ;;  %v3398_v32 = vld [vmem:[#allocation3 + $0xc0] sm:$0xff]  ;;  %7920 = vmatpush3.msra.mxu0 %v3228_v49  ;;  %v3227_v23 = vld [vmem:[#allocation3 + $0x70] sm:$0xff]  ;;  %v3397_v18 = vld [vmem:[#allocation3 + $0xb8] sm:$0xff] }
 0x171   : > { %v10205_v31 = vpop.f32.mrf.mxu0  ;;  %7853 = vmatprep.subr.mxu1 %v3398_v32  ;;  %7921 = vmatprep.subr.mxu0 %v3227_v23 }
 0x172   : > { %v10207_v21 = vadd.f32 %v7423_v27, %v1312_v41  ;;  %v10209_v35 = vpop.f32.mrf.mxu1  ;;  %7854 = vmatpush3.msra.mxu1 %v3398_v32  ;;  %v12361_v41 = vld [vmem:[#allocation39_spill] sm:$0xff]  ;;  %7922 = vmatpush3.msra.mxu0 %v3227_v23  ;;  %v12364_v23 = vld [vmem:[#allocation9_spill] sm:$0xff] }
 0x173   : > { %12357 = vst [vmem:[#allocation19_spill] sm:$0xff] %v10209_v35  ;;  %v7346_v34 = vpop.f32.mrf.mxu0  ;;  %7825 = vmatmul.mubr.f32.gmra.mxu0 %v12358_v48  ;;  %v2721_v48 = vrot.slane %v10053_v47, 2  ;;  %7855 = vmatprep.subr.mxu1 %v3397_v18  ;;  %v2723_v47 = vrot.slane %v10067_v58, 2 }
 0x174   : > { %v1314_v45 = vadd.f32 %v7346_v34, %v10036_v3  ;;  %v7426_v46 = vpop.f32.mrf.mxu1  ;;  %7827 = vmatprep.mubr.f32.mxu0 %v12359_v50  ;;  %v2720_v34 = vrot.slane %v10050_v5, 2  ;;  %7923 = vmatprep.subr.mxu0 %v3226_v57 }
 0x175   : > { %v10214_v1 = vpop.f32.mrf.mxu0  ;;  %7856 = vmatpush3.msra.mxu1 %v3397_v18  ;;  %7924 = vmatpush3.msra.mxu0 %v3226_v57 }
 0x176   : > { %v10216_v40 = vadd.f32 %v7426_v46, %v1314_v45  ;;  %v10218_v25 = vpop.f32.mrf.mxu1 }
 0x177   : > { %12360 = vst [vmem:[#allocation20_spill] sm:$0xff] %v10218_v25  ;;  %v7349_v63 = vpop.f32.mrf.mxu0  ;;  %7828 = vmatmul.mubr.f32.gmra.mxu0 %v12361_v41  ;;  %v3224_v41 = vld [vmem:[#allocation3 + $0x58] sm:$0xff]  ;;  %v3392_v25 = vld [vmem:[#allocation3 + $0x90] sm:$0xff] }
 0x178   : > { %v1316_v3 = vadd.f32 %v7349_v63, %v10055_v38  ;;  %v7429_v27 = vpop.f32.mrf.mxu1  ;;  %7830 = vmatprep.mubr.f32.mxu0 %v9694_v9  ;;  %v3225_v38 = vld [vmem:[#allocation3 + $0x60] sm:$0xff]  ;;  %v12363_v9 = vld [vmem:[#allocation40_spill] sm:$0xff]  ;;  %v3396_v63 = vld [vmem:[#allocation3 + $0xb0] sm:$0xff] }
 0x179   : > { %v10225_v45 = vpop.f32.mrf.mxu0  ;;  %7925 = vmatprep.subr.mxu0 %v3225_v38  ;;  %7857 = vmatprep.subr.mxu1 %v3396_v63 }
 0x17a   : > { %v10227_v46 = vadd.f32 %v7429_v27, %v1316_v3  ;;  %v10229_v50 = vpop.f32.mrf.mxu1  ;;  %7926 = vmatpush3.msra.mxu0 %v3225_v38  ;;  %v2722_v27 = vsel %vm936_vm1, %v2720_v34, %v2721_v48  ;;  %7858 = vmatpush3.msra.mxu1 %v3396_v63  ;;  %v3395_v34 = vld [vmem:[#allocation3 + $0xa8] sm:$0xff] }
 0x17b   : > { %12362 = vst [vmem:[#allocation21_spill] sm:$0xff] %v10229_v50  ;;  %v7352_v32 = vpop.f32.mrf.mxu0  ;;  %7831 = vmatmul.mubr.f32.gmra.mxu0 %v12363_v9  ;;  %7927 = vmatprep.subr.mxu0 %v3224_v41  ;;  %v12366_v9 = vld [vmem:[#allocation10_spill] sm:$0xff] }
 0x17c   : > { %v1318_v49 = vadd.f32 %v7352_v32, %v10073_v14  ;;  %v7432_v5 = vpop.f32.mrf.mxu1  ;;  %7833 = vmatprep.mubr.f32.mxu0 %v12364_v23  ;;  %7928 = vmatpush3.msra.mxu0 %v3224_v41  ;;  %v3223_v14 = vld [vmem:[#allocation3 + $0x50] sm:$0xff]  ;;  %v2724_v23 = vsel %vm936_vm1, %v2721_v48, %v2723_v47  ;;  %v3222_v50 = vld [vmem:[#allocation3 + $0x48] sm:$0xff]  ;;  %v3221_v41 = vld [vmem:[#allocation3 + $0x40] sm:$0xff] }
 0x17d   : > { %v10235_v3 = vpop.f32.mrf.mxu0  ;;  %7929 = vmatprep.subr.mxu0 %v3223_v14  ;;  %7859 = vmatprep.subr.mxu1 %v3395_v34  ;;  %v3394_v47 = vld [vmem:[#allocation3 + $0xa0] sm:$0xff] }
 0x17e   : > { %v10238_v18 = vadd.f32 %v7432_v5, %v1318_v49  ;;  %v10240_v57 = vpop.f32.mrf.mxu1  ;;  %7930 = vmatpush3.msra.mxu0 %v3223_v14  ;;  %7860 = vmatpush3.msra.mxu1 %v3395_v34  ;;  %v3218_v34 = vld [vmem:[#allocation3 + $0x28] sm:$0xff] }
 0x17f   : > { %12365 = vst [vmem:[#allocation22_spill] sm:$0xff] %v10240_v57  ;;  %v7355_v32 = vpop.f32.mrf.mxu0  ;;  %7834 = vmatmul.mubr.f32.gmra.mxu0 %v12366_v9  ;;  %7931 = vmatprep.subr.mxu0 %v3222_v50 }
 0x180   : > { %v1320_v58 = vadd.f32 %v7355_v32, %v10085_v15  ;;  %v7435_v38 = vpop.f32.mrf.mxu1  ;;  %7836 = vmatprep.mubr.f32.mxu0 %v2722_v27  ;;  %7932 = vmatpush3.msra.mxu0 %v3222_v50  ;;  %v3220_v27 = vld [vmem:[#allocation3 + $0x38] sm:$0xff]  ;;  %v3219_v50 = vld [vmem:[#allocation3 + $0x30] sm:$0xff] }
 0x181   : > { %v10245_v49 = vpop.f32.mrf.mxu0  ;;  %7933 = vmatprep.subr.mxu0 %v3221_v41  ;;  %7861 = vmatprep.subr.mxu1 %v3394_v47 }
 0x182   : > { %v10247_v5 = vadd.f32 %v7435_v38, %v1320_v58  ;;  %v10249_v63 = vpop.f32.mrf.mxu1  ;;  %7934 = vmatpush3.msra.mxu0 %v3221_v41  ;;  %7862 = vmatpush3.msra.mxu1 %v3394_v47  ;;  %v12226_v47 = vmov 0.0  }
 0x183   : > { %12367 = vst [vmem:[#allocation23_spill] sm:$0xff] %v10249_v63  ;;  %v7358_v9 = vpop.f32.mrf.mxu0  ;;  %7837 = vmatmul.mubr.f32.gmra.mxu0 %v2724_v23  ;;  %7935 = vmatprep.subr.mxu0 %v3220_v27  ;;  %3076 = vst [vmem:[#allocation2 + $0x20] sm:$0xff] %v12226_v47  ;;  %v3215_v63 = vld [vmem:[#allocation3 + $0x10] sm:$0xff] }
 0x184   : > { %v1322_v15 = vadd.f32 %v7358_v9, %v10095_v7  ;;  %v7438_v48 = vpop.f32.mrf.mxu1  ;;  %7936 = vmatpush3.msra.mxu0 %v3220_v27  ;;  %3077 = vst [vmem:[#allocation2 + $0x28] sm:$0x3] %v12226_v47  ;;  %3072 = vst [vmem:[#allocation2] sm:$0xff] %v12226_v47  ;;  %7951 = vmatprep.mubr.f32.mxu0 %v12226_v47 }
 0x185   : > { %v10252_v14 = vpop.f32.mrf.mxu0  ;;  %7937 = vmatprep.subr.mxu0 %v3219_v50  ;;  %3074 = vst [vmem:[#allocation2 + $0x10] sm:$0x3] %v12226_v47  ;;  %3075 = vst [vmem:[#allocation2 + $0x18] sm:$0xff] %v12226_v47 }
 0x186   : > { %v10254_v32 = vadd.f32 %v7438_v48, %v1322_v15  ;;  %v10256_v58 = vpop.f32.mrf.mxu1  ;;  %7938 = vmatpush3.msra.mxu0 %v3219_v50  ;;  %v3217_v15 = vld [vmem:[#allocation3 + $0x20] sm:$0xff]  ;;  %3078 = vst [vmem:[#allocation2 + $0x30] sm:$0xff] %v12226_v47  ;;  %3079 = vst [vmem:[#allocation2 + $0x38] sm:$0xff] %v12226_v47  ;;  %v3216_v50 = vld [vmem:[#allocation3 + $0x18] sm:$0xff] }
 0x187   : > { %12368 = vst [vmem:[#allocation24_spill] sm:$0xff] %v10256_v58  ;;  %v7473_v38 = vpop.f32.mrf.mxu0  ;;  %7939 = vmatprep.subr.mxu0 %v3218_v34  ;;  %3080 = vst [vmem:[#allocation2 + $0x40] sm:$0x3] %v12226_v47 }
 0x188   : > { %v10259_v23 = vadd.f32 %v7473_v38, %v10108_v43  ;;  %v10261_v7 = vpop.f32.mrf.mxu1  ;;  %7940 = vmatpush3.msra.mxu0 %v3218_v34  ;;  %3081 = vst [vmem:[#allocation2 + $0x48] sm:$0xff] %v12226_v47  ;;  %3082 = vst [vmem:[#allocation2 + $0x50] sm:$0xff] %v12226_v47  ;;  %v3393_v34 = vld [vmem:[#allocation3 + $0x98] sm:$0xff] }
 0x189   : > { %v10263_v41 = vpop.f32.mrf.mxu0  ;;  %3083 = vst [vmem:[#allocation2 + $0x58] sm:$0x3] %v12226_v47  ;;  %3084 = vst [vmem:[#allocation2 + $0x60] sm:$0xff] %v12226_v47  ;;  %7941 = vmatprep.subr.mxu0 %v3217_v15  ;;  %7863 = vmatprep.subr.mxu1 %v3393_v34 }
 0x18a   : > { %v10265_v9 = vpop.f32.mrf.mxu1  ;;  %3085 = vst [vmem:[#allocation2 + $0x68] sm:$0xff] %v12226_v47  ;;  %3086 = vst [vmem:[#allocation2 + $0x70] sm:$0x3] %v12226_v47  ;;  %7942 = vmatpush3.msra.mxu0 %v3217_v15  ;;  %7864 = vmatpush3.msra.mxu1 %v3393_v34  ;;  %v3214_v15 = vld [vmem:[#allocation3 + $0x8] sm:$0xff]  ;;  %v12375_v34 = vmov 0.0  }
 0x18b   : > { %v7476_v48 = vpop.f32.mrf.mxu0  ;;  %3087 = vst [vmem:[#allocation2 + $0x78] sm:$0xff] %v12226_v47  ;;  %3088 = vst [vmem:[#allocation2 + $0x80] sm:$0xff] %v12226_v47  ;;  %7943 = vmatprep.subr.mxu0 %v3216_v50  ;;  %7865 = vmatprep.subr.mxu1 %v3392_v25 }
 0x18c   : > { %3089 = vst [vmem:[#allocation2 + $0x88] sm:$0x3] %v12226_v47  ;;  %3090 = vst [vmem:[#allocation2 + $0x90] sm:$0xff] %v12226_v47  ;;  %v10320_v43 = vadd.f32 %v7476_v48, %v10118_v39  ;;  %v10322_v27 = vpop.f32.mrf.mxu1  ;;  %7944 = vmatpush3.msra.mxu0 %v3216_v50  ;;  %7866 = vmatpush3.msra.mxu1 %v3392_v25  ;;  %v3213_v50 = vld [vmem:[#allocation3] sm:$0xff] }
 0x18d   : > { %3091 = vst [vmem:[#allocation2 + $0x98] sm:$0xff] %v12226_v47  ;;  %3092 = vst [vmem:[#allocation2 + $0xa0] sm:$0x3] %v12226_v47  ;;  %v10324_v38 = vpop.f32.mrf.mxu0  ;;  %7945 = vmatprep.subr.mxu0 %v3215_v63  ;;  %v3161_v35 = vld [vmem:[#allocation2 + $0x10] sm:$0x3] }
 0x18e   : > { %3093 = vst [vmem:[#allocation2 + $0xa8] sm:$0xff] %v12226_v47  ;;  %3094 = vst [vmem:[#allocation2 + $0xb0] sm:$0xff] %v12226_v47  ;;  %v10326_v58 = vpop.f32.mrf.mxu1  ;;  %7946 = vmatpush3.msra.mxu0 %v3215_v63 }
 0x18f   : > { %3095 = vst [vmem:[#allocation2 + $0xb8] sm:$0x3] %v12226_v47  ;;  %3096 = vst [vmem:[#allocation2 + $0xc0] sm:$0xff] %v12226_v47  ;;  %v7479_v57 = vpop.f32.mrf.mxu0  ;;  %7947 = vmatprep.subr.mxu0 %v3214_v15 }
 0x190   : > { %3097 = vst [vmem:[#allocation2 + $0xc8] sm:$0xff] %v12226_v47  ;;  %3098 = vst [vmem:[#allocation2 + $0xd0] sm:$0x3] %v12226_v47  ;;  %v10329_v39 = vadd.f32 %v7479_v57, %v10128_v56  ;;  %v10331_v48 = vpop.f32.mrf.mxu1  ;;  %7948 = vmatpush3.msra.mxu0 %v3214_v15  ;;  %v3390_v57 = vld [vmem:[#allocation3 + $0x80] sm:$0xff] }
 0x191   : > { %3099 = vst [vmem:[#allocation2 + $0xd8] sm:$0xff] %v12226_v47  ;;  %3100 = vst [vmem:[#allocation2 + $0xe0] sm:$0xff] %v12226_v47  ;;  %7949 = vmatprep.subr.mxu0 %v3213_v50 }
 0x192   : > { %3101 = vst [vmem:[#allocation2 + $0xe8] sm:$0x3] %v12226_v47  ;;  %3102 = vst [vmem:[#allocation2 + $0xf0] sm:$0xff] %v12226_v47  ;;  %7950 = vmatpush3.msra.mxu0 %v3213_v50 }
 0x193   : > { %3103 = vst [vmem:[#allocation2 + $0xf8] sm:$0xff] %v12226_v47  ;;  %3104 = vst [vmem:[#allocation2 + $0x100] sm:$0x3] %v12226_v47  ;;  %7952 = vmatmul.mubr.f32.vlgmr.msra.gmra.mxu0 %v12375_v34 }
 0x194   : > { %3105 = vst [vmem:[#allocation2 + $0x108] sm:$0xff] %v12226_v47  ;;  %3106 = vst [vmem:[#allocation2 + $0x110] sm:$0xff] %v12226_v47 }
 0x195   : > { %3107 = vst [vmem:[#allocation2 + $0x118] sm:$0x3] %v12226_v47  ;;  %3108 = vst [vmem:[#allocation2 + $0x120] sm:$0xff] %v12226_v47 }
 0x196   : > { %3109 = vst [vmem:[#allocation2 + $0x128] sm:$0xff] %v12226_v47  ;;  %3110 = vst [vmem:[#allocation2 + $0x130] sm:$0x3] %v12226_v47 }
 0x197   : > { %3111 = vst [vmem:[#allocation2 + $0x138] sm:$0xff] %v12226_v47  ;;  %3112 = vst [vmem:[#allocation2 + $0x140] sm:$0xff] %v12226_v47 }
 0x198   : > { %3113 = vst [vmem:[#allocation2 + $0x148] sm:$0x3] %v12226_v47  ;;  %3114 = vst [vmem:[#allocation2 + $0x150] sm:$0xff] %v12226_v47 }
 0x199   : > { %3115 = vst [vmem:[#allocation2 + $0x158] sm:$0xff] %v12226_v47  ;;  %3116 = vst [vmem:[#allocation2 + $0x160] sm:$0x3] %v12226_v47 }
 0x19a   : > { %3117 = vst [vmem:[#allocation2 + $0x168] sm:$0xff] %v12226_v47  ;;  %3118 = vst [vmem:[#allocation2 + $0x170] sm:$0xff] %v12226_v47 }
 0x19b   : > { %3119 = vst [vmem:[#allocation2 + $0x178] sm:$0x3] %v12226_v47  ;;  %3120 = vst [vmem:[#allocation2 + $0x180] sm:$0xff] %v12226_v47 }
 0x19c   : > { %3121 = vst [vmem:[#allocation2 + $0x188] sm:$0xff] %v12226_v47  ;;  %3122 = vst [vmem:[#allocation2 + $0x190] sm:$0x3] %v12226_v47 }
 0x19d   : > { %3125 = vst [vmem:[#allocation2 + $0x1a8] sm:$0x3] %v12226_v47  ;;  %12369 = vst [vmem:[#allocation25_spill] sm:$0xff] %v10320_v43  ;;  %v10333_v47 = vpop.f32.mrf.mxu0  ;;  %v3277_v43 = vrot.slane %v12375_v34, 1 }
 0x19e   : > { %12370 = vst [vmem:[#allocation26_spill] sm:$0xff] %v10322_v27  ;;  %12371 = vst [vmem:[#allocation27_spill] sm:$0xff] %v10326_v58  ;;  %v3391_v27 = vld [vmem:[#allocation3 + $0x88] sm:$0xff]  ;;  %v10335_v58 = vpop.f32.mrf.mxu1 }
 0x19f   : > { %12372 = vst [vmem:[#allocation28_spill] sm:$0xff] %v10329_v39  ;;  %12373 = vst [vmem:[#allocation29_spill] sm:$0xff] %v10331_v48  ;;  %7867 = vmatprep.subr.mxu1 %v3391_v27  ;;  %v7482_v56 = vpop.f32.mrf.mxu0  ;;  %v3280_v48 = vrot.slane %v3161_v35, 1  ;;  %7871 = vmatprep.mubr.f32.mxu1 %v3277_v43 }
 0x1a0   : > { %12374 = vst [vmem:[#allocation30_spill] sm:$0xff] %v10335_v58  ;;  %7868 = vmatpush3.msra.mxu1 %v3391_v27  ;;  %v10339_v63 = vadd.f32 %v7482_v56, %v10138_v33  ;;  %v10341_v39 = vpop.f32.mrf.mxu1 }
 0x1a1   : > { %12376 = vst [vmem:[#allocation31_spill] sm:$0xff] %v10341_v39  ;;  %7869 = vmatprep.subr.mxu1 %v3390_v57  ;;  %v10343_v25 = vpop.f32.mrf.mxu0  ;;  %v3281_v15 = vsel %vm356_vm0, %v3277_v43, %v3280_v48 }
 0x1a2   : > { %7870 = vmatpush3.msra.mxu1 %v3390_v57  ;;  %v10347_v58 = vpop.f32.mrf.mxu1 }
 0x1a3   : > { %12377 = vst [vmem:[#allocation32_spill] sm:$0xff] %v10347_v58  ;;  %v7485_v27 = vpop.f32.mrf.mxu0  ;;  %7872 = vmatmul.mubr.f32.vlgmr.msra.gmra.mxu1 %v3281_v15  ;;  %v3984_v15 = vld [vmem:[#allocation3 + $0x178] sm:$0xff] }
 0x1a4   : > { %v10350_v35 = vadd.f32 %v7485_v27, %v10148_v0  ;;  %v10352_v33 = vpop.f32.mrf.mxu1  ;;  %7999 = vmatprep.subr.mxu1 %v3984_v15 }
 0x1a5   : > { %12379 = vst [vmem:[#allocation34_spill] sm:$0xff] %v10352_v33  ;;  %v10354_v56 = vpop.f32.mrf.mxu0  ;;  %8000 = vmatpush3.msra.mxu1 %v3984_v15 }
 0x1a6   : > { %12378 = vst [vmem:[#allocation33_spill] sm:$0xff] %v10350_v35  ;;  %v10356_v50 = vpop.f32.mrf.mxu1 }
 0x1a7   : > { %12380 = vst [vmem:[#allocation35_spill] sm:$0xff] %v10356_v50  ;;  %v7488_v39 = vpop.f32.mrf.mxu0 }
 0x1a8   : > { %v10359_v57 = vadd.f32 %v7488_v39, %v10158_v11  ;;  %v10361_v34 = vpop.f32.mrf.mxu1  ;;  %v3983_v11 = vld [vmem:[#allocation3 + $0x170] sm:$0xff] }
 0x1a9   : > { %12382 = vst [vmem:[#allocation37_spill] sm:$0xff] %v10361_v34  ;;  %v10363_v48 = vpop.f32.mrf.mxu0  ;;  %8001 = vmatprep.subr.mxu1 %v3983_v11 }
 0x1aa   : > { %12381 = vst [vmem:[#allocation36_spill] sm:$0xff] %v10359_v57  ;;  %v10365_v43 = vpop.f32.mrf.mxu1  ;;  %8002 = vmatpush3.msra.mxu1 %v3983_v11 }
 0x1ab   : > { %12383 = vst [vmem:[#allocation38_spill] sm:$0xff] %v10365_v43  ;;  %v7491_v58 = vpop.f32.mrf.mxu0 }
 0x1ac   : > { %v10368_v0 = vadd.f32 %v7491_v58, %v10168_v26  ;;  %v10370_v27 = vpop.f32.mrf.mxu1  ;;  %v3982_v58 = vld [vmem:[#allocation3 + $0x168] sm:$0xff] }
 0x1ad   : > { %12385 = vst [vmem:[#allocation40_spill] sm:$0xff] %v10370_v27  ;;  %v10372_v50 = vpop.f32.mrf.mxu0  ;;  %8003 = vmatprep.subr.mxu1 %v3982_v58 }
 0x1ae   : > { %12384 = vst [vmem:[#allocation39_spill] sm:$0xff] %v10368_v0  ;;  %12386 = vst [vmem:[#allocation9_spill] sm:$0xff] %v10372_v50  ;;  %v10374_v33 = vpop.f32.mrf.mxu1  ;;  %8004 = vmatpush3.msra.mxu1 %v3982_v58  ;;  %v12464_v50 = vld [vmem:[#allocation17_spill] sm:$0xff] }
 0x1af   : > { %12387 = vst [vmem:[#allocation10_spill] sm:$0xff] %v10374_v33  ;;  %v7494_v39 = vpop.f32.mrf.mxu0 }
 0x1b0   : > { %v10377_v34 = vadd.f32 %v7494_v39, %v10178_v53  ;;  %v10379_v43 = vpop.f32.mrf.mxu1  ;;  %v3981_v39 = vld [vmem:[#allocation3 + $0x160] sm:$0xff] }
 0x1b1   : > { %12389 = vst [vmem:[#allocation42_spill] sm:$0xff] %v10379_v43  ;;  %v10381_v57 = vpop.f32.mrf.mxu0  ;;  %8005 = vmatprep.subr.mxu1 %v3981_v39 }
 0x1b2   : > { %12388 = vst [vmem:[#allocation41_spill] sm:$0xff] %v10377_v34  ;;  %12390 = vst [vmem:[#allocation43_spill] sm:$0xff] %v10381_v57  ;;  %v10383_v26 = vpop.f32.mrf.mxu1  ;;  %8006 = vmatpush3.msra.mxu1 %v3981_v39 }
 0x1b3   : > { %12391 = vst [vmem:[#allocation44_spill] sm:$0xff] %v10383_v26  ;;  %v7497_v27 = vpop.f32.mrf.mxu0 }
 0x1b4   : > { %v10386_v15 = vadd.f32 %v7497_v27, %v10189_v62  ;;  %v10388_v33 = vpop.f32.mrf.mxu1  ;;  %v3980_v27 = vld [vmem:[#allocation3 + $0x158] sm:$0xff] }
 0x1b5   : > { %12393 = vst [vmem:[#allocation46_spill] sm:$0xff] %v10388_v33  ;;  %v10390_v0 = vpop.f32.mrf.mxu0  ;;  %8007 = vmatprep.subr.mxu1 %v3980_v27 }
 0x1b6   : > { %12392 = vst [vmem:[#allocation45_spill] sm:$0xff] %v10386_v15  ;;  %12394 = vst [vmem:[#allocation47_spill] sm:$0xff] %v10390_v0  ;;  %v10392_v53 = vpop.f32.mrf.mxu1  ;;  %8008 = vmatpush3.msra.mxu1 %v3980_v27  ;;  %v3969_v0 = vld [vmem:[#allocation3 + $0x100] sm:$0xff] }
 0x1b7   : > { %12395 = vst [vmem:[#allocation48_spill] sm:$0xff] %v10392_v53  ;;  %v7500_v43 = vpop.f32.mrf.mxu0 }
 0x1b8   : > { %v10395_v11 = vadd.f32 %v7500_v43, %v10198_v37  ;;  %v10397_v26 = vpop.f32.mrf.mxu1  ;;  %v3979_v43 = vld [vmem:[#allocation3 + $0x150] sm:$0xff] }
 0x1b9   : > { %12397 = vst [vmem:[#allocation50_spill] sm:$0xff] %v10397_v26  ;;  %v10399_v34 = vpop.f32.mrf.mxu0  ;;  %8009 = vmatprep.subr.mxu1 %v3979_v43 }
 0x1ba   : > { %12396 = vst [vmem:[#allocation49_spill] sm:$0xff] %v10395_v11  ;;  %12398 = vst [vmem:[#allocation51_spill] sm:$0xff] %v10399_v34  ;;  %v10401_v62 = vpop.f32.mrf.mxu1  ;;  %8010 = vmatpush3.msra.mxu1 %v3979_v43 }
 0x1bb   : > { %12399 = vst [vmem:[#allocation52_spill] sm:$0xff] %v10401_v62  ;;  %v7503_v33 = vpop.f32.mrf.mxu0 }
 0x1bc   : > { %v10404_v58 = vadd.f32 %v7503_v33, %v10207_v21  ;;  %v10406_v53 = vpop.f32.mrf.mxu1  ;;  %v4258_v21 = vld [vmem:[#allocation3 + $0x1f8] sm:$0xff] }
 0x1bd   : > { %12401 = vst [vmem:[#allocation54_spill] sm:$0xff] %v10406_v53  ;;  %v10408_v15 = vpop.f32.mrf.mxu0  ;;  %v3978_v53 = vld [vmem:[#allocation3 + $0x148] sm:$0xff]  ;;  %8079 = vmatprep.subr.mxu0 %v4258_v21 }
 0x1be   : > { %12400 = vst [vmem:[#allocation53_spill] sm:$0xff] %v10404_v58  ;;  %12402 = vst [vmem:[#allocation55_spill] sm:$0xff] %v10408_v15  ;;  %v10410_v37 = vpop.f32.mrf.mxu1  ;;  %8011 = vmatprep.subr.mxu1 %v3978_v53  ;;  %8080 = vmatpush3.msra.mxu0 %v4258_v21  ;;  %v4255_v21 = vld [vmem:[#allocation3 + $0x1e0] sm:$0xff] }
 0x1bf   : > { %12403 = vst [vmem:[#allocation56_spill] sm:$0xff] %v10410_v37  ;;  %v7506_v26 = vpop.f32.mrf.mxu0  ;;  %v4257_v37 = vld [vmem:[#allocation3 + $0x1f0] sm:$0xff]  ;;  %8012 = vmatpush3.msra.mxu1 %v3978_v53 }
 0x1c0   : > { %v10413_v39 = vadd.f32 %v7506_v26, %v10216_v40  ;;  %v10415_v62 = vpop.f32.mrf.mxu1  ;;  %8081 = vmatprep.subr.mxu0 %v4257_v37  ;;  %v4256_v26 = vld [vmem:[#allocation3 + $0x1e8] sm:$0xff] }
 0x1c1   : > { %12405 = vst [vmem:[#allocation58_spill] sm:$0xff] %v10415_v62  ;;  %v10417_v11 = vpop.f32.mrf.mxu0  ;;  %8082 = vmatpush3.msra.mxu0 %v4257_v37  ;;  %v4254_v37 = vld [vmem:[#allocation3 + $0x1d8] sm:$0xff] }
 0x1c2   : > { %12404 = vst [vmem:[#allocation57_spill] sm:$0xff] %v10413_v39  ;;  %12406 = vst [vmem:[#allocation59_spill] sm:$0xff] %v10417_v11  ;;  %v10419_v33 = vpop.f32.mrf.mxu1  ;;  %8083 = vmatprep.subr.mxu0 %v4256_v26  ;;  %v4244_v11 = vld [vmem:[#allocation3 + $0x188] sm:$0xff] }
 0x1c3   : > { %12407 = vst [vmem:[#allocation60_spill] sm:$0xff] %v10419_v33  ;;  %v7509_v27 = vpop.f32.mrf.mxu0  ;;  %v3977_v33 = vld [vmem:[#allocation3 + $0x140] sm:$0xff]  ;;  %8084 = vmatpush3.msra.mxu0 %v4256_v26  ;;  %v4253_v26 = vld [vmem:[#allocation3 + $0x1d0] sm:$0xff] }
 0x1c4   : > { %v10422_v58 = vadd.f32 %v7509_v27, %v10227_v46  ;;  %v10424_v15 = vpop.f32.mrf.mxu1  ;;  %8013 = vmatprep.subr.mxu1 %v3977_v33  ;;  %8085 = vmatprep.subr.mxu0 %v4255_v21 }
 0x1c5   : > { %12409 = vst [vmem:[#allocation62_spill] sm:$0xff] %v10424_v15  ;;  %v10426_v40 = vpop.f32.mrf.mxu0  ;;  %8014 = vmatpush3.msra.mxu1 %v3977_v33  ;;  %8086 = vmatpush3.msra.mxu0 %v4255_v21  ;;  %v4252_v33 = vld [vmem:[#allocation3 + $0x1c8] sm:$0xff] }
 0x1c6   : > { %12408 = vst [vmem:[#allocation61_spill] sm:$0xff] %v10422_v58  ;;  %12410 = vst [vmem:[#allocation63_spill] sm:$0xff] %v10426_v40  ;;  %v10428_v43 = vpop.f32.mrf.mxu1  ;;  %8087 = vmatprep.subr.mxu0 %v4254_v37  ;;  %v3970_v40 = vld [vmem:[#allocation3 + $0x108] sm:$0xff] }
 0x1c7   : > { %12411 = vst [vmem:[#allocation64_spill] sm:$0xff] %v10428_v43  ;;  %v7512_v62 = vpop.f32.mrf.mxu0  ;;  %v3976_v43 = vld [vmem:[#allocation3 + $0x138] sm:$0xff]  ;;  %8088 = vmatpush3.msra.mxu0 %v4254_v37  ;;  %v4251_v37 = vld [vmem:[#allocation3 + $0x1c0] sm:$0xff] }
 0x1c8   : > { %v10431_v39 = vadd.f32 %v7512_v62, %v10238_v18  ;;  %v10433_v46 = vpop.f32.mrf.mxu1  ;;  %8015 = vmatprep.subr.mxu1 %v3976_v43  ;;  %8089 = vmatprep.subr.mxu0 %v4253_v26 }
 0x1c9   : > { %12413 = vst [vmem:[#allocation66_spill] sm:$0xff] %v10433_v46  ;;  %v10435_v53 = vpop.f32.mrf.mxu0  ;;  %8016 = vmatpush3.msra.mxu1 %v3976_v43  ;;  %8090 = vmatpush3.msra.mxu0 %v4253_v26  ;;  %v4250_v43 = vld [vmem:[#allocation3 + $0x1b8] sm:$0xff] }
 0x1ca   : > { %12412 = vst [vmem:[#allocation65_spill] sm:$0xff] %v10431_v39  ;;  %12414 = vst [vmem:[#allocation67_spill] sm:$0xff] %v10435_v53  ;;  %v10437_v27 = vpop.f32.mrf.mxu1  ;;  %8091 = vmatprep.subr.mxu0 %v4252_v33  ;;  %v4245_v53 = vld [vmem:[#allocation3 + $0x190] sm:$0xff] }
 0x1cb   : > { %12415 = vst [vmem:[#allocation68_spill] sm:$0xff] %v10437_v27  ;;  %v7515_v15 = vpop.f32.mrf.mxu0  ;;  %v3975_v27 = vld [vmem:[#allocation3 + $0x130] sm:$0xff]  ;;  %8092 = vmatpush3.msra.mxu0 %v4252_v33 }
 0x1cc   : > { %v10440_v58 = vadd.f32 %v7515_v15, %v10247_v5  ;;  %v10442_v18 = vpop.f32.mrf.mxu1  ;;  %8017 = vmatprep.subr.mxu1 %v3975_v27  ;;  %8093 = vmatprep.subr.mxu0 %v4251_v37  ;;  %v4249_v33 = vld [vmem:[#allocation3 + $0x1b0] sm:$0xff] }
 0x1cd   : > { %12417 = vst [vmem:[#allocation70_spill] sm:$0xff] %v10442_v18  ;;  %v10444_v62 = vpop.f32.mrf.mxu0  ;;  %8018 = vmatpush3.msra.mxu1 %v3975_v27  ;;  %8094 = vmatpush3.msra.mxu0 %v4251_v37  ;;  %v3973_v37 = vld [vmem:[#allocation3 + $0x120] sm:$0xff] }
 0x1ce   : > { %12416 = vst [vmem:[#allocation69_spill] sm:$0xff] %v10440_v58  ;;  %12418 = vst [vmem:[#allocation71_spill] sm:$0xff] %v10444_v62  ;;  %v10446_v21 = vpop.f32.mrf.mxu1  ;;  %8095 = vmatprep.subr.mxu0 %v4250_v43 }
 0x1cf   : > { %12419 = vst [vmem:[#allocation72_spill] sm:$0xff] %v10446_v21  ;;  %v7518_v46 = vpop.f32.mrf.mxu0  ;;  %v3974_v21 = vld [vmem:[#allocation3 + $0x128] sm:$0xff]  ;;  %8096 = vmatpush3.msra.mxu0 %v4250_v43  ;;  %v3972_v43 = vld [vmem:[#allocation3 + $0x118] sm:$0xff] }
 0x1d0   : > { %v10449_v39 = vadd.f32 %v7518_v46, %v10254_v32  ;;  %v10451_v5 = vpop.f32.mrf.mxu1  ;;  %8019 = vmatprep.subr.mxu1 %v3974_v21  ;;  %8097 = vmatprep.subr.mxu0 %v4249_v33  ;;  %v4248_v46 = vld [vmem:[#allocation3 + $0x1a8] sm:$0xff] }
 0x1d1   : > { %12421 = vst [vmem:[#allocation74_spill] sm:$0xff] %v10451_v5  ;;  %v10453_v15 = vpop.f32.mrf.mxu0  ;;  %8020 = vmatpush3.msra.mxu1 %v3974_v21  ;;  %8098 = vmatpush3.msra.mxu0 %v4249_v33  ;;  %v4247_v5 = vld [vmem:[#allocation3 + $0x1a0] sm:$0xff]  ;;  %v4246_v33 = vld [vmem:[#allocation3 + $0x198] sm:$0xff] }
 0x1d2   : > { %12420 = vst [vmem:[#allocation73_spill] sm:$0xff] %v10449_v39  ;;  %12422 = vst [vmem:[#allocation75_spill] sm:$0xff] %v10453_v15  ;;  %v10455_v26 = vpop.f32.mrf.mxu1  ;;  %8099 = vmatprep.subr.mxu0 %v4248_v46  ;;  %8021 = vmatprep.subr.mxu1 %v3973_v37  ;;  %v3971_v15 = vld [vmem:[#allocation3 + $0x110] sm:$0xff] }
 0x1d3   : > { %12423 = vst [vmem:[#allocation76_spill] sm:$0xff] %v10455_v26  ;;  %v10457_v18 = vpop.f32.mrf.mxu0  ;;  %8100 = vmatpush3.msra.mxu0 %v4248_v46  ;;  %8022 = vmatpush3.msra.mxu1 %v3973_v37 }
 0x1d4   : > { %v10459_v58 = vpop.f32.mrf.mxu1  ;;  %8101 = vmatprep.subr.mxu0 %v4247_v5  ;;  %8023 = vmatprep.subr.mxu1 %v3972_v43 }
 0x1d5   : > { %v10461_v32 = vpop.f32.mrf.mxu0  ;;  %8102 = vmatpush3.msra.mxu0 %v4247_v5  ;;  %8024 = vmatpush3.msra.mxu1 %v3972_v43  ;;  %v4243_v43 = vld [vmem:[#allocation3 + $0x180] sm:$0xff] }
 0x1d6   : > { %v10463_v27 = vpop.f32.mrf.mxu1  ;;  %8103 = vmatprep.subr.mxu0 %v4246_v33  ;;  %8025 = vmatprep.subr.mxu1 %v3971_v15 }
 0x1d7   : > { %v10465_v26 = vpop.f32.mrf.mxu0  ;;  %8104 = vmatpush3.msra.mxu0 %v4246_v33  ;;  %8026 = vmatpush3.msra.mxu1 %v3971_v15 }
 0x1d8   : > { %v10467_v39 = vpop.f32.mrf.mxu1  ;;  %8105 = vmatprep.subr.mxu0 %v4245_v53  ;;  %8027 = vmatprep.subr.mxu1 %v3970_v40 }
 0x1d9   : > { %12424 = vst [vmem:[#allocation77_spill] sm:$0xff] %v10467_v39  ;;  %v10469_v21 = vpop.f32.mrf.mxu0  ;;  %8106 = vmatpush3.msra.mxu0 %v4245_v53  ;;  %8028 = vmatpush3.msra.mxu1 %v3970_v40  ;;  %v12461_v39 = vld [vmem:[#allocation14_spill] sm:$0xff] }
 0x1da   : > { %v10473_v46 = vpop.f32.mrf.mxu1  ;;  %8107 = vmatprep.subr.mxu0 %v4244_v11  ;;  %8029 = vmatprep.subr.mxu1 %v3969_v0 }
 0x1db   : > { %v10471_v62 = vpop.f32.mrf.mxu0  ;;  %12426 = vst [vmem:[#allocation79_spill] sm:$0xff] %v10473_v46  ;;  %8108 = vmatpush3.msra.mxu0 %v4244_v11  ;;  %8030 = vmatpush3.msra.mxu1 %v3969_v0 }
 0x1dc   : > { %12425 = vst [vmem:[#allocation78_spill] sm:$0xff] %v10471_v62  ;;  %v10479_v34 = vpop.f32.mrf.mxu1  ;;  %8109 = vmatprep.subr.mxu0 %v4243_v43  ;;  %v12462_v62 = vld [vmem:[#allocation15_spill] sm:$0xff] }
 0x1dd   : > { %v10475_v37 = vpop.f32.mrf.mxu0  ;;  %12429 = vst [vmem:[#allocation82_spill] sm:$0xff] %v10479_v34  ;;  %8110 = vmatpush3.msra.mxu0 %v4243_v43 }
 0x1de   : > { %12427 = vst [vmem:[#allocation80_spill] sm:$0xff] %v10475_v37  ;;  %v10485_v53 = vpop.f32.mrf.mxu1  ;;  %v4542_v37 = vld [vmem:[#allocation3 + $0x278] sm:$0xff] }
 0x1df   : > { %v10477_v5 = vpop.f32.mrf.mxu0  ;;  %12432 = vst [vmem:[#allocation85_spill] sm:$0xff] %v10485_v53  ;;  %8159 = vmatprep.subr.mxu1 %v4542_v37 }
 0x1e0   : > { %12428 = vst [vmem:[#allocation81_spill] sm:$0xff] %v10477_v5  ;;  %v10491_v11 = vpop.f32.mrf.mxu1 }
 0x1e1   : > { %v10481_v33 = vpop.f32.mrf.mxu0  ;;  %12435 = vst [vmem:[#allocation88_spill] sm:$0xff] %v10491_v11 }
 0x1e2   : > { %12430 = vst [vmem:[#allocation83_spill] sm:$0xff] %v10481_v33  ;;  %v10497_v33 = vpop.f32.mrf.mxu1 }
 0x1e3   : > { %v10483_v15 = vpop.f32.mrf.mxu0  ;;  %12438 = vst [vmem:[#allocation91_spill] sm:$0xff] %v10497_v33 }
 0x1e4   : > { %12431 = vst [vmem:[#allocation84_spill] sm:$0xff] %v10483_v15  ;;  %v10503_v0 = vpop.f32.mrf.mxu1 }
 0x1e5   : > { %v10487_v46 = vpop.f32.mrf.mxu0  ;;  %12441 = vst [vmem:[#allocation94_spill] sm:$0xff] %v10503_v0 }
 0x1e6   : > { %12433 = vst [vmem:[#allocation86_spill] sm:$0xff] %v10487_v46  ;;  %v10509_v37 = vpop.f32.mrf.mxu1 }
 0x1e7   : > { %v10489_v40 = vpop.f32.mrf.mxu0  ;;  %12444 = vst [vmem:[#allocation97_spill] sm:$0xff] %v10509_v37  ;;  %v4823_v37 = vld [vmem:[#allocation3 + $0x2f8] sm:$0xff] }
 0x1e8   : > { %12434 = vst [vmem:[#allocation87_spill] sm:$0xff] %v10489_v40  ;;  %8239 = vmatprep.subr.mxu0 %v4823_v37 }
 0x1e9   : > { %v10493_v5 = vpop.f32.mrf.mxu0 }
 0x1ea   : > { %12436 = vst [vmem:[#allocation89_spill] sm:$0xff] %v10493_v5  ;;  %v10515_v5 = vpop.f32.mrf.mxu1 }
 0x1eb   : > { %v10495_v34 = vpop.f32.mrf.mxu0  ;;  %12447 = vst [vmem:[#allocation100_spill] sm:$0xff] %v10515_v5 }
 0x1ec   : > { %12437 = vst [vmem:[#allocation90_spill] sm:$0xff] %v10495_v34 }
 0x1ed   : > { %v10499_v43 = vpop.f32.mrf.mxu0 }
 0x1ee   : > { %12439 = vst [vmem:[#allocation92_spill] sm:$0xff] %v10499_v43  ;;  %v10521_v43 = vpop.f32.mrf.mxu1 }
 0x1ef   : > { %v10501_v15 = vpop.f32.mrf.mxu0  ;;  %12450 = vst [vmem:[#allocation103_spill] sm:$0xff] %v10521_v43  ;;  %v12459_v43 = vld [vmem:[#allocation12_spill] sm:$0xff] }
 0x1f0   : > { %12440 = vst [vmem:[#allocation93_spill] sm:$0xff] %v10501_v15 }
 0x1f1   : > { %v10505_v53 = vpop.f32.mrf.mxu0 }
 0x1f2   : > { %12442 = vst [vmem:[#allocation95_spill] sm:$0xff] %v10505_v53  ;;  %v10527_v53 = vpop.f32.mrf.mxu1 }
 0x1f3   : > { %v10507_v46 = vpop.f32.mrf.mxu0  ;;  %12453 = vst [vmem:[#allocation106_spill] sm:$0xff] %v10527_v53  ;;  %v1565_v53 = vadd.f32 %v10110_v17, %v10106_v6  ;;  %v1567_v6 = vadd.f32 %v10120_v55, %v10116_v10  ;;  %v1569_v17 = vadd.f32 %v10130_v20, %v10126_v22  ;;  %v2131_v55 = vadd.f32 %v10261_v7, %v10259_v23  ;;  %v12469_v23 = vld [vmem:[#allocation26_spill] sm:$0xff] }
 0x1f4   : > { %12443 = vst [vmem:[#allocation96_spill] sm:$0xff] %v10507_v46  ;;  %v1579_v20 = vadd.f32 %v10180_v24, %v10176_v59  ;;  %v12466_v24 = vld [vmem:[#allocation19_spill] sm:$0xff] }
 0x1f5   : > { %v10511_v40 = vpop.f32.mrf.mxu0 }
 0x1f6   : > { %12445 = vst [vmem:[#allocation98_spill] sm:$0xff] %v10511_v40 }
 0x1f7   : > { %v10513_v11 = vpop.f32.mrf.mxu0 }
 0x1f8   : > { %12446 = vst [vmem:[#allocation99_spill] sm:$0xff] %v10513_v11  ;;  %v10533_v11 = vpop.f32.mrf.mxu1 }
 0x1f9   : > { %v10517_v34 = vpop.f32.mrf.mxu0  ;;  %12456 = vst [vmem:[#allocation109_spill] sm:$0xff] %v10533_v11  ;;  %v12465_v11 = vld [vmem:[#allocation18_spill] sm:$0xff] }
 0x1fa   : > { %12448 = vst [vmem:[#allocation101_spill] sm:$0xff] %v10517_v34  ;;  %v898_v35 = vadd.f32 %v12465_v11, %v12464_v50  ;;  %v1571_v50 = vadd.f32 %v10140_v54, %v10136_v30 }
 0x1fb   : > { %v10519_v33 = vpop.f32.mrf.mxu0 }
 0x1fc   : > { %12449 = vst [vmem:[#allocation102_spill] sm:$0xff] %v10519_v33  ;;  %v12458_v33 = vld [vmem:[#allocation11_spill] sm:$0xff]  ;;  %v1315_v30 = vadd.f32 %v10225_v45, %v898_v35 }
 0x1fd   : > { %v10523_v15 = vpop.f32.mrf.mxu0  ;;  %v868_v57 = vadd.f32 %v12459_v43, %v12458_v33  ;;  %v918_v33 = vadd.f32 %v10091_v44, %v10089_v61 }
 0x1fe   : > { %12451 = vst [vmem:[#allocation104_spill] sm:$0xff] %v10523_v15  ;;  %v12460_v15 = vld [vmem:[#allocation13_spill] sm:$0xff] }
 0x1ff   : > { %v10525_v0 = vpop.f32.mrf.mxu0 }
 0x200   : > { %12452 = vst [vmem:[#allocation105_spill] sm:$0xff] %v10525_v0  ;;  %v878_v0 = vadd.f32 %v12461_v39, %v12460_v15  ;;  %v928_v39 = vadd.f32 %v10100_v13, %v10098_v4  ;;  %v1575_v4 = vadd.f32 %v10160_v12, %v10156_v28  ;;  %v1577_v13 = vadd.f32 %v10170_v29, %v10166_v36  ;;  %v12473_v15 = vld [vmem:[#allocation24_spill] sm:$0xff] }
 0x201   : > { %v10529_v46 = vpop.f32.mrf.mxu0  ;;  %v1851_v36 = vadd.f32 %v10324_v38, %v1567_v6  ;;  %v2405_v29 = vadd.f32 %v10457_v18, %v2131_v55  ;;  %v12471_v38 = vld [vmem:[#allocation22_spill] sm:$0xff] }
 0x202   : > { %12454 = vst [vmem:[#allocation107_spill] sm:$0xff] %v10529_v46  ;;  %v10545_v46 = vpop.f32.mrf.mxu1  ;;  %v1311_v61 = vadd.f32 %v10205_v31, %v878_v0  ;;  %v1321_v28 = vadd.f32 %v10252_v14, %v928_v39  ;;  %v12468_v14 = vld [vmem:[#allocation25_spill] sm:$0xff]  ;;  %v12475_v0 = vld [vmem:[#allocation28_spill] sm:$0xff]  ;;  %v12477_v39 = vld [vmem:[#allocation30_spill] sm:$0xff] }
 0x203   : > { %v10531_v40 = vpop.f32.mrf.mxu0  ;;  %v2133_v7 = vadd.f32 %v12469_v23, %v12468_v14  ;;  %v12487_v14 = vld [vmem:[#allocation77_spill] sm:$0xff] }
 0x204   : > { %12455 = vst [vmem:[#allocation108_spill] sm:$0xff] %v10531_v40  ;;  %v12463_v40 = vld [vmem:[#allocation16_spill] sm:$0xff]  ;;  %v10579_v22 = vpop.f32.mrf.mxu1  ;;  %v10596_v31 = vadd.f32 %v12466_v24, %v1311_v61 }
 0x205   : > { %v10535_v5 = vpop.f32.mrf.mxu0  ;;  %v888_v37 = vadd.f32 %v12463_v40, %v12462_v62  ;;  %v1849_v62 = vadd.f32 %v10263_v41, %v1565_v53  ;;  %v1855_v41 = vadd.f32 %v10343_v25, %v1571_v50  ;;  %v10623_v53 = vadd.f32 %v12473_v15, %v1321_v28  ;;  %v12474_v25 = vld [vmem:[#allocation27_spill] sm:$0xff]  ;;  %v12485_v24 = vld [vmem:[#allocation36_spill] sm:$0xff] }
 0x206   : > { %v2689_v40 = vadd.f32 %v10459_v58, %v2405_v29  ;;  %v2407_v11 = vadd.f32 %v10465_v26, %v2133_v7  ;;  %v12488_v7 = vld [vmem:[#allocation38_spill] sm:$0xff] }
 0x207   : > { %v10537_v34 = vpop.f32.mrf.mxu0  ;;  %v1313_v10 = vadd.f32 %v10214_v1, %v888_v37  ;;  %v2130_v12 = vadd.f32 %v10265_v9, %v1849_v62  ;;  %v1853_v1 = vadd.f32 %v10333_v47, %v1569_v17  ;;  %v12472_v47 = vld [vmem:[#allocation23_spill] sm:$0xff]  ;;  %v12476_v37 = vld [vmem:[#allocation29_spill] sm:$0xff] }
 0x208   : > { %12457 = vst [vmem:[#allocation110_spill] sm:$0xff] %v10537_v34  ;;  %v908_v34 = vadd.f32 %v10079_v60, %v10077_v16  ;;  %v1573_v16 = vadd.f32 %v10150_v42, %v10146_v52  ;;  %v1309_v60 = vadd.f32 %v10196_v19, %v868_v57  ;;  %v1319_v52 = vadd.f32 %v10245_v49, %v918_v33  ;;  %v12478_v17 = vld [vmem:[#allocation31_spill] sm:$0xff] }
 0x209   : > { %v10555_v43 = vpop.f32.mrf.mxu0  ;;  %v1581_v19 = vadd.f32 %v10191_v51, %v10187_v2  ;;  %v2404_v9 = vadd.f32 %v10461_v32, %v2130_v12  ;;  %v10608_v2 = vpop.f32.mrf.mxu1  ;;  %v12470_v51 = vld [vmem:[#allocation21_spill] sm:$0xff]  ;;  %v2132_v32 = vadd.f32 %v12474_v25, %v1851_v36  ;;  %v2135_v33 = vadd.f32 %v12476_v37, %v12475_v0  ;;  %v12484_v12 = vld [vmem:[#allocation78_spill] sm:$0xff] }
 0x20a   : > { %v1317_v54 = vadd.f32 %v10235_v3, %v908_v34  ;;  %v1583_v59 = vadd.f32 %v10200_v8, %v1309_v60  ;;  %v12467_v3 = vld [vmem:[#allocation20_spill] sm:$0xff]  ;;  %v10611_v8 = vadd.f32 %v12470_v51, %v1315_v30  ;;  %v10617_v57 = vadd.f32 %v12472_v47, %v1319_v52  ;;  %v12480_v30 = vld [vmem:[#allocation33_spill] sm:$0xff]  ;;  %v12482_v52 = vld [vmem:[#allocation35_spill] sm:$0xff] }
 0x20b   : > { %v10570_v44 = vpop.f32.mrf.mxu0  ;;  %v10602_v49 = vadd.f32 %v12467_v3, %v1313_v10  ;;  %v1857_v34 = vadd.f32 %v10354_v56, %v1573_v16  ;;  %v2134_v6 = vadd.f32 %v12477_v39, %v1853_v1  ;;  %v2137_v62 = vadd.f32 %v12478_v17, %v10339_v63  ;;  %v10637_v16 = vld [vmem:[%s12164_s2] ss:$0 sm:$0xff]  ;;  %v12479_v60 = vld [vmem:[#allocation32_spill] sm:$0xff]  ;;  %v10642_v10 = vpop.f32.mrf.mxu1  ;;  %v12486_v1 = vld [vmem:[#allocation37_spill] sm:$0xff] }
 0x20c   : > { %v10614_v35 = vadd.f32 %v12471_v38, %v1317_v54  ;;  %v1859_v56 = vadd.f32 %v10363_v48, %v1575_v4  ;;  %v2136_v58 = vadd.f32 %v12479_v60, %v1855_v41  ;;  %v2688_v26 = vadd.f32 %v10463_v27, %v2404_v9  ;;  %v12481_v54 = vld [vmem:[#allocation34_spill] sm:$0xff]  ;;  %v12483_v4 = vld [vmem:[#allocation9_spill] sm:$0xff]  ;;  %v12489_v9 = vld [vmem:[#allocation39_spill] sm:$0xff] }
 0x20d   : > { %v10586_v42 = vpop.f32.mrf.mxu0  ;;  %v2406_v61 = vadd.f32 %v10469_v21, %v2132_v32  ;;  %v2139_v63 = vadd.f32 %v12481_v54, %v12480_v30  ;;  %v2138_v48 = vadd.f32 %v12482_v52, %v1857_v34  ;;  %v1861_v28 = vadd.f32 %v12483_v4, %v1577_v13  ;;  %v12490_v51 = vld [vmem:[#allocation40_spill] sm:$0xff]  ;;  %v12491_v47 = vld [vmem:[#allocation43_spill] sm:$0xff]  ;;  %v10663_v0 = vpop.f32.mrf.mxu1  ;;  %v12494_v39 = vld [vmem:[#allocation10_spill] sm:$0xff] }
 0x20e   : > { %v2409_v36 = vadd.f32 %v12484_v12, %v2135_v33  ;;  %v2141_v3 = vadd.f32 %v12486_v1, %v12485_v24  ;;  %v2691_v27 = vadd.f32 %v12487_v14, %v2407_v11  ;;  %v10654_v41 = vadd.f32 %v12488_v7, %v1859_v56  ;;  %v12492_v34 = vld [vmem:[#allocation80_spill] sm:$0xff]  ;;  %v12493_v32 = vld [vmem:[#allocation79_spill] sm:$0xff]  ;;  %v12495_v56 = vld [vmem:[#allocation41_spill] sm:$0xff] }
 0x20f   : > { %v10599_v45 = vpop.f32.mrf.mxu0  ;;  %v10658_v38 = vadd.f32 %v12490_v51, %v12489_v9  ;;  %v1863_v13 = vadd.f32 %v12491_v47, %v1579_v20  ;;  %v2408_v15 = vadd.f32 %v12492_v34, %v2134_v6  ;;  %v10667_v17 = vadd.f32 %v12494_v39, %v1861_v28  ;;  %v12499_v54 = vld [vmem:[#allocation81_spill] sm:$0xff]  ;;  %v12502_v1 = vld [vmem:[#allocation46_spill] sm:$0xff]  ;;  %v12505_v7 = vld [vmem:[#allocation83_spill] sm:$0xff] }
 0x210   : > { %v12501_v28 = vld [vmem:[#allocation45_spill] sm:$0xff]  ;;  %v2410_v9 = vadd.f32 %v12505_v7, %v2136_v58  ;;  %v12511_v39 = vld [vmem:[#allocation88_spill] sm:$0xff] }
 0x211   : > { %v10620_v18 = vpop.f32.mrf.mxu0  ;;  %v10682_v14 = vadd.f32 %v12502_v1, %v12501_v28  ;;  %v12517_v28 = vld [vmem:[#allocation91_spill] sm:$0xff]  ;;  %v12519_v7 = vld [vmem:[#allocation57_spill] sm:$0xff] }
 0x213   : > { %v7793_v50 = vpop.f32.mrf.mxu0 }
 0x214   : > { %v2970_v55 = vadd.f32 %v7793_v50, %v2689_v40  ;;  %v2690_v40 = vadd.f32 %v12493_v32, %v2406_v61  ;;  %v12496_v50 = vld [vmem:[#allocation42_spill] sm:$0xff]  ;;  %v2411_v61 = vadd.f32 %v12499_v54, %v2137_v62  ;;  %v10687_v62 = vpop.f32.mrf.mxu1  ;;  %v12507_v32 = vld [vmem:[#allocation49_spill] sm:$0xff] }
 0x215   : > { %v2810_v29 = vpop.f32.mrf.mxu0  ;;  %v10671_v60 = vadd.f32 %v12496_v50, %v12495_v56  ;;  %v12514_v54 = vld [vmem:[#allocation54_spill] sm:$0xff] }
 0x216   : > { %v3009_v21 = vadd.f32 %v10637_v16, %v2970_v55  ;;  %v2969_v23 = vadd.f32 %v2810_v29, %v2688_v26  ;;  %v12497_v26 = vld [vmem:[#allocation47_spill] sm:$0xff]  ;;  %v12498_v55 = vld [vmem:[#allocation82_spill] sm:$0xff]  ;;  %v12500_v29 = vld [vmem:[#allocation44_spill] sm:$0xff]  ;;  %v2695_v56 = vadd.f32 %v12511_v39, %v2411_v61  ;;  %v2694_v61 = vadd.f32 %v12517_v28, %v2410_v9  ;;  %v10713_v1 = vpop.f32.mrf.mxu1 }
 0x217   : > { %v7796_v25 = vpop.f32.mrf.mxu0  ;;  %v1865_v20 = vadd.f32 %v12497_v26, %v1581_v19  ;;  %v2693_v6 = vadd.f32 %v12498_v55, %v2409_v36  ;;  %v10678_v24 = vadd.f32 %v12500_v29, %v1863_v13  ;;  %v12504_v19 = vld [vmem:[#allocation85_spill] sm:$0xff]  ;;  %v12506_v13 = vld [vmem:[#allocation48_spill] sm:$0xff] }
 0x218   : > { %v3041_v11 = vmax.f32 %v3009_v21, 0.0  ;;  %v3008_v37 = vadd.f32 %v10637_v16, %v2969_v23  ;;  %v2972_v33 = vadd.f32 %v7796_v25, %v2691_v27  ;;  %v12503_v27 = vld [vmem:[#allocation51_spill] sm:$0xff]  ;;  %v2692_v23 = vadd.f32 %v12504_v19, %v2408_v15 }
 0x219   : > { %v2820_v30 = vpop.f32.mrf.mxu0  ;;  %v1867_v21 = vadd.f32 %v12503_v27, %v1583_v59  ;;  %v10691_v25 = vadd.f32 %v12506_v13, %v1865_v20  ;;  %v12509_v59 = vld [vmem:[#allocation55_spill] sm:$0xff] }
 0x21a   : > { %3128 = vst [vmem:[#allocation2 + $0x21] sm:$0xff] %v3041_v11  ;;  %v3040_v52 = vmax.f32 %v3008_v37, 0.0  ;;  %v3011_v4 = vadd.f32 %v10637_v16, %v2972_v33  ;;  %v2971_v12 = vadd.f32 %v2820_v30, %v2690_v40  ;;  %v12508_v40 = vld [vmem:[#allocation50_spill] sm:$0xff]  ;;  %v1869_v15 = vadd.f32 %v12509_v59, %v10596_v31  ;;  %v12510_v37 = vld [vmem:[#allocation84_spill] sm:$0xff]  ;;  %v12513_v30 = vld [vmem:[#allocation53_spill] sm:$0xff] }
 0x21b   : > { %v7799_v36 = vpop.f32.mrf.mxu0  ;;  %v10695_v11 = vadd.f32 %v12508_v40, %v12507_v32  ;;  %v2413_v33 = vadd.f32 %v12510_v37, %v2139_v63  ;;  %v12523_v32 = vld [vmem:[#allocation87_spill] sm:$0xff] }
 0x21c   : > { %3127 = vst [vmem:[#allocation2 + $0x19] sm:$0xff] %v3040_v52  ;;  %v3043_v51 = vmax.f32 %v3011_v4, 0.0  ;;  %v3010_v47 = vadd.f32 %v10637_v16, %v2971_v12  ;;  %v2974_v34 = vadd.f32 %v7799_v36, %v2693_v6  ;;  %v12512_v6 = vld [vmem:[#allocation52_spill] sm:$0xff]  ;;  %v10707_v52 = vadd.f32 %v12514_v54, %v12513_v30  ;;  %v12515_v4 = vld [vmem:[#allocation59_spill] sm:$0xff]  ;;  %v12516_v12 = vld [vmem:[#allocation86_spill] sm:$0xff] }
 0x21d   : > { %v2830_v58 = vpop.f32.mrf.mxu0  ;;  %v10703_v20 = vadd.f32 %v12512_v6, %v1867_v21  ;;  %v1871_v31 = vadd.f32 %v12515_v4, %v10602_v49  ;;  %v2412_v63 = vadd.f32 %v12516_v12, %v2138_v48  ;;  %v12521_v49 = vld [vmem:[#allocation63_spill] sm:$0xff]  ;;  %v2415_v40 = vadd.f32 %v12523_v32, %v2141_v3  ;;  %v10744_v12 = vpop.f32.mrf.mxu1 }
 0x21e   : > { %3130 = vst [vmem:[#allocation2 + $0x39] sm:$0xff] %v3043_v51  ;;  %v3042_v50 = vmax.f32 %v3010_v47, 0.0  ;;  %v3013_v26 = vadd.f32 %v10637_v16, %v2974_v34  ;;  %v2973_v55 = vadd.f32 %v2830_v58, %v2692_v23  ;;  %v12518_v23 = vld [vmem:[#allocation56_spill] sm:$0xff]  ;;  %v12520_v51 = vld [vmem:[#allocation58_spill] sm:$0xff]  ;;  %v1873_v48 = vadd.f32 %v12521_v49, %v10611_v8  ;;  %v12527_v8 = vld [vmem:[#allocation97_spill] sm:$0xff] }
 0x21f   : > { %v7802_v29 = vpop.f32.mrf.mxu0  ;;  %v10717_v36 = vadd.f32 %v12518_v23, %v1869_v15  ;;  %v10721_v47 = vadd.f32 %v12520_v51, %v12519_v7  ;;  %v12522_v34 = vld [vmem:[#allocation94_spill] sm:$0xff]  ;;  %v12524_v15 = vld [vmem:[#allocation60_spill] sm:$0xff]  ;;  %v2696_v6 = vadd.f32 %v12527_v8, %v2412_v63  ;;  %v10774_v8 = vpop.f32.mrf.mxu1 }
 0x220   : > { %3129 = vst [vmem:[#allocation2 + $0x31] sm:$0xff] %v3042_v50  ;;  %v3045_v27 = vmax.f32 %v3013_v26, 0.0  ;;  %v3012_v19 = vadd.f32 %v10637_v16, %v2973_v55  ;;  %v2976_v21 = vadd.f32 %v7802_v29, %v2695_v56  ;;  %v2697_v13 = vadd.f32 %v12522_v34, %v2413_v33  ;;  %v12525_v50 = vld [vmem:[#allocation61_spill] sm:$0xff]  ;;  %v12526_v26 = vld [vmem:[#allocation62_spill] sm:$0xff]  ;;  %v12529_v63 = vld [vmem:[#allocation64_spill] sm:$0xff] }
 0x221   : > { %v2840_v9 = vpop.f32.mrf.mxu0  ;;  %v10728_v39 = vld [vmem:[#allocation2 + $0x28] sm:$0x3]  ;;  %v10731_v56 = vadd.f32 %v12524_v15, %v1871_v31  ;;  %v10735_v55 = vadd.f32 %v12526_v26, %v12525_v50  ;;  %v12528_v33 = vld [vmem:[#allocation89_spill] sm:$0xff] }
 0x222   : > { %3132 = vst [vmem:[#allocation2 + $0x51] sm:$0xff] %v3045_v27  ;;  %v3044_v59 = vmax.f32 %v3012_v19, 0.0  ;;  %v3015_v37 = vadd.f32 %v10637_v16, %v2976_v21  ;;  %v2975_v58 = vadd.f32 %v2840_v9, %v2694_v61  ;;  %v2414_v30 = vadd.f32 %v12528_v33, %v10654_v41  ;;  %v12530_v41 = vld [vmem:[#allocation90_spill] sm:$0xff]  ;;  %v12531_v51 = vld [vmem:[#allocation100_spill] sm:$0xff] }
 0x223   : > { %v7805_v3 = vpop.f32.mrf.mxu0  ;;  %v10740_v54 = vld [vmem:[#allocation2 + $0x18] sm:$0xff]  ;;  %v10742_v4 = vld [vmem:[#allocation2 + $0x20] sm:$0xff]  ;;  %v10750_v27 = vadd.f32 %v12529_v63, %v1873_v48  ;;  %v2417_v19 = vadd.f32 %v12530_v41, %v10658_v38  ;;  %v3285_v7 = vrot.slane %v10728_v39, 1  ;;  %v2699_v49 = vadd.f32 %v12531_v51, %v2415_v40  ;;  %v12533_v38 = vld [vmem:[#allocation92_spill] sm:$0xff] }
 0x224   : > { %3131 = vst [vmem:[#allocation2 + $0x49] sm:$0xff] %v3044_v59  ;;  %v3047_v29 = vmax.f32 %v3015_v37, 0.0  ;;  %v3014_v31 = vadd.f32 %v10637_v16, %v2975_v58  ;;  %v2978_v28 = vadd.f32 %v7805_v3, %v2697_v13  ;;  %7954 = vmatprep.mubr.f32.mxu0 %v10740_v54  ;;  %v3282_v61 = vrot.slane %v10740_v54, 1  ;;  %v12532_v48 = vld [vmem:[#allocation103_spill] sm:$0xff] }
 0x225   : > { %v2850_v21 = vpop.f32.mrf.mxu0  ;;  %7955 = vmatmul.mubr.f32.gmra.mxu0 %v10742_v4  ;;  %v3283_v23 = vrot.slane %v10742_v4, 1  ;;  %v10759_v32 = vld [vmem:[#allocation2 + $0x40] sm:$0x3]  ;;  %v2698_v59 = vadd.f32 %v12532_v48, %v2414_v30  ;;  %v2416_v37 = vadd.f32 %v12533_v38, %v10667_v17 }
 0x226   : > { %3134 = vst [vmem:[#allocation2 + $0x69] sm:$0xff] %v3047_v29  ;;  %v3046_v34 = vmax.f32 %v3014_v31, 0.0  ;;  %v3017_v13 = vadd.f32 %v10637_v16, %v2978_v28  ;;  %v2977_v9 = vadd.f32 %v2850_v21, %v2696_v6  ;;  %v12534_v3 = vld [vmem:[#allocation67_spill] sm:$0xff]  ;;  %v12535_v31 = vld [vmem:[#allocation106_spill] sm:$0xff]  ;;  %v3290_v41 = vrot.slane %v10759_v32, 1  ;;  %v12536_v21 = vld [vmem:[#allocation93_spill] sm:$0xff] }
 0x227   : > { %v7808_v58 = vpop.f32.mrf.mxu0  ;;  %v10765_v15 = vsel %vm356_vm0, %v3282_v61, %v3283_v23  ;;  %v10768_v50 = vsel %vm356_vm0, %v3283_v23, %v3285_v7  ;;  %v10770_v40 = vld [vmem:[#allocation2 + $0x30] sm:$0xff]  ;;  %v10772_v26 = vld [vmem:[#allocation2 + $0x38] sm:$0xff]  ;;  %v1875_v29 = vadd.f32 %v12534_v3, %v10614_v35  ;;  %v2701_v28 = vadd.f32 %v12535_v31, %v2417_v19 }
 0x228   : > { %3133 = vst [vmem:[#allocation2 + $0x61] sm:$0xff] %v3046_v34  ;;  %v3049_v6 = vmax.f32 %v3017_v13, 0.0  ;;  %v3016_v33 = vadd.f32 %v10637_v16, %v2977_v9  ;;  %v2980_v30 = vadd.f32 %v7808_v58, %v2699_v49  ;;  %7874 = vmatprep.mubr.f32.mxu1 %v10765_v15  ;;  %7957 = vmatprep.mubr.f32.mxu0 %v10770_v40  ;;  %v3287_v17 = vrot.slane %v10770_v40, 1  ;;  %v12537_v19 = vld [vmem:[#allocation109_spill] sm:$0xff]  ;;  %v12538_v13 = vld [vmem:[#allocation95_spill] sm:$0xff]  ;;  %v12542_v3 = vld [vmem:[#allocation66_spill] sm:$0xff] }
 0x229   : > { %7875 = vmatmul.mubr.f32.gmra.mxu1 %v10768_v50  ;;  %v2860_v61 = vpop.f32.mrf.mxu0  ;;  %7958 = vmatmul.mubr.f32.gmra.mxu0 %v10772_v26  ;;  %v3288_v63 = vrot.slane %v10772_v26, 1  ;;  %v2419_v23 = vadd.f32 %v12536_v21, %v10671_v60  ;;  %v10790_v35 = vld [vmem:[#allocation2 + $0x58] sm:$0x3]  ;;  %v2700_v34 = vadd.f32 %v12537_v19, %v2416_v37  ;;  %v2418_v9 = vadd.f32 %v12538_v13, %v10678_v24 }
 0x22a   : > { %3136 = vst [vmem:[#allocation2 + $0x81] sm:$0xff] %v3049_v6  ;;  %v3048_v7 = vmax.f32 %v3016_v33, 0.0  ;;  %v3019_v51 = vadd.f32 %v10637_v16, %v2980_v30  ;;  %v2979_v49 = vadd.f32 %v2860_v61, %v2698_v59  ;;  %v10805_v33 = vpop.f32.mrf.mxu1  ;;  %v12543_v61 = vld [vmem:[#allocation96_spill] sm:$0xff]  ;;  %v3295_v21 = vrot.slane %v10790_v35, 1 }
 0x22b   : > { %v7811_v48 = vpop.f32.mrf.mxu0  ;;  %v10796_v38 = vsel %vm356_vm0, %v3287_v17, %v3288_v63  ;;  %v10799_v58 = vsel %vm356_vm0, %v3288_v63, %v3290_v41  ;;  %v10801_v60 = vld [vmem:[#allocation2 + $0x48] sm:$0xff]  ;;  %v10803_v6 = vld [vmem:[#allocation2 + $0x50] sm:$0xff]  ;;  %v2421_v63 = vadd.f32 %v12543_v61, %v10682_v14  ;;  %v2702_v14 = vadd.f32 %v10579_v22, %v2418_v9 }
 0x22c   : > { %12539 = vst [vmem:[#allocation11_spill] sm:$0xff] %v10796_v38  ;;  %12540 = vst [vmem:[#allocation12_spill] sm:$0xff] %v10799_v58  ;;  %v3051_v59 = vmax.f32 %v3019_v51, 0.0  ;;  %v3018_v37 = vadd.f32 %v10637_v16, %v2979_v49  ;;  %v2982_v30 = vadd.f32 %v7811_v48, %v2701_v28  ;;  %7877 = vmatprep.mubr.f32.mxu1 %v10796_v38  ;;  %7960 = vmatprep.mubr.f32.mxu0 %v10801_v60  ;;  %v12541_v17 = vld [vmem:[#allocation65_spill] sm:$0xff]  ;;  %v12544_v48 = vld [vmem:[#allocation98_spill] sm:$0xff] }
 0x22d   : > { %3135 = vst [vmem:[#allocation2 + $0x79] sm:$0xff] %v3048_v7  ;;  %v3292_v24 = vrot.slane %v10801_v60, 1  ;;  %v10813_v31 = vadd.f32 %v12542_v3, %v12541_v17  ;;  %7878 = vmatmul.mubr.f32.gmra.mxu1 %v10799_v58  ;;  %v2870_v41 = vpop.f32.mrf.mxu0  ;;  %7961 = vmatmul.mubr.f32.gmra.mxu0 %v10803_v6  ;;  %v3293_v28 = vrot.slane %v10803_v6, 1  ;;  %v2703_v7 = vadd.f32 %v10545_v46, %v2419_v23  ;;  %v10823_v13 = vld [vmem:[#allocation2 + $0x70] sm:$0x3] }
 0x22e   : > { %3138 = vst [vmem:[#allocation2 + $0x99] sm:$0xff] %v3051_v59  ;;  %v3050_v51 = vmax.f32 %v3018_v37, 0.0  ;;  %v3021_v49 = vadd.f32 %v10637_v16, %v2982_v30  ;;  %v2981_v19 = vadd.f32 %v2870_v41, %v2700_v34  ;;  %v2420_v17 = vadd.f32 %v12544_v48, %v10691_v25  ;;  %v10838_v59 = vpop.f32.mrf.mxu1  ;;  %v12547_v37 = vld [vmem:[#allocation68_spill] sm:$0xff] }
 0x22f   : > { %v7814_v3 = vpop.f32.mrf.mxu0  ;;  %v10829_v61 = vsel %vm356_vm0, %v3292_v24, %v3293_v28  ;;  %v10832_v58 = vsel %vm356_vm0, %v3293_v28, %v3295_v21  ;;  %v10834_v46 = vld [vmem:[#allocation2 + $0x60] sm:$0xff]  ;;  %v10836_v23 = vld [vmem:[#allocation2 + $0x68] sm:$0xff]  ;;  %v10845_v30 = vadd.f32 %v12547_v37, %v1875_v29  ;;  %v2705_v24 = vadd.f32 %v10608_v2, %v2421_v63  ;;  %v12549_v63 = vld [vmem:[#allocation101_spill] sm:$0xff] }
 0x230   : > { %12545 = vst [vmem:[#allocation13_spill] sm:$0xff] %v10829_v61  ;;  %12546 = vst [vmem:[#allocation14_spill] sm:$0xff] %v10832_v58  ;;  %v3053_v34 = vmax.f32 %v3021_v49, 0.0  ;;  %v3020_v22 = vadd.f32 %v10637_v16, %v2981_v19  ;;  %v2984_v9 = vadd.f32 %v7814_v3, %v2703_v7  ;;  %7880 = vmatprep.mubr.f32.mxu1 %v10829_v61  ;;  %7963 = vmatprep.mubr.f32.mxu0 %v10834_v46  ;;  %v12548_v7 = vld [vmem:[#allocation99_spill] sm:$0xff] }
 0x231   : > { %3137 = vst [vmem:[#allocation2 + $0x91] sm:$0xff] %v3050_v51  ;;  %v3297_v25 = vrot.slane %v10834_v46, 1  ;;  %7881 = vmatmul.mubr.f32.gmra.mxu1 %v10832_v58  ;;  %v2880_v41 = vpop.f32.mrf.mxu0  ;;  %7964 = vmatmul.mubr.f32.gmra.mxu0 %v10836_v23  ;;  %v3298_v28 = vrot.slane %v10836_v23, 1  ;;  %v3300_v21 = vrot.slane %v10823_v13, 1  ;;  %v2423_v51 = vadd.f32 %v12548_v7, %v10695_v11  ;;  %v10855_v48 = vld [vmem:[#allocation2 + $0x88] sm:$0x3] }
 0x232   : > { %3140 = vst [vmem:[#allocation2 + $0xb1] sm:$0xff] %v3053_v34  ;;  %v3052_v49 = vmax.f32 %v3020_v22, 0.0  ;;  %v3023_v19 = vadd.f32 %v10637_v16, %v2984_v9  ;;  %v2983_v29 = vadd.f32 %v2880_v41, %v2702_v14  ;;  %v2704_v2 = vadd.f32 %v10642_v10, %v2420_v17  ;;  %v10870_v22 = vpop.f32.mrf.mxu1  ;;  %v12552_v9 = vld [vmem:[#allocation71_spill] sm:$0xff]  ;;  %v12553_v41 = vld [vmem:[#allocation102_spill] sm:$0xff] }
 0x233   : > { %v2422_v3 = vadd.f32 %v12549_v63, %v10703_v20  ;;  %v7817_v37 = vpop.f32.mrf.mxu0  ;;  %v10861_v58 = vsel %vm356_vm0, %v3297_v25, %v3298_v28  ;;  %v10864_v61 = vsel %vm356_vm0, %v3298_v28, %v3300_v21  ;;  %v1877_v25 = vadd.f32 %v12552_v9, %v10617_v57 }
 0x234   : > { %12550 = vst [vmem:[#allocation15_spill] sm:$0xff] %v10861_v58  ;;  %12551 = vst [vmem:[#allocation16_spill] sm:$0xff] %v10864_v61  ;;  %v10866_v11 = vld [vmem:[#allocation2 + $0x78] sm:$0xff]  ;;  %v10868_v34 = vld [vmem:[#allocation2 + $0x80] sm:$0xff]  ;;  %v3055_v14 = vmax.f32 %v3023_v19, 0.0  ;;  %v3022_v10 = vadd.f32 %v10637_v16, %v2983_v29  ;;  %v2986_v17 = vadd.f32 %v7817_v37, %v2705_v24  ;;  %7883 = vmatprep.mubr.f32.mxu1 %v10861_v58  ;;  %v3305_v24 = vrot.slane %v10855_v48, 1 }
 0x235   : > { %3139 = vst [vmem:[#allocation2 + $0xa9] sm:$0xff] %v3052_v49  ;;  %7966 = vmatprep.mubr.f32.mxu0 %v10866_v11  ;;  %v3302_v20 = vrot.slane %v10866_v11, 1  ;;  %v2425_v28 = vadd.f32 %v12553_v41, %v10707_v52  ;;  %7884 = vmatmul.mubr.f32.gmra.mxu1 %v10864_v61  ;;  %v2890_v21 = vpop.f32.mrf.mxu0  ;;  %v3303_v7 = vrot.slane %v10868_v34, 1  ;;  %v2707_v49 = vadd.f32 %v10663_v0, %v2423_v51  ;;  %v10886_v57 = vld [vmem:[#allocation2 + $0xa0] sm:$0x3]  ;;  %v12554_v37 = vld [vmem:[#allocation104_spill] sm:$0xff] }
 0x236   : > { %7967 = vmatmul.mubr.f32.gmra.mxu0 %v10868_v34  ;;  %3142 = vst [vmem:[#allocation2 + $0xc9] sm:$0xff] %v3055_v14  ;;  %v3054_v19 = vmax.f32 %v3022_v10, 0.0  ;;  %v3025_v29 = vadd.f32 %v10637_v16, %v2986_v17  ;;  %v2985_v63 = vadd.f32 %v2890_v21, %v2704_v2  ;;  %v2706_v52 = vadd.f32 %v10687_v62, %v2422_v3  ;;  %v10901_v14 = vpop.f32.mrf.mxu1  ;;  %v12557_v10 = vld [vmem:[#allocation69_spill] sm:$0xff]  ;;  %v12558_v17 = vld [vmem:[#allocation70_spill] sm:$0xff] }
 0x237   : > { %v2424_v9 = vadd.f32 %v12554_v37, %v10717_v36  ;;  %v7820_v41 = vpop.f32.mrf.mxu0  ;;  %v10892_v61 = vsel %vm356_vm0, %v3302_v20, %v3303_v7  ;;  %v10895_v58 = vsel %vm356_vm0, %v3303_v7, %v3305_v24  ;;  %v10909_v20 = vadd.f32 %v12558_v17, %v12557_v10 }
 0x238   : > { %12555 = vst [vmem:[#allocation17_spill] sm:$0xff] %v10892_v61  ;;  %12556 = vst [vmem:[#allocation18_spill] sm:$0xff] %v10895_v58  ;;  %v10897_v0 = vld [vmem:[#allocation2 + $0x90] sm:$0xff]  ;;  %v10899_v51 = vld [vmem:[#allocation2 + $0x98] sm:$0xff]  ;;  %v3057_v2 = vmax.f32 %v3025_v29, 0.0  ;;  %v3024_v62 = vadd.f32 %v10637_v16, %v2985_v63  ;;  %v2988_v3 = vadd.f32 %v7820_v41, %v2707_v49  ;;  %7886 = vmatprep.mubr.f32.mxu1 %v10892_v61  ;;  %v3310_v49 = vrot.slane %v10886_v57, 1 }
 0x239   : > { %3141 = vst [vmem:[#allocation2 + $0xc1] sm:$0xff] %v3054_v19  ;;  %7969 = vmatprep.mubr.f32.mxu0 %v10897_v0  ;;  %v3307_v36 = vrot.slane %v10897_v0, 1  ;;  %v2709_v21 = vadd.f32 %v10713_v1, %v2425_v28  ;;  %7887 = vmatmul.mubr.f32.gmra.mxu1 %v10895_v58  ;;  %v2900_v7 = vpop.f32.mrf.mxu0  ;;  %v3308_v24 = vrot.slane %v10899_v51, 1  ;;  %v12559_v19 = vld [vmem:[#allocation105_spill] sm:$0xff]  ;;  %v10919_v10 = vld [vmem:[#allocation2 + $0xb8] sm:$0x3]  ;;  %v2708_v1 = vadd.f32 %v10744_v12, %v2424_v9 }
 0x23a   : > { %7970 = vmatmul.mubr.f32.gmra.mxu0 %v10899_v51  ;;  %v2427_v29 = vadd.f32 %v12559_v19, %v10721_v47  ;;  %3144 = vst [vmem:[#allocation2 + $0xe1] sm:$0xff] %v3057_v2  ;;  %v3056_v63 = vmax.f32 %v3024_v62, 0.0  ;;  %v3027_v37 = vadd.f32 %v10637_v16, %v2988_v3  ;;  %v2987_v41 = vadd.f32 %v2900_v7, %v2706_v52  ;;  %v12560_v28 = vld [vmem:[#allocation107_spill] sm:$0xff]  ;;  %v10934_v62 = vpop.f32.mrf.mxu1  ;;  %v12562_v3 = vld [vmem:[#allocation72_spill] sm:$0xff] }
 0x23b   : > { %v2426_v17 = vadd.f32 %v12560_v28, %v10731_v56  ;;  %v7823_v58 = vpop.f32.mrf.mxu0  ;;  %v10925_v61 = vsel %vm356_vm0, %v3307_v36, %v3308_v24  ;;  %v10928_v38 = vsel %vm356_vm0, %v3308_v24, %v3310_v49  ;;  %v10941_v36 = vadd.f32 %v12562_v3, %v1877_v25  ;;  %v12563_v7 = vld [vmem:[#allocation108_spill] sm:$0xff] }
 0x23c   : > { %12561 = vst [vmem:[#allocation19_spill] sm:$0xff] %v10928_v38  ;;  %v10930_v47 = vld [vmem:[#allocation2 + $0xa8] sm:$0xff]  ;;  %v10932_v2 = vld [vmem:[#allocation2 + $0xb0] sm:$0xff]  ;;  %3143 = vst [vmem:[#allocation2 + $0xd9] sm:$0xff] %v3056_v63  ;;  %v3059_v52 = vmax.f32 %v3027_v37, 0.0  ;;  %v3026_v12 = vadd.f32 %v10637_v16, %v2987_v41  ;;  %v2990_v9 = vadd.f32 %v7823_v58, %v2709_v21  ;;  %7889 = vmatprep.mubr.f32.mxu1 %v10925_v61  ;;  %v3315_v58 = vrot.slane %v10919_v10, 1 }
 0x23d   : > { %7972 = vmatprep.mubr.f32.mxu0 %v10930_v47  ;;  %v3312_v56 = vrot.slane %v10930_v47, 1  ;;  %v2429_v24 = vadd.f32 %v12563_v7, %v10735_v55  ;;  %7890 = vmatmul.mubr.f32.gmra.mxu1 %v10928_v38  ;;  %v2910_v49 = vpop.f32.mrf.mxu0  ;;  %v3313_v19 = vrot.slane %v10932_v2, 1  ;;  %v2711_v21 = vadd.f32 %v10774_v8, %v2427_v29  ;;  %v10951_v41 = vld [vmem:[#allocation2 + $0xd0] sm:$0x3] }
 0x23e   : > { %7973 = vmatmul.mubr.f32.gmra.mxu0 %v10932_v2  ;;  %3146 = vst [vmem:[#allocation2 + $0xf9] sm:$0xff] %v3059_v52  ;;  %v3058_v63 = vmax.f32 %v3026_v12, 0.0  ;;  %v3029_v37 = vadd.f32 %v10637_v16, %v2990_v9  ;;  %v2989_v25 = vadd.f32 %v2910_v49, %v2708_v1  ;;  %v2710_v55 = vadd.f32 %v10805_v33, %v2426_v17  ;;  %v10966_v52 = vpop.f32.mrf.mxu1 }
 0x23f   : > { %v2428_v28 = vadd.f32 %v10535_v5, %v10750_v27  ;;  %v7826_v3 = vpop.f32.mrf.mxu0  ;;  %v10957_v7 = vsel %vm356_vm0, %v3312_v56, %v3313_v19  ;;  %v10960_v38 = vsel %vm356_vm0, %v3313_v19, %v3315_v58  ;;  %v12565_v27 = vld [vmem:[#allocation75_spill] sm:$0xff]  ;;  %v2713_v9 = vadd.f32 %v10838_v59, %v2429_v24  ;;  %v12566_v58 = vld [vmem:[#allocation110_spill] sm:$0xff] }
 0x240   : > { %12564 = vst [vmem:[#allocation20_spill] sm:$0xff] %v10960_v38  ;;  %v10962_v8 = vld [vmem:[#allocation2 + $0xc0] sm:$0xff]  ;;  %v10964_v29 = vld [vmem:[#allocation2 + $0xc8] sm:$0xff]  ;;  %3145 = vst [vmem:[#allocation2 + $0xf1] sm:$0xff] %v3058_v63  ;;  %v3061_v1 = vmax.f32 %v3029_v37, 0.0  ;;  %v3028_v33 = vadd.f32 %v10637_v16, %v2989_v25  ;;  %v2992_v17 = vadd.f32 %v7826_v3, %v2711_v21  ;;  %7892 = vmatprep.mubr.f32.mxu1 %v10957_v7  ;;  %v3320_v19 = vrot.slane %v10951_v41, 1 }
 0x241   : > { %7975 = vmatprep.mubr.f32.mxu0 %v10962_v8  ;;  %v3317_v5 = vrot.slane %v10962_v8, 1  ;;  %v1879_v12 = vadd.f32 %v12565_v27, %v10623_v53  ;;  %7893 = vmatmul.mubr.f32.gmra.mxu1 %v10960_v38  ;;  %v2920_v56 = vpop.f32.mrf.mxu0  ;;  %v3318_v49 = vrot.slane %v10964_v29, 1  ;;  %v2431_v21 = vadd.f32 %v12566_v58, %v10813_v31  ;;  %v10982_v53 = vld [vmem:[#allocation2 + $0xe8] sm:$0x3] }
 0x242   : > { %7976 = vmatmul.mubr.f32.gmra.mxu0 %v10964_v29  ;;  %3148 = vst [vmem:[#allocation2 + $0x111] sm:$0xff] %v3061_v1  ;;  %v3060_v63 = vmax.f32 %v3028_v33, 0.0  ;;  %v3031_v37 = vadd.f32 %v10637_v16, %v2992_v17  ;;  %v2991_v25 = vadd.f32 %v2920_v56, %v2710_v55  ;;  %v2712_v59 = vadd.f32 %v10870_v22, %v2428_v28  ;;  %v2669_v33 = vpop.f32.mrf.mxu1  ;;  %v12569_v28 = vld [vmem:[#allocation74_spill] sm:$0xff] }
 0x243   : > { %v2430_v24 = vadd.f32 %v10555_v43, %v10845_v30  ;;  %v7829_v3 = vpop.f32.mrf.mxu0  ;;  %v10988_v27 = vsel %vm356_vm0, %v3317_v5, %v3318_v49  ;;  %v10991_v38 = vsel %vm356_vm0, %v3318_v49, %v3320_v19  ;;  %v10993_v31 = vld [vmem:[#allocation2 + $0xd8] sm:$0xff]  ;;  %v10995_v1 = vld [vmem:[#allocation2 + $0xe0] sm:$0xff]  ;;  %v12568_v30 = vld [vmem:[#allocation73_spill] sm:$0xff]  ;;  %v2433_v56 = vadd.f32 %v10570_v44, %v10909_v20 }
 0x244   : > { %12567 = vst [vmem:[#allocation25_spill] sm:$0xff] %v10991_v38  ;;  %3147 = vst [vmem:[#allocation2 + $0x109] sm:$0xff] %v3060_v63  ;;  %v3063_v55 = vmax.f32 %v3031_v37, 0.0  ;;  %v3030_v17 = vadd.f32 %v10637_v16, %v2991_v25  ;;  %v2994_v22 = vadd.f32 %v7829_v3, %v2713_v9  ;;  %7895 = vmatprep.mubr.f32.mxu1 %v10988_v27  ;;  %7978 = vmatprep.mubr.f32.mxu0 %v10993_v31 }
 0x245   : > { %v3322_v43 = vrot.slane %v10993_v31, 1  ;;  %v2161_v5 = vadd.f32 %v12569_v28, %v12568_v30  ;;  %7896 = vmatmul.mubr.f32.gmra.mxu1 %v10991_v38  ;;  %v2930_v49 = vpop.f32.mrf.mxu0  ;;  %v3323_v19 = vrot.slane %v10995_v1, 1  ;;  %v3325_v9 = vrot.slane %v10982_v53, 1  ;;  %v11011_v3 = vld [vmem:[#allocation2 + $0x100] sm:$0x3] }
 0x246   : > { %7979 = vmatmul.mubr.f32.gmra.mxu0 %v10995_v1  ;;  %v2715_v58 = vadd.f32 %v10901_v14, %v2431_v21  ;;  %3150 = vst [vmem:[#allocation2 + $0x129] sm:$0xff] %v3063_v55  ;;  %v3062_v63 = vmax.f32 %v3030_v17, 0.0  ;;  %v3033_v37 = vadd.f32 %v10637_v16, %v2994_v22  ;;  %v2993_v25 = vadd.f32 %v2930_v49, %v2712_v59  ;;  %v7758_v55 = vpop.f32.mrf.mxu1 }
 0x247   : > { %v2714_v44 = vadd.f32 %v10934_v62, %v2430_v24  ;;  %v2432_v20 = vadd.f32 %v10586_v42, %v10941_v36  ;;  %v7832_v30 = vpop.f32.mrf.mxu0  ;;  %v11017_v28 = vsel %vm356_vm0, %v3322_v43, %v3323_v19  ;;  %v11020_v38 = vsel %vm356_vm0, %v3323_v19, %v3325_v9  ;;  %v11022_v14 = vld [vmem:[#allocation2 + $0xf0] sm:$0xff]  ;;  %v11024_v21 = vld [vmem:[#allocation2 + $0xf8] sm:$0xff]  ;;  %v12571_v36 = vld [vmem:[#allocation76_spill] sm:$0xff] }
 0x248   : > { %12570 = vst [vmem:[#allocation26_spill] sm:$0xff] %v11020_v38  ;;  %3149 = vst [vmem:[#allocation2 + $0x121] sm:$0xff] %v3062_v63  ;;  %v3065_v59 = vmax.f32 %v3033_v37, 0.0  ;;  %v3032_v17 = vadd.f32 %v10637_v16, %v2993_v25  ;;  %v2996_v62 = vadd.f32 %v7832_v30, %v2715_v58  ;;  %7898 = vmatprep.mubr.f32.mxu1 %v11017_v28  ;;  %7981 = vmatprep.mubr.f32.mxu0 %v11022_v14 }
 0x249   : > { %v3327_v42 = vrot.slane %v11022_v14, 1  ;;  %v2160_v24 = vadd.f32 %v12571_v36, %v1879_v12  ;;  %v2717_v22 = vadd.f32 %v10966_v52, %v2433_v56  ;;  %7899 = vmatmul.mubr.f32.gmra.mxu1 %v11020_v38  ;;  %v2940_v43 = vpop.f32.mrf.mxu0  ;;  %v3328_v49 = vrot.slane %v11024_v21, 1  ;;  %v11038_v25 = vld [vmem:[#allocation2 + $0x118] sm:$0x3] }
 0x24a   : > { %7982 = vmatmul.mubr.f32.gmra.mxu0 %v11024_v21  ;;  %v3330_v19 = vrot.slane %v11011_v3, 1  ;;  %v2435_v9 = vadd.f32 %v10599_v45, %v2161_v5  ;;  %3152 = vst [vmem:[#allocation2 + $0x141] sm:$0xff] %v3065_v59  ;;  %v3064_v58 = vmax.f32 %v3032_v17, 0.0  ;;  %v3035_v63 = vadd.f32 %v10637_v16, %v2996_v62  ;;  %v2679_v5 = vpop.f32.mrf.mxu1 }
 0x24b   : > { %v2995_v37 = vadd.f32 %v2940_v43, %v2714_v44  ;;  %v2716_v12 = vadd.f32 %v2669_v33, %v2432_v20  ;;  %v2434_v52 = vadd.f32 %v10620_v18, %v2160_v24  ;;  %v7835_v56 = vpop.f32.mrf.mxu0  ;;  %v11042_v30 = vsel %vm356_vm0, %v3327_v42, %v3328_v49  ;;  %v11047_v38 = vld [vmem:[#allocation2 + $0x108] sm:$0xff]  ;;  %v11049_v45 = vld [vmem:[#allocation2 + $0x110] sm:$0xff] }
 0x24c   : > { %v11045_v36 = vsel %vm356_vm0, %v3328_v49, %v3330_v19  ;;  %3151 = vst [vmem:[#allocation2 + $0x139] sm:$0xff] %v3064_v58  ;;  %v3067_v59 = vmax.f32 %v3035_v63, 0.0  ;;  %v2998_v17 = vadd.f32 %v7835_v56, %v2717_v22  ;;  %7901 = vmatprep.mubr.f32.mxu1 %v11042_v30  ;;  %7984 = vmatprep.mubr.f32.mxu0 %v11047_v38  ;;  %v3332_v18 = vrot.slane %v11047_v38, 1 }
 0x24d   : > { %12572 = vst [vmem:[#allocation21_spill] sm:$0xff] %v11045_v36  ;;  %v3034_v44 = vadd.f32 %v10637_v16, %v2995_v37  ;;  %7902 = vmatmul.mubr.f32.gmra.mxu1 %v11045_v36  ;;  %v2950_v33 = vpop.f32.mrf.mxu0  ;;  %v3333_v20 = vrot.slane %v11049_v45, 1  ;;  %v3335_v62 = vrot.slane %v11038_v25, 1  ;;  %v2719_v42 = vadd.f32 %v7758_v55, %v2435_v9  ;;  %v11060_v49 = vld [vmem:[#allocation2 + $0x130] sm:$0x3] }
 0x24e   : > { %7985 = vmatmul.mubr.f32.gmra.mxu0 %v11049_v45  ;;  %3154 = vst [vmem:[#allocation2 + $0x159] sm:$0xff] %v3067_v59  ;;  %v3037_v22 = vadd.f32 %v10637_v16, %v2998_v17  ;;  %v2997_v43 = vadd.f32 %v2950_v33, %v2716_v12  ;;  %v2718_v19 = vadd.f32 %v2679_v5, %v2434_v52 }
 0x24f   : > { %v3066_v24 = vmax.f32 %v3034_v44, 0.0  ;;  %v7838_v58 = vpop.f32.mrf.mxu0  ;;  %v11063_v63 = vsel %vm356_vm0, %v3332_v18, %v3333_v20  ;;  %v11066_v37 = vsel %vm356_vm0, %v3333_v20, %v3335_v62  ;;  %v11068_v56 = vld [vmem:[#allocation2 + $0x120] sm:$0xff]  ;;  %v11070_v36 = vld [vmem:[#allocation2 + $0x128] sm:$0xff]  ;;  %v3340_v44 = vrot.slane %v11060_v49, 1 }
 0x250   : > { %12573 = vst [vmem:[#allocation22_spill] sm:$0xff] %v11063_v63  ;;  %12574 = vst [vmem:[#allocation23_spill] sm:$0xff] %v11066_v37  ;;  %v3069_v55 = vmax.f32 %v3037_v22, 0.0  ;;  %v3036_v9 = vadd.f32 %v10637_v16, %v2997_v43  ;;  %v3000_v59 = vadd.f32 %v7838_v58, %v2719_v42  ;;  %7904 = vmatprep.mubr.f32.mxu1 %v11063_v63  ;;  %7987 = vmatprep.mubr.f32.mxu0 %v11068_v56  ;;  %v4541_v63 = vld [vmem:[#allocation3 + $0x270] sm:$0xff] }
 0x251   : > { %3153 = vst [vmem:[#allocation2 + $0x151] sm:$0xff] %v3066_v24  ;;  %v3337_v12 = vrot.slane %v11068_v56, 1  ;;  %7905 = vmatmul.mubr.f32.gmra.mxu1 %v11066_v37  ;;  %v2960_v52 = vpop.f32.mrf.mxu0  ;;  %v3338_v5 = vrot.slane %v11070_v36, 1  ;;  %v11080_v17 = vld [vmem:[#allocation2 + $0x148] sm:$0x3]  ;;  %v4822_v37 = vld [vmem:[#allocation3 + $0x2f0] sm:$0xff] }
 0x252   : > { %7988 = vmatmul.mubr.f32.gmra.mxu0 %v11070_v36  ;;  %3156 = vst [vmem:[#allocation2 + $0x171] sm:$0xff] %v3069_v55  ;;  %v3068_v18 = vmax.f32 %v3036_v9, 0.0  ;;  %v3039_v33 = vadd.f32 %v10637_v16, %v3000_v59  ;;  %v2999_v20 = vadd.f32 %v2960_v52, %v2718_v19  ;;  %v3345_v43 = vrot.slane %v11080_v17, 1 }
 0x253   : > { %v11084_v62 = vsel %vm356_vm0, %v3337_v12, %v3338_v5  ;;  %v11087_v42 = vsel %vm356_vm0, %v3338_v5, %v3340_v44  ;;  %v11089_v24 = vld [vmem:[#allocation2 + $0x138] sm:$0xff]  ;;  %v11091_v22 = vld [vmem:[#allocation2 + $0x140] sm:$0xff] }
 0x254   : > { %12575 = vst [vmem:[#allocation24_spill] sm:$0xff] %v11084_v62  ;;  %12576 = vst [vmem:[#allocation27_spill] sm:$0xff] %v11087_v42  ;;  %v3071_v58 = vmax.f32 %v3039_v33, 0.0  ;;  %v3038_v55 = vadd.f32 %v10637_v16, %v2999_v20  ;;  %7907 = vmatprep.mubr.f32.mxu1 %v11084_v62  ;;  %7990 = vmatprep.mubr.f32.mxu0 %v11089_v24  ;;  %v3342_v19 = vrot.slane %v11089_v24, 1  ;;  %v3343_v9 = vrot.slane %v11091_v22, 1 }
 0x255   : > { %3155 = vst [vmem:[#allocation2 + $0x169] sm:$0xff] %v3068_v18  ;;  %7908 = vmatmul.mubr.f32.gmra.mxu1 %v11087_v42  ;;  %v11101_v59 = vld [vmem:[#allocation2 + $0x160] sm:$0x3]  ;;  %v3862_v62 = vrot.slane %v10742_v4, 2 }
 0x256   : > { %7991 = vmatmul.mubr.f32.gmra.mxu0 %v11091_v22  ;;  %3158 = vst [vmem:[#allocation2 + $0x189] sm:$0xff] %v3071_v58  ;;  %v3070_v12 = vmax.f32 %v3038_v55, 0.0  ;;  %v11104_v52 = vsel %vm356_vm0, %v3342_v19, %v3343_v9  ;;  %v11107_v16 = vsel %vm356_vm0, %v3343_v9, %v3345_v43  ;;  %v3350_v20 = vrot.slane %v11101_v59, 1  ;;  %v8643_v19 = vld [vmem:[#allocation2] sm:$0xff] }
 0x257   : > { %12577 = vst [vmem:[#allocation28_spill] sm:$0xff] %v11104_v52  ;;  %12578 = vst [vmem:[#allocation29_spill] sm:$0xff] %v11107_v16  ;;  %7910 = vmatprep.mubr.f32.mxu1 %v11104_v52  ;;  %v3856_v9 = vrot.slane %v8643_v19, 2  ;;  %v8644_v19 = vld [vmem:[#allocation2 + $0x10] sm:$0x3] }
 0x258   : > { %v11110_v5 = vld [vmem:[#allocation2 + $0x150] sm:$0xff]  ;;  %v11112_v44 = vld [vmem:[#allocation2 + $0x158] sm:$0xff]  ;;  %3157 = vst [vmem:[#allocation2 + $0x181] sm:$0xff] %v3070_v12 }
 0x259   : > { %7993 = vmatprep.mubr.f32.mxu0 %v11110_v5  ;;  %v3347_v18 = vrot.slane %v11110_v5, 1  ;;  %v3348_v33 = vrot.slane %v11112_v44, 1  ;;  %7911 = vmatmul.mubr.f32.gmra.mxu1 %v11107_v16  ;;  %v11120_v43 = vld [vmem:[#allocation2 + $0x178] sm:$0x3] }
 0x25a   : > { %7994 = vmatmul.mubr.f32.gmra.mxu0 %v11112_v44 }
 0x25b   : > { %v11123_v58 = vsel %vm356_vm0, %v3347_v18, %v3348_v33  ;;  %v11126_v55 = vsel %vm356_vm0, %v3348_v33, %v3350_v20  ;;  %v3355_v18 = vrot.slane %v11120_v43, 1 }
 0x25c   : > { %12579 = vst [vmem:[#allocation30_spill] sm:$0xff] %v11123_v58  ;;  %12580 = vst [vmem:[#allocation31_spill] sm:$0xff] %v11126_v55  ;;  %7913 = vmatprep.mubr.f32.mxu1 %v11123_v58  ;;  %v11129_v12 = vld [vmem:[#allocation2 + $0x168] sm:$0xff]  ;;  %v11131_v52 = vld [vmem:[#allocation2 + $0x170] sm:$0xff]  ;;  %v3859_v58 = vrot.slane %v8644_v19, 2 }
 0x25d   : > { %7996 = vmatprep.mubr.f32.mxu0 %v11129_v12  ;;  %v3352_v16 = vrot.slane %v11129_v12, 1  ;;  %v3353_v42 = vrot.slane %v11131_v52, 1  ;;  %7914 = vmatmul.mubr.f32.gmra.mxu1 %v11126_v55  ;;  %v3861_v55 = vrot.slane %v10740_v54, 2 }
 0x25e   : > { %7997 = vmatmul.mubr.f32.gmra.mxu0 %v11131_v52 }
 0x25f   : > { %8111 = vmatprep.mubr.f32.mxu0 %v10740_v54  ;;  %v11141_v33 = vsel %vm356_vm0, %v3352_v16, %v3353_v42  ;;  %v11144_v20 = vsel %vm356_vm0, %v3353_v42, %v3355_v18  ;;  %v3860_v16 = vsel %vm936_vm1, %v3856_v9, %v3859_v58  ;;  %v8645_v42 = vld [vmem:[#allocation3 + $0x2f8] sm:$0xff]  ;;  %v7953_v18 = vpop.f32.mrf.mxu0  ;;  %v3866_v54 = vrot.slane %v10770_v40, 2 }
 0x260   : > { %12581 = vst [vmem:[#allocation32_spill] sm:$0xff] %v11141_v33  ;;  %12582 = vst [vmem:[#allocation33_spill] sm:$0xff] %v11144_v20  ;;  %7916 = vmatprep.mubr.f32.mxu1 %v11141_v33  ;;  %v8646_v58 = vld [vmem:[#allocation3 + $0x278] sm:$0xff] }
 0x261   : > { %7917 = vmatmul.mubr.f32.gmra.mxu1 %v11144_v20  ;;  %v11156_v20 = vsel %vm936_vm1, %v3861_v55, %v3862_v62  ;;  %v4540_v55 = vld [vmem:[#allocation3 + $0x268] sm:$0xff] }
 0x262   : > { %8112 = vmatmul.mubr.f32.vlgmr.msra.gmra.mxu0 %v10742_v4  ;;  %8031 = vmatprep.mubr.f32.mxu1 %v3856_v9  ;;  %v3867_v4 = vrot.slane %v10772_v26, 2  ;;  %v3864_v9 = vrot.slane %v10728_v39, 2  ;;  %v3872_v39 = vrot.slane %v10803_v6, 2 }
 0x263   : > { %8114 = vmatprep.mubr.f32.mxu0 %v10770_v40  ;;  %8240 = vmatpush3.msra.mxu0 %v8645_v42  ;;  %v7873_v19 = vpop.f32.mrf.mxu1  ;;  %v4821_v42 = vld [vmem:[#allocation3 + $0x2e8] sm:$0xff] }
 0x264   : > { %8241 = vmatprep.subr.mxu0 %v4822_v37  ;;  %v11153_v33 = vadd.f32 %v7953_v18, %v7873_v19  ;;  %v11169_v40 = vsel %vm936_vm1, %v3866_v54, %v3867_v4  ;;  %v4820_v18 = vld [vmem:[#allocation3 + $0x2e0] sm:$0xff]  ;;  %v3874_v19 = vrot.slane %v10790_v35, 2  ;;  %v3882_v35 = vrot.slane %v10868_v34, 2 }
 0x265   : > { %8032 = vmatmul.mubr.f32.vlgmr.msra.gmra.mxu1 %v3860_v16  ;;  %v11165_v16 = vsel %vm936_vm1, %v3862_v62, %v3864_v9  ;;  %8242 = vmatpush3.msra.mxu0 %v4822_v37  ;;  %v4539_v62 = vld [vmem:[#allocation3 + $0x260] sm:$0xff]  ;;  %v3879_v9 = vrot.slane %v10823_v13, 2  ;;  %v3887_v13 = vrot.slane %v10899_v51, 2 }
 0x266   : > { %8115 = vmatmul.mubr.f32.gmra.mxu0 %v10772_v26  ;;  %8034 = vmatprep.mubr.f32.mxu1 %v11156_v20  ;;  %v3871_v26 = vrot.slane %v10801_v60, 2  ;;  %v11191_v54 = vsel %vm936_vm1, %v3872_v39, %v3874_v19  ;;  %v4535_v19 = vld [vmem:[#allocation3 + $0x240] sm:$0xff] }
 0x267   : > { %8160 = vmatpush3.msra.mxu1 %v8646_v58  ;;  %8117 = vmatprep.mubr.f32.mxu0 %v10801_v60  ;;  %v4819_v58 = vld [vmem:[#allocation3 + $0x2d8] sm:$0xff] }
 0x268   : > { %8161 = vmatprep.subr.mxu1 %v4541_v63  ;;  %8243 = vmatprep.subr.mxu0 %v4821_v42  ;;  %v11182_v60 = vsel %vm936_vm1, %v3871_v26, %v3872_v39  ;;  %v4818_v26 = vld [vmem:[#allocation3 + $0x2d0] sm:$0xff]  ;;  %v3884_v39 = vrot.slane %v10855_v48, 2  ;;  %v3892_v48 = vrot.slane %v10932_v2, 2 }
 0x269   : > { %8162 = vmatpush3.msra.mxu1 %v4541_v63  ;;  %v3869_v63 = vrot.slane %v10759_v32, 2  ;;  %8244 = vmatpush3.msra.mxu0 %v4821_v42  ;;  %v3877_v32 = vrot.slane %v10836_v23, 2  ;;  %v4537_v42 = vld [vmem:[#allocation3 + $0x250] sm:$0xff] }
 0x26a   : > { %8035 = vmatmul.mubr.f32.gmra.mxu1 %v11165_v16  ;;  %8118 = vmatmul.mubr.f32.gmra.mxu0 %v10803_v6  ;;  %v3876_v6 = vrot.slane %v10834_v46, 2 }
 0x26b   : > { %8037 = vmatprep.mubr.f32.mxu1 %v11169_v40  ;;  %8120 = vmatprep.mubr.f32.mxu0 %v10834_v46  ;;  %v11178_v37 = vsel %vm936_vm1, %v3867_v4, %v3869_v63  ;;  %v4538_v4 = vld [vmem:[#allocation3 + $0x258] sm:$0xff]  ;;  %v11217_v63 = vsel %vm936_vm1, %v3882_v35, %v3884_v39  ;;  %v3904_v39 = vrot.slane %v10982_v53, 2  ;;  %v3912_v53 = vrot.slane %v11049_v45, 2 }
 0x26c   : > { %8163 = vmatprep.subr.mxu1 %v4540_v55  ;;  %8245 = vmatprep.subr.mxu0 %v4820_v18  ;;  %v11195_v46 = vsel %vm936_vm1, %v3876_v6, %v3877_v32  ;;  %v3889_v6 = vrot.slane %v10886_v57, 2  ;;  %v3897_v57 = vrot.slane %v10964_v29, 2 }
 0x26d   : > { %8164 = vmatpush3.msra.mxu1 %v4540_v55  ;;  %8246 = vmatpush3.msra.mxu0 %v4820_v18  ;;  %v11204_v55 = vsel %vm936_vm1, %v3877_v32, %v3879_v9  ;;  %v4817_v18 = vld [vmem:[#allocation3 + $0x2c8] sm:$0xff]  ;;  %v4815_v9 = vld [vmem:[#allocation3 + $0x2b8] sm:$0xff] }
 0x26e   : > { %8038 = vmatmul.mubr.f32.gmra.mxu1 %v11178_v37  ;;  %8121 = vmatmul.mubr.f32.gmra.mxu0 %v10836_v23  ;;  %v3881_v23 = vrot.slane %v10866_v11, 2  ;;  %v11230_v32 = vsel %vm936_vm1, %v3887_v13, %v3889_v6 }
 0x26f   : > { %8040 = vmatprep.mubr.f32.mxu1 %v11182_v60  ;;  %8123 = vmatprep.mubr.f32.mxu0 %v10866_v11 }
 0x270   : > { %8165 = vmatprep.subr.mxu1 %v4539_v62  ;;  %8247 = vmatprep.subr.mxu0 %v4819_v58  ;;  %v11208_v11 = vsel %vm936_vm1, %v3881_v23, %v3882_v35  ;;  %v4534_v35 = vld [vmem:[#allocation3 + $0x238] sm:$0xff] }
 0x271   : > { %8166 = vmatpush3.msra.mxu1 %v4539_v62  ;;  %8248 = vmatpush3.msra.mxu0 %v4819_v58  ;;  %v4536_v62 = vld [vmem:[#allocation3 + $0x248] sm:$0xff]  ;;  %v3894_v58 = vrot.slane %v10919_v10, 2  ;;  %v3902_v10 = vrot.slane %v10995_v1, 2 }
 0x272   : > { %8041 = vmatmul.mubr.f32.gmra.mxu1 %v11191_v54  ;;  %8124 = vmatmul.mubr.f32.gmra.mxu0 %v10868_v34  ;;  %v3886_v34 = vrot.slane %v10897_v0, 2 }
 0x273   : > { %8043 = vmatprep.mubr.f32.mxu1 %v11195_v46  ;;  %8126 = vmatprep.mubr.f32.mxu0 %v10897_v0  ;;  %v11243_v23 = vsel %vm936_vm1, %v3892_v48, %v3894_v58  ;;  %v4530_v58 = vld [vmem:[#allocation3 + $0x218] sm:$0xff] }
 0x274   : > { %8167 = vmatprep.subr.mxu1 %v4538_v4  ;;  %8249 = vmatprep.subr.mxu0 %v4818_v26  ;;  %v11221_v0 = vsel %vm936_vm1, %v3886_v34, %v3887_v13  ;;  %v4533_v34 = vld [vmem:[#allocation3 + $0x230] sm:$0xff] }
 0x275   : > { %8168 = vmatpush3.msra.mxu1 %v4538_v4  ;;  %8250 = vmatpush3.msra.mxu0 %v4818_v26  ;;  %v4816_v4 = vld [vmem:[#allocation3 + $0x2c0] sm:$0xff]  ;;  %v4814_v13 = vld [vmem:[#allocation3 + $0x2b0] sm:$0xff] }
 0x276   : > { %8044 = vmatmul.mubr.f32.gmra.mxu1 %v11204_v55  ;;  %8127 = vmatmul.mubr.f32.gmra.mxu0 %v10899_v51  ;;  %v3891_v51 = vrot.slane %v10930_v47, 2 }
 0x277   : > { %8046 = vmatprep.mubr.f32.mxu1 %v11208_v11  ;;  %8129 = vmatprep.mubr.f32.mxu0 %v10930_v47 }
 0x278   : > { %8169 = vmatprep.subr.mxu1 %v4537_v42  ;;  %8251 = vmatprep.subr.mxu0 %v4817_v18  ;;  %v11234_v47 = vsel %vm936_vm1, %v3891_v51, %v3892_v48  ;;  %v4813_v51 = vld [vmem:[#allocation3 + $0x2a8] sm:$0xff]  ;;  %v3909_v48 = vrot.slane %v11011_v3, 2  ;;  %v3917_v3 = vrot.slane %v11070_v36, 2 }
 0x279   : > { %8170 = vmatpush3.msra.mxu1 %v4537_v42  ;;  %8252 = vmatpush3.msra.mxu0 %v4817_v18  ;;  %v3899_v42 = vrot.slane %v10951_v41, 2  ;;  %v3907_v41 = vrot.slane %v11024_v21, 2  ;;  %v4532_v18 = vld [vmem:[#allocation3 + $0x228] sm:$0xff] }
 0x27a   : > { %8047 = vmatmul.mubr.f32.gmra.mxu1 %v11217_v63  ;;  %8130 = vmatmul.mubr.f32.gmra.mxu0 %v10932_v2  ;;  %v3896_v2 = vrot.slane %v10962_v8, 2 }
 0x27b   : > { %8049 = vmatprep.mubr.f32.mxu1 %v11221_v0  ;;  %8132 = vmatprep.mubr.f32.mxu0 %v10962_v8  ;;  %v11256_v26 = vsel %vm936_vm1, %v3897_v57, %v3899_v42  ;;  %v11282_v6 = vsel %vm936_vm1, %v3907_v41, %v3909_v48  ;;  %v4810_v42 = vld [vmem:[#allocation3 + $0x290] sm:$0xff]  ;;  %v4527_v48 = vld [vmem:[#allocation3 + $0x200] sm:$0xff] }
 0x27c   : > { %8171 = vmatprep.subr.mxu1 %v4536_v62  ;;  %8253 = vmatprep.subr.mxu0 %v4816_v4  ;;  %v11247_v8 = vsel %vm936_vm1, %v3896_v2, %v3897_v57  ;;  %v3914_v2 = vrot.slane %v11038_v25, 2  ;;  %v3922_v25 = vrot.slane %v11091_v22, 2 }
 0x27d   : > { %8172 = vmatpush3.msra.mxu1 %v4536_v62  ;;  %8254 = vmatpush3.msra.mxu0 %v4816_v4  ;;  %v11269_v62 = vsel %vm936_vm1, %v3902_v10, %v3904_v39  ;;  %v4812_v4 = vld [vmem:[#allocation3 + $0x2a0] sm:$0xff]  ;;  %v3932_v39 = vrot.slane %v11131_v52, 2 }
 0x27e   : > { %8050 = vmatmul.mubr.f32.gmra.mxu1 %v11230_v32  ;;  %8133 = vmatmul.mubr.f32.gmra.mxu0 %v10964_v29  ;;  %v3901_v29 = vrot.slane %v10993_v31, 2  ;;  %v11295_v57 = vsel %vm936_vm1, %v3912_v53, %v3914_v2  ;;  %v12593_v2 = vld [vmem:[#allocation13_spill] sm:$0xff] }
 0x27f   : > { %8052 = vmatprep.mubr.f32.mxu1 %v11234_v47  ;;  %8135 = vmatprep.mubr.f32.mxu0 %v10993_v31 }
 0x280   : > { %8173 = vmatprep.subr.mxu1 %v4535_v19  ;;  %8255 = vmatprep.subr.mxu0 %v4815_v9  ;;  %v11260_v31 = vsel %vm936_vm1, %v3901_v29, %v3902_v10  ;;  %v4529_v10 = vld [vmem:[#allocation3 + $0x210] sm:$0xff] }
 0x281   : > { %8174 = vmatpush3.msra.mxu1 %v4535_v19  ;;  %8256 = vmatpush3.msra.mxu0 %v4815_v9  ;;  %v4531_v19 = vld [vmem:[#allocation3 + $0x220] sm:$0xff]  ;;  %v3919_v9 = vrot.slane %v11060_v49, 2  ;;  %v3927_v49 = vrot.slane %v11112_v44, 2 }
 0x282   : > { %8053 = vmatmul.mubr.f32.gmra.mxu1 %v11243_v23  ;;  %8136 = vmatmul.mubr.f32.gmra.mxu0 %v10995_v1  ;;  %v3906_v1 = vrot.slane %v11022_v14, 2 }
 0x283   : > { %8055 = vmatprep.mubr.f32.mxu1 %v11247_v8  ;;  %8138 = vmatprep.mubr.f32.mxu0 %v11022_v14  ;;  %v11308_v29 = vsel %vm936_vm1, %v3917_v3, %v3919_v9  ;;  %v12596_v9 = vld [vmem:[#allocation16_spill] sm:$0xff] }
 0x284   : > { %8175 = vmatprep.subr.mxu1 %v4534_v35  ;;  %8257 = vmatprep.subr.mxu0 %v4814_v13  ;;  %v11273_v14 = vsel %vm936_vm1, %v3906_v1, %v3907_v41  ;;  %12584 = vst [vmem:[#allocation35_spill] sm:$0xff] %v11308_v29  ;;  %v4528_v1 = vld [vmem:[#allocation3 + $0x208] sm:$0xff] }
 0x285   : > { %8176 = vmatpush3.msra.mxu1 %v4534_v35  ;;  %8258 = vmatpush3.msra.mxu0 %v4814_v13  ;;  %v4811_v35 = vld [vmem:[#allocation3 + $0x298] sm:$0xff]  ;;  %v4809_v41 = vld [vmem:[#allocation3 + $0x288] sm:$0xff] }
 0x286   : > { %8056 = vmatmul.mubr.f32.gmra.mxu1 %v11256_v26  ;;  %8139 = vmatmul.mubr.f32.gmra.mxu0 %v11024_v21  ;;  %v3911_v21 = vrot.slane %v11047_v38, 2 }
 0x287   : > { %8058 = vmatprep.mubr.f32.mxu1 %v11260_v31  ;;  %8141 = vmatprep.mubr.f32.mxu0 %v11047_v38 }
 0x288   : > { %8177 = vmatprep.subr.mxu1 %v4533_v34  ;;  %8259 = vmatprep.subr.mxu0 %v4813_v51  ;;  %v11286_v38 = vsel %vm936_vm1, %v3911_v21, %v3912_v53  ;;  %v11338_v21 = vld [vmem:[#allocation2 + $0x188] sm:$0xff]  ;;  %v4808_v53 = vld [vmem:[#allocation3 + $0x280] sm:$0xff] }
 0x289   : > { %8178 = vmatpush3.msra.mxu1 %v4533_v34  ;;  %8260 = vmatpush3.msra.mxu0 %v4813_v51  ;;  %v3924_v34 = vrot.slane %v11080_v17, 2  ;;  %v3931_v17 = vrot.slane %v11129_v12, 2 }
 0x28a   : > { %8059 = vmatmul.mubr.f32.gmra.mxu1 %v11269_v62  ;;  %8142 = vmatmul.mubr.f32.gmra.mxu0 %v11049_v45  ;;  %v3916_v45 = vrot.slane %v11068_v56, 2 }
 0x28b   : > { %8061 = vmatprep.mubr.f32.mxu1 %v11273_v14  ;;  %8144 = vmatprep.mubr.f32.mxu0 %v11068_v56  ;;  %v11321_v13 = vsel %vm936_vm1, %v3922_v25, %v3924_v34  ;;  %v5376_v34 = vld [vmem:[#allocation3 + $0x3d0] sm:$0xff] }
 0x28c   : > { %8179 = vmatprep.subr.mxu1 %v4532_v18  ;;  %8261 = vmatprep.subr.mxu0 %v4812_v4  ;;  %v11299_v56 = vsel %vm936_vm1, %v3916_v45, %v3917_v3  ;;  %12586 = vst [vmem:[#allocation78_spill] sm:$0xff] %v11321_v13  ;;  %v12591_v45 = vld [vmem:[#allocation11_spill] sm:$0xff]  ;;  %v5379_v3 = vld [vmem:[#allocation3 + $0x3e8] sm:$0xff] }
 0x28d   : > { %8180 = vmatpush3.msra.mxu1 %v4532_v18  ;;  %8262 = vmatpush3.msra.mxu0 %v4812_v4  ;;  %12583 = vst [vmem:[#allocation34_spill] sm:$0xff] %v11299_v56  ;;  %v3929_v18 = vrot.slane %v11101_v59, 2  ;;  %v3934_v59 = vrot.slane %v11120_v43, 2  ;;  %v5381_v4 = vld [vmem:[#allocation3 + $0x3f8] sm:$0xff]  ;;  %v5096_v43 = vld [vmem:[#allocation3 + $0x370] sm:$0xff] }
 0x28e   : > { %8062 = vmatmul.mubr.f32.gmra.mxu1 %v11282_v6  ;;  %8145 = vmatmul.mubr.f32.gmra.mxu0 %v11070_v36  ;;  %v3921_v36 = vrot.slane %v11089_v24, 2 }
 0x28f   : > { %8064 = vmatprep.mubr.f32.mxu1 %v11286_v38  ;;  %8147 = vmatprep.mubr.f32.mxu0 %v11089_v24  ;;  %v11336_v51 = vsel %vm936_vm1, %v3927_v49, %v3929_v18  ;;  %v12600_v18 = vld [vmem:[#allocation20_spill] sm:$0xff] }
 0x290   : > { %8181 = vmatprep.subr.mxu1 %v4531_v19  ;;  %8263 = vmatprep.subr.mxu0 %v4811_v35  ;;  %v11312_v24 = vsel %vm936_vm1, %v3921_v36, %v3922_v25  ;;  %12588 = vst [vmem:[#allocation37_spill] sm:$0xff] %v11336_v51  ;;  %v12595_v36 = vld [vmem:[#allocation15_spill] sm:$0xff]  ;;  %v5093_v25 = vld [vmem:[#allocation3 + $0x358] sm:$0xff] }
 0x291   : > { %8182 = vmatpush3.msra.mxu1 %v4531_v19  ;;  %8264 = vmatpush3.msra.mxu0 %v4811_v35  ;;  %12585 = vst [vmem:[#allocation9_spill] sm:$0xff] %v11312_v24  ;;  %v5097_v19 = vld [vmem:[#allocation3 + $0x378] sm:$0xff]  ;;  %v5378_v35 = vld [vmem:[#allocation3 + $0x3e0] sm:$0xff] }
 0x292   : > { %8065 = vmatmul.mubr.f32.gmra.mxu1 %v11295_v57  ;;  %8148 = vmatmul.mubr.f32.gmra.mxu0 %v11091_v22  ;;  %v3926_v22 = vrot.slane %v11110_v5, 2 }
 0x293   : > { %8067 = vmatprep.mubr.f32.mxu1 %v11299_v56  ;;  %8150 = vmatprep.mubr.f32.mxu0 %v11110_v5 }
 0x294   : > { %8183 = vmatprep.subr.mxu1 %v4530_v58  ;;  %8265 = vmatprep.subr.mxu0 %v4810_v42  ;;  %v11325_v5 = vsel %vm936_vm1, %v3926_v22, %v3927_v49  ;;  %v5092_v22 = vld [vmem:[#allocation3 + $0x350] sm:$0xff]  ;;  %v12598_v49 = vld [vmem:[#allocation18_spill] sm:$0xff] }
 0x295   : > { %8184 = vmatpush3.msra.mxu1 %v4530_v58  ;;  %8266 = vmatpush3.msra.mxu0 %v4810_v42  ;;  %12587 = vst [vmem:[#allocation36_spill] sm:$0xff] %v11325_v5  ;;  %v12594_v58 = vld [vmem:[#allocation14_spill] sm:$0xff]  ;;  %v12597_v42 = vld [vmem:[#allocation17_spill] sm:$0xff] }
 0x296   : > { %8068 = vmatmul.mubr.f32.gmra.mxu1 %v11308_v29  ;;  %8151 = vmatmul.mubr.f32.gmra.mxu0 %v11112_v44  ;;  %v11328_v44 = vld [vmem:[#allocation2 + $0x180] sm:$0xff] }
 0x297   : > { %8070 = vmatprep.mubr.f32.mxu1 %v11312_v24  ;;  %8153 = vmatprep.mubr.f32.mxu0 %v11129_v12  ;;  %v11349_v12 = vsel %vm936_vm1, %v3932_v39, %v3934_v59  ;;  %v12601_v59 = vld [vmem:[#allocation25_spill] sm:$0xff] }
 0x298   : > { %8185 = vmatprep.subr.mxu1 %v4529_v10  ;;  %8267 = vmatprep.subr.mxu0 %v4809_v41  ;;  %12590 = vst [vmem:[#allocation38_spill] sm:$0xff] %v11349_v12 }
 0x299   : > { %8186 = vmatpush3.msra.mxu1 %v4529_v10  ;;  %8268 = vmatpush3.msra.mxu0 %v4809_v41  ;;  %v5377_v10 = vld [vmem:[#allocation3 + $0x3d8] sm:$0xff]  ;;  %v12599_v41 = vld [vmem:[#allocation19_spill] sm:$0xff] }
 0x29a   : > { %8071 = vmatmul.mubr.f32.gmra.mxu1 %v11321_v13  ;;  %8154 = vmatmul.mubr.f32.gmra.mxu0 %v11131_v52  ;;  %v11342_v52 = vsel %vm936_vm1, %v3931_v17, %v3932_v39  ;;  %v5375_v17 = vld [vmem:[#allocation3 + $0x3c8] sm:$0xff]  ;;  %v5090_v39 = vld [vmem:[#allocation3 + $0x340] sm:$0xff] }
 0x29b   : > { %8073 = vmatprep.mubr.f32.mxu1 %v11325_v5  ;;  %8156 = vmatprep.mubr.f32.mxu0 %v11328_v44  ;;  %12589 = vst [vmem:[#allocation77_spill] sm:$0xff] %v11342_v52 }
 0x29c   : > { %8187 = vmatprep.subr.mxu1 %v4528_v1  ;;  %8269 = vmatprep.subr.mxu0 %v4808_v53 }
 0x29d   : > { %8188 = vmatpush3.msra.mxu1 %v4528_v1  ;;  %8270 = vmatpush3.msra.mxu0 %v4808_v53  ;;  %v5091_v1 = vld [vmem:[#allocation3 + $0x348] sm:$0xff]  ;;  %v5374_v53 = vld [vmem:[#allocation3 + $0x3c0] sm:$0xff] }
 0x29e   : > { %8074 = vmatmul.mubr.f32.gmra.mxu1 %v11336_v51  ;;  %8157 = vmatmul.mubr.f32.gmra.mxu0 %v11338_v21 }
 0x29f   : > { %8076 = vmatprep.mubr.f32.mxu1 %v11342_v52  ;;  %8271 = vmatprep.mubr.f32.mxu0 %v11156_v20  ;;  %v5380_v20 = vld [vmem:[#allocation3 + $0x3f0] sm:$0xff] }
 0x2a0   : > { %8189 = vmatprep.subr.mxu1 %v4527_v48  ;;  %8399 = vmatprep.subr.mxu0 %v5381_v4 }
 0x2a1   : > { %8190 = vmatpush3.msra.mxu1 %v4527_v48  ;;  %v5089_v48 = vld [vmem:[#allocation3 + $0x338] sm:$0xff] }
 0x2a2   : > { %8077 = vmatmul.mubr.f32.gmra.mxu1 %v11349_v12  ;;  %8272 = vmatmul.mubr.f32.vlgmr.msra.gmra.mxu0 %v11165_v16  ;;  %v5095_v16 = vld [vmem:[#allocation3 + $0x368] sm:$0xff] }
 0x2a3   : > { %8191 = vmatprep.mubr.f32.mxu1 %v10765_v15  ;;  %8274 = vmatprep.mubr.f32.mxu0 %v11169_v40  ;;  %v12592_v15 = vld [vmem:[#allocation12_spill] sm:$0xff] }
 0x2a4   : > { %8319 = vmatprep.subr.mxu1 %v5097_v19  ;;  %8400 = vmatpush3.msra.mxu0 %v5381_v4  ;;  %v5088_v4 = vld [vmem:[#allocation3 + $0x330] sm:$0xff] }
 0x2a5   : > { %8401 = vmatprep.subr.mxu0 %v5380_v20 }
 0x2a6   : > { %8192 = vmatmul.mubr.f32.vlgmr.msra.gmra.mxu1 %v10768_v50  ;;  %8275 = vmatmul.mubr.f32.gmra.mxu0 %v11178_v37  ;;  %v5094_v50 = vld [vmem:[#allocation3 + $0x360] sm:$0xff] }
 0x2a7   : > { %8194 = vmatprep.mubr.f32.mxu1 %v12591_v45  ;;  %8320 = vmatpush3.msra.mxu1 %v5097_v19  ;;  %v5373_v19 = vld [vmem:[#allocation3 + $0x3b8] sm:$0xff] }
 0x2a8   : > { %8277 = vmatprep.mubr.f32.mxu0 %v11182_v60  ;;  %8321 = vmatprep.subr.mxu1 %v5096_v43 }
 0x2a9   : > { %8322 = vmatpush3.msra.mxu1 %v5096_v43  ;;  %8402 = vmatpush3.msra.mxu0 %v5380_v20  ;;  %v12602_v43 = vld [vmem:[#allocation26_spill] sm:$0xff]  ;;  %v5372_v20 = vld [vmem:[#allocation3 + $0x3b0] sm:$0xff] }
 0x2aa   : > { %8195 = vmatmul.mubr.f32.gmra.mxu1 %v12592_v15  ;;  %8278 = vmatmul.mubr.f32.gmra.mxu0 %v11191_v54 }
 0x2ab   : > { %8197 = vmatprep.mubr.f32.mxu1 %v12593_v2  ;;  %8280 = vmatprep.mubr.f32.mxu0 %v11195_v46 }
 0x2ac   : > { %8323 = vmatprep.subr.mxu1 %v5095_v16  ;;  %8403 = vmatprep.subr.mxu0 %v5379_v3 }
 0x2ad   : > { %8324 = vmatpush3.msra.mxu1 %v5095_v16  ;;  %8404 = vmatpush3.msra.mxu0 %v5379_v3  ;;  %v5087_v16 = vld [vmem:[#allocation3 + $0x328] sm:$0xff]  ;;  %v12603_v3 = vld [vmem:[#allocation21_spill] sm:$0xff] }
 0x2ae   : > { %8198 = vmatmul.mubr.f32.gmra.mxu1 %v12594_v58  ;;  %8281 = vmatmul.mubr.f32.gmra.mxu0 %v11204_v55 }
 0x2af   : > { %8200 = vmatprep.mubr.f32.mxu1 %v12595_v36  ;;  %8283 = vmatprep.mubr.f32.mxu0 %v11208_v11 }
 0x2b0   : > { %8325 = vmatprep.subr.mxu1 %v5094_v50  ;;  %8405 = vmatprep.subr.mxu0 %v5378_v35 }
 0x2b1   : > { %8326 = vmatpush3.msra.mxu1 %v5094_v50  ;;  %8406 = vmatpush3.msra.mxu0 %v5378_v35  ;;  %v5371_v50 = vld [vmem:[#allocation3 + $0x3a8] sm:$0xff] }
 0x2b2   : > { %8201 = vmatmul.mubr.f32.gmra.mxu1 %v12596_v9  ;;  %8284 = vmatmul.mubr.f32.gmra.mxu0 %v11217_v63  ;;  %v12604_v35 = vld [vmem:[#allocation22_spill] sm:$0xff] }
 0x2b3   : > { %8203 = vmatprep.mubr.f32.mxu1 %v12597_v42  ;;  %8286 = vmatprep.mubr.f32.mxu0 %v11221_v0 }
 0x2b4   : > { %8327 = vmatprep.subr.mxu1 %v5093_v25  ;;  %8407 = vmatprep.subr.mxu0 %v5377_v10 }
 0x2b5   : > { %8328 = vmatpush3.msra.mxu1 %v5093_v25  ;;  %8408 = vmatpush3.msra.mxu0 %v5377_v10  ;;  %v5086_v25 = vld [vmem:[#allocation3 + $0x320] sm:$0xff]  ;;  %v12605_v10 = vld [vmem:[#allocation23_spill] sm:$0xff] }
 0x2b6   : > { %8204 = vmatmul.mubr.f32.gmra.mxu1 %v12598_v49  ;;  %8287 = vmatmul.mubr.f32.gmra.mxu0 %v11230_v32 }
 0x2b7   : > { %8206 = vmatprep.mubr.f32.mxu1 %v10925_v61  ;;  %8289 = vmatprep.mubr.f32.mxu0 %v11234_v47 }
 0x2b8   : > { %8329 = vmatprep.subr.mxu1 %v5092_v22  ;;  %8409 = vmatprep.subr.mxu0 %v5376_v34 }
 0x2b9   : > { %8330 = vmatpush3.msra.mxu1 %v5092_v22  ;;  %8410 = vmatpush3.msra.mxu0 %v5376_v34  ;;  %v5370_v22 = vld [vmem:[#allocation3 + $0x3a0] sm:$0xff]  ;;  %v12606_v34 = vld [vmem:[#allocation24_spill] sm:$0xff] }
 0x2ba   : > { %8207 = vmatmul.mubr.f32.gmra.mxu1 %v12599_v41  ;;  %8290 = vmatmul.mubr.f32.gmra.mxu0 %v11243_v23 }
 0x2bb   : > { %8209 = vmatprep.mubr.f32.mxu1 %v10957_v7  ;;  %8292 = vmatprep.mubr.f32.mxu0 %v11247_v8 }
 0x2bc   : > { %8331 = vmatprep.subr.mxu1 %v5091_v1  ;;  %8411 = vmatprep.subr.mxu0 %v5375_v17 }
 0x2bd   : > { %8332 = vmatpush3.msra.mxu1 %v5091_v1  ;;  %8412 = vmatpush3.msra.mxu0 %v5375_v17  ;;  %v5085_v1 = vld [vmem:[#allocation3 + $0x318] sm:$0xff]  ;;  %v12607_v17 = vld [vmem:[#allocation27_spill] sm:$0xff] }
 0x2be   : > { %8210 = vmatmul.mubr.f32.gmra.mxu1 %v12600_v18  ;;  %8293 = vmatmul.mubr.f32.gmra.mxu0 %v11256_v26 }
 0x2bf   : > { %8212 = vmatprep.mubr.f32.mxu1 %v10988_v27  ;;  %8295 = vmatprep.mubr.f32.mxu0 %v11260_v31 }
 0x2c0   : > { %8333 = vmatprep.subr.mxu1 %v5090_v39  ;;  %8413 = vmatprep.subr.mxu0 %v5374_v53 }
 0x2c1   : > { %8334 = vmatpush3.msra.mxu1 %v5090_v39  ;;  %8414 = vmatpush3.msra.mxu0 %v5374_v53  ;;  %v5369_v39 = vld [vmem:[#allocation3 + $0x398] sm:$0xff] }
 0x2c2   : > { %8213 = vmatmul.mubr.f32.gmra.mxu1 %v12601_v59  ;;  %8296 = vmatmul.mubr.f32.gmra.mxu0 %v11269_v62  ;;  %v12608_v53 = vld [vmem:[#allocation28_spill] sm:$0xff] }
 0x2c3   : > { %8215 = vmatprep.mubr.f32.mxu1 %v11017_v28  ;;  %8298 = vmatprep.mubr.f32.mxu0 %v11273_v14 }
 0x2c4   : > { %8335 = vmatprep.subr.mxu1 %v5089_v48  ;;  %8415 = vmatprep.subr.mxu0 %v5373_v19 }
 0x2c5   : > { %8336 = vmatpush3.msra.mxu1 %v5089_v48  ;;  %8416 = vmatpush3.msra.mxu0 %v5373_v19  ;;  %v5084_v48 = vld [vmem:[#allocation3 + $0x310] sm:$0xff]  ;;  %v12609_v19 = vld [vmem:[#allocation29_spill] sm:$0xff] }
 0x2c6   : > { %8216 = vmatmul.mubr.f32.gmra.mxu1 %v12602_v43  ;;  %8299 = vmatmul.mubr.f32.gmra.mxu0 %v11282_v6 }
 0x2c7   : > { %8218 = vmatprep.mubr.f32.mxu1 %v11042_v30  ;;  %8301 = vmatprep.mubr.f32.mxu0 %v11286_v38 }
 0x2c8   : > { %8337 = vmatprep.subr.mxu1 %v5088_v4  ;;  %8417 = vmatprep.subr.mxu0 %v5372_v20 }
 0x2c9   : > { %8338 = vmatpush3.msra.mxu1 %v5088_v4  ;;  %8418 = vmatpush3.msra.mxu0 %v5372_v20  ;;  %v4800_v4 = vrot.slane %v11328_v44, 2  ;;  %v4801_v20 = vrot.slane %v11338_v21, 2 }
 0x2ca   : > { %8219 = vmatmul.mubr.f32.gmra.mxu1 %v12603_v3  ;;  %8302 = vmatmul.mubr.f32.gmra.mxu0 %v11295_v57 }
 0x2cb   : > { %8221 = vmatprep.mubr.f32.mxu1 %v12604_v35  ;;  %8304 = vmatprep.mubr.f32.mxu0 %v11299_v56  ;;  %v5082_v56 = vld [vmem:[#allocation3 + $0x300] sm:$0xff] }
 0x2cc   : > { %8339 = vmatprep.subr.mxu1 %v5087_v16  ;;  %8419 = vmatprep.subr.mxu0 %v5371_v50 }
 0x2cd   : > { %8340 = vmatpush3.msra.mxu1 %v5087_v16  ;;  %8420 = vmatpush3.msra.mxu0 %v5371_v50  ;;  %v5368_v16 = vld [vmem:[#allocation3 + $0x390] sm:$0xff]  ;;  %v12610_v50 = vld [vmem:[#allocation30_spill] sm:$0xff] }
 0x2ce   : > { %8222 = vmatmul.mubr.f32.gmra.mxu1 %v12605_v10  ;;  %8305 = vmatmul.mubr.f32.gmra.mxu0 %v11308_v29  ;;  %v12613_v29 = vld [vmem:[#allocation32_spill] sm:$0xff] }
 0x2cf   : > { %8224 = vmatprep.mubr.f32.mxu1 %v12606_v34  ;;  %8307 = vmatprep.mubr.f32.mxu0 %v11312_v24  ;;  %v5367_v24 = vld [vmem:[#allocation3 + $0x388] sm:$0xff] }
 0x2d0   : > { %8341 = vmatprep.subr.mxu1 %v5086_v25  ;;  %8421 = vmatprep.subr.mxu0 %v5370_v22 }
 0x2d1   : > { %8342 = vmatpush3.msra.mxu1 %v5086_v25  ;;  %8422 = vmatpush3.msra.mxu0 %v5370_v22  ;;  %v3209_v25 = vld [vmem:[#allocation2 + $0x190] sm:$0x3]  ;;  %v5083_v22 = vld [vmem:[#allocation3 + $0x308] sm:$0xff] }
 0x2d2   : > { %8225 = vmatmul.mubr.f32.gmra.mxu1 %v12607_v17  ;;  %8308 = vmatmul.mubr.f32.gmra.mxu0 %v11321_v13  ;;  %v4520_v13 = vrot.slane %v11338_v21, 1 }
 0x2d3   : > { %8227 = vmatprep.mubr.f32.mxu1 %v12608_v53  ;;  %8310 = vmatprep.mubr.f32.mxu0 %v11325_v5  ;;  %v4519_v5 = vrot.slane %v11328_v44, 1 }
 0x2d4   : > { %8343 = vmatprep.subr.mxu1 %v5085_v1  ;;  %8423 = vmatprep.subr.mxu0 %v5369_v39 }
 0x2d5   : > { %8344 = vmatpush3.msra.mxu1 %v5085_v1  ;;  %8424 = vmatpush3.msra.mxu0 %v5369_v39  ;;  %v12611_v1 = vld [vmem:[#allocation31_spill] sm:$0xff]  ;;  %v4803_v39 = vrot.slane %v3209_v25, 2 }
 0x2d6   : > { %8228 = vmatmul.mubr.f32.gmra.mxu1 %v12609_v19  ;;  %8311 = vmatmul.mubr.f32.gmra.mxu0 %v11336_v51  ;;  %v11412_v51 = vsel %vm936_vm1, %v4800_v4, %v4801_v20  ;;  %v12615_v4 = vld [vmem:[#allocation33_spill] sm:$0xff] }
 0x2d7   : > { %8230 = vmatprep.mubr.f32.mxu1 %v12610_v50  ;;  %8313 = vmatprep.mubr.f32.mxu0 %v11342_v52  ;;  %12612 = vst [vmem:[#allocation39_spill] sm:$0xff] %v11412_v51  ;;  %v11423_v52 = vsel %vm356_vm0, %v4519_v5, %v4520_v13  ;;  %v11433_v5 = vpop.f32.mrf.mxu0 }
 0x2d8   : > { %8345 = vmatprep.subr.mxu1 %v5084_v48  ;;  %8425 = vmatprep.subr.mxu0 %v5368_v16 }
 0x2d9   : > { %8346 = vmatpush3.msra.mxu1 %v5084_v48  ;;  %8426 = vmatpush3.msra.mxu0 %v5368_v16  ;;  %v11419_v48 = vsel %vm936_vm1, %v4801_v20, %v4803_v39  ;;  %v5662_v16 = vld [vmem:[#allocation3 + $0x478] sm:$0xff] }
 0x2da   : > { %8231 = vmatmul.mubr.f32.gmra.mxu1 %v12611_v1  ;;  %8314 = vmatmul.mubr.f32.gmra.mxu0 %v11349_v12  ;;  %12614 = vst [vmem:[#allocation40_spill] sm:$0xff] %v11419_v48  ;;  %v5366_v12 = vld [vmem:[#allocation3 + $0x380] sm:$0xff] }
 0x2db   : > { %8233 = vmatprep.mubr.f32.mxu1 %v12613_v29  ;;  %8316 = vmatprep.mubr.f32.mxu0 %v11412_v51  ;;  %v4522_v51 = vrot.slane %v3209_v25, 1 }
 0x2dc   : > { %8347 = vmatprep.subr.mxu1 %v5083_v22  ;;  %8427 = vmatprep.subr.mxu0 %v5367_v24 }
 0x2dd   : > { %8348 = vmatpush3.msra.mxu1 %v5083_v22  ;;  %8428 = vmatpush3.msra.mxu0 %v5367_v24  ;;  %v11429_v20 = vsel %vm356_vm0, %v4520_v13, %v4522_v51  ;;  %v8647_v22 = vld [vmem:[#allocation2 + $0x30] sm:$0xff]  ;;  %v5661_v24 = vld [vmem:[#allocation3 + $0x470] sm:$0xff]  ;;  %v8649_v51 = vld [vmem:[#allocation2 + $0x48] sm:$0xff] }
 0x2de   : > { %8234 = vmatmul.mubr.f32.gmra.mxu1 %v12615_v4  ;;  %8317 = vmatmul.mubr.f32.gmra.mxu0 %v11419_v48  ;;  %v8652_v48 = vld [vmem:[#allocation2 + $0x68] sm:$0xff] }
 0x2df   : > { %8236 = vmatprep.mubr.f32.mxu1 %v11423_v52  ;;  %8431 = vmatprep.mubr.f32.mxu0 %v12591_v45  ;;  %v8648_v45 = vld [vmem:[#allocation2 + $0x38] sm:$0xff] }
 0x2e0   : > { %8429 = vmatprep.subr.mxu0 %v5366_v12  ;;  %8349 = vmatprep.subr.mxu1 %v5082_v56 }
 0x2e1   : > { %8430 = vmatpush3.msra.mxu0 %v5366_v12  ;;  %8350 = vmatpush3.msra.mxu1 %v5082_v56  ;;  %v11437_v12 = vpop.f32.mrf.mxu1  ;;  %v5660_v56 = vld [vmem:[#allocation3 + $0x468] sm:$0xff] }
 0x2e2   : > { %8237 = vmatmul.mubr.f32.gmra.mxu1 %v11429_v20  ;;  %8432 = vmatmul.mubr.f32.vlgmr.msra.gmra.mxu0 %v12592_v15 }
 0x2e3   : > { %8351 = vmatprep.mubr.f32.mxu1 %v8647_v22  ;;  %8434 = vmatprep.mubr.f32.mxu0 %v12593_v2  ;;  %v8650_v2 = vld [vmem:[#allocation2 + $0x50] sm:$0xff] }
 0x2e4   : > { %8479 = vmatprep.subr.mxu1 %v5662_v16 }
 0x2e5   : > { %v7956_v13 = vpop.f32.mrf.mxu0 }
 0x2e6   : > { %8352 = vmatmul.mubr.f32.vlgmr.msra.gmra.mxu1 %v8648_v45  ;;  %8435 = vmatmul.mubr.f32.gmra.mxu0 %v12594_v58  ;;  %v8651_v58 = vld [vmem:[#allocation2 + $0x60] sm:$0xff] }
 0x2e7   : > { %8354 = vmatprep.mubr.f32.mxu1 %v8649_v51  ;;  %8480 = vmatpush3.msra.mxu1 %v5662_v16  ;;  %v3707_v15 = vpop.f32.mrf.mxu0 }
 0x2e8   : > { %8437 = vmatprep.mubr.f32.mxu0 %v12595_v36  ;;  %8481 = vmatprep.subr.mxu1 %v5661_v24 }
 0x2e9   : > { %8482 = vmatpush3.msra.mxu1 %v5661_v24  ;;  %v7876_v25 = vpop.f32.mrf.mxu1  ;;  %v7959_v39 = vpop.f32.mrf.mxu0  ;;  %v5659_v24 = vld [vmem:[#allocation3 + $0x460] sm:$0xff] }
 0x2ea   : > { %8355 = vmatmul.mubr.f32.gmra.mxu1 %v8650_v2  ;;  %8438 = vmatmul.mubr.f32.gmra.mxu0 %v12596_v9  ;;  %v11441_v22 = vadd.f32 %v7956_v13, %v7876_v25  ;;  %v8653_v13 = vld [vmem:[#allocation2 + $0x78] sm:$0xff] }
 0x2eb   : > { %8357 = vmatprep.mubr.f32.mxu1 %v8651_v58  ;;  %8440 = vmatprep.mubr.f32.mxu0 %v12597_v42  ;;  %v3482_v16 = vpop.f32.mrf.mxu1  ;;  %v3717_v45 = vpop.f32.mrf.mxu0 }
 0x2ec   : > { %8483 = vmatprep.subr.mxu1 %v5660_v56  ;;  %v11444_v36 = vadd.f32 %v3707_v15, %v3482_v16  ;;  %v5658_v15 = vld [vmem:[#allocation3 + $0x458] sm:$0xff]  ;;  %v8654_v16 = vld [vmem:[#allocation2 + $0x80] sm:$0xff] }
 0x2ed   : > { %8484 = vmatpush3.msra.mxu1 %v5660_v56  ;;  %v7879_v51 = vpop.f32.mrf.mxu1  ;;  %v7962_v2 = vpop.f32.mrf.mxu0 }
 0x2ee   : > { %8358 = vmatmul.mubr.f32.gmra.mxu1 %v8652_v48  ;;  %8441 = vmatmul.mubr.f32.gmra.mxu0 %v12598_v49  ;;  %v11447_v9 = vadd.f32 %v7959_v39, %v7879_v51  ;;  %v8655_v39 = vld [vmem:[#allocation2 + $0x90] sm:$0xff] }
 0x2ef   : > { %8360 = vmatprep.mubr.f32.mxu1 %v8653_v13  ;;  %8443 = vmatprep.mubr.f32.mxu0 %v10925_v61  ;;  %v3492_v42 = vpop.f32.mrf.mxu1  ;;  %v3727_v25 = vpop.f32.mrf.mxu0 }
 0x2f0   : > { %8485 = vmatprep.subr.mxu1 %v5659_v24  ;;  %v11450_v58 = vadd.f32 %v3717_v45, %v3492_v42  ;;  %v5657_v45 = vld [vmem:[#allocation3 + $0x450] sm:$0xff]  ;;  %v8656_v42 = vld [vmem:[#allocation2 + $0x98] sm:$0xff] }
 0x2f1   : > { %8486 = vmatpush3.msra.mxu1 %v5659_v24  ;;  %v7882_v56 = vpop.f32.mrf.mxu1  ;;  %v7965_v48 = vpop.f32.mrf.mxu0 }
 0x2f2   : > { %8361 = vmatmul.mubr.f32.gmra.mxu1 %v8654_v16  ;;  %8444 = vmatmul.mubr.f32.gmra.mxu0 %v12599_v41  ;;  %v11453_v49 = vadd.f32 %v7962_v2, %v7882_v56  ;;  %v8657_v2 = vld [vmem:[#allocation2 + $0xa8] sm:$0xff] }
 0x2f3   : > { %8363 = vmatprep.mubr.f32.mxu1 %v8655_v39  ;;  %8446 = vmatprep.mubr.f32.mxu0 %v10957_v7  ;;  %v3502_v61 = vpop.f32.mrf.mxu1  ;;  %v3737_v51 = vpop.f32.mrf.mxu0 }
 0x2f4   : > { %8487 = vmatprep.subr.mxu1 %v5658_v15  ;;  %v11456_v13 = vadd.f32 %v3727_v25, %v3502_v61  ;;  %v5656_v25 = vld [vmem:[#allocation3 + $0x448] sm:$0xff]  ;;  %v8658_v61 = vld [vmem:[#allocation2 + $0xb0] sm:$0xff] }
 0x2f5   : > { %8488 = vmatpush3.msra.mxu1 %v5658_v15  ;;  %v7885_v24 = vpop.f32.mrf.mxu1 }
 0x2f6   : > { %8364 = vmatmul.mubr.f32.gmra.mxu1 %v8656_v42  ;;  %v7968_v16 = vpop.f32.mrf.mxu0  ;;  %8447 = vmatmul.mubr.f32.gmra.mxu0 %v12600_v18  ;;  %v11459_v41 = vadd.f32 %v7965_v48, %v7885_v24  ;;  %v8659_v48 = vld [vmem:[#allocation2 + $0xc0] sm:$0xff] }
 0x2f7   : > { %8366 = vmatprep.mubr.f32.mxu1 %v8657_v2  ;;  %8449 = vmatprep.mubr.f32.mxu0 %v10988_v27  ;;  %v3512_v7 = vpop.f32.mrf.mxu1 }
 0x2f8   : > { %v3747_v56 = vpop.f32.mrf.mxu0  ;;  %8489 = vmatprep.subr.mxu1 %v5657_v45  ;;  %v11462_v39 = vadd.f32 %v3737_v51, %v3512_v7  ;;  %v5655_v51 = vld [vmem:[#allocation3 + $0x440] sm:$0xff]  ;;  %v8660_v7 = vld [vmem:[#allocation2 + $0xc8] sm:$0xff] }
 0x2f9   : > { %8490 = vmatpush3.msra.mxu1 %v5657_v45  ;;  %v7888_v15 = vpop.f32.mrf.mxu1 }
 0x2fa   : > { %8367 = vmatmul.mubr.f32.gmra.mxu1 %v8658_v61  ;;  %v7971_v42 = vpop.f32.mrf.mxu0  ;;  %8450 = vmatmul.mubr.f32.gmra.mxu0 %v12601_v59  ;;  %v11465_v18 = vadd.f32 %v7968_v16, %v7888_v15  ;;  %v8661_v16 = vld [vmem:[#allocation2 + $0xd8] sm:$0xff] }
 0x2fb   : > { %8369 = vmatprep.mubr.f32.mxu1 %v8659_v48  ;;  %8452 = vmatprep.mubr.f32.mxu0 %v11017_v28  ;;  %v3522_v27 = vpop.f32.mrf.mxu1 }
 0x2fc   : > { %v3757_v24 = vpop.f32.mrf.mxu0  ;;  %8491 = vmatprep.subr.mxu1 %v5656_v25  ;;  %v11468_v2 = vadd.f32 %v3747_v56, %v3522_v27  ;;  %v5654_v56 = vld [vmem:[#allocation3 + $0x438] sm:$0xff]  ;;  %v8662_v27 = vld [vmem:[#allocation2 + $0xe0] sm:$0xff] }
 0x2fd   : > { %8492 = vmatpush3.msra.mxu1 %v5656_v25  ;;  %v7891_v45 = vpop.f32.mrf.mxu1 }
 0x2fe   : > { %8370 = vmatmul.mubr.f32.gmra.mxu1 %v8660_v7  ;;  %v7974_v61 = vpop.f32.mrf.mxu0  ;;  %8453 = vmatmul.mubr.f32.gmra.mxu0 %v12602_v43  ;;  %v11471_v59 = vadd.f32 %v7971_v42, %v7891_v45  ;;  %v8663_v42 = vld [vmem:[#allocation2 + $0xf0] sm:$0xff] }
 0x2ff   : > { %8372 = vmatprep.mubr.f32.mxu1 %v8661_v16  ;;  %8455 = vmatprep.mubr.f32.mxu0 %v11042_v30  ;;  %v3532_v28 = vpop.f32.mrf.mxu1 }
 0x300   : > { %v3767_v15 = vpop.f32.mrf.mxu0  ;;  %8493 = vmatprep.subr.mxu1 %v5655_v51  ;;  %v11474_v48 = vadd.f32 %v3757_v24, %v3532_v28  ;;  %v5653_v24 = vld [vmem:[#allocation3 + $0x430] sm:$0xff]  ;;  %v8664_v28 = vld [vmem:[#allocation2 + $0xf8] sm:$0xff] }
 0x301   : > { %8494 = vmatpush3.msra.mxu1 %v5655_v51  ;;  %v7894_v25 = vpop.f32.mrf.mxu1 }
 0x302   : > { %8373 = vmatmul.mubr.f32.gmra.mxu1 %v8662_v27  ;;  %v7977_v7 = vpop.f32.mrf.mxu0  ;;  %8456 = vmatmul.mubr.f32.gmra.mxu0 %v12603_v3  ;;  %v11477_v43 = vadd.f32 %v7974_v61, %v7894_v25  ;;  %v8665_v61 = vld [vmem:[#allocation2 + $0x108] sm:$0xff] }
 0x303   : > { %8375 = vmatprep.mubr.f32.mxu1 %v8663_v42  ;;  %8458 = vmatprep.mubr.f32.mxu0 %v12604_v35  ;;  %v3542_v30 = vpop.f32.mrf.mxu1 }
 0x304   : > { %v3777_v45 = vpop.f32.mrf.mxu0  ;;  %8495 = vmatprep.subr.mxu1 %v5654_v56  ;;  %v11480_v16 = vadd.f32 %v3767_v15, %v3542_v30  ;;  %v5652_v15 = vld [vmem:[#allocation3 + $0x428] sm:$0xff]  ;;  %v8666_v30 = vld [vmem:[#allocation2 + $0x110] sm:$0xff] }
 0x305   : > { %8496 = vmatpush3.msra.mxu1 %v5654_v56  ;;  %v7897_v51 = vpop.f32.mrf.mxu1 }
 0x306   : > { %8376 = vmatmul.mubr.f32.gmra.mxu1 %v8664_v28  ;;  %v7980_v27 = vpop.f32.mrf.mxu0  ;;  %8459 = vmatmul.mubr.f32.gmra.mxu0 %v12605_v10  ;;  %v11483_v3 = vadd.f32 %v7977_v7, %v7897_v51  ;;  %v8667_v7 = vld [vmem:[#allocation2 + $0x120] sm:$0xff] }
 0x307   : > { %8378 = vmatprep.mubr.f32.mxu1 %v8665_v61  ;;  %8461 = vmatprep.mubr.f32.mxu0 %v12606_v34  ;;  %v3552_v35 = vpop.f32.mrf.mxu1 }
 0x308   : > { %v3787_v25 = vpop.f32.mrf.mxu0  ;;  %8497 = vmatprep.subr.mxu1 %v5653_v24  ;;  %v11486_v42 = vadd.f32 %v3777_v45, %v3552_v35  ;;  %v5651_v45 = vld [vmem:[#allocation3 + $0x420] sm:$0xff]  ;;  %v8668_v35 = vld [vmem:[#allocation2 + $0x128] sm:$0xff] }
 0x309   : > { %8498 = vmatpush3.msra.mxu1 %v5653_v24  ;;  %v7900_v56 = vpop.f32.mrf.mxu1 }
 0x30a   : > { %8379 = vmatmul.mubr.f32.gmra.mxu1 %v8666_v30  ;;  %v7983_v28 = vpop.f32.mrf.mxu0  ;;  %8462 = vmatmul.mubr.f32.gmra.mxu0 %v12607_v17  ;;  %v11489_v10 = vadd.f32 %v7980_v27, %v7900_v56  ;;  %v8669_v27 = vld [vmem:[#allocation2 + $0x138] sm:$0xff] }
 0x30b   : > { %8381 = vmatprep.mubr.f32.mxu1 %v8667_v7  ;;  %8464 = vmatprep.mubr.f32.mxu0 %v12608_v53  ;;  %v3562_v34 = vpop.f32.mrf.mxu1 }
 0x30c   : > { %v3797_v51 = vpop.f32.mrf.mxu0  ;;  %8499 = vmatprep.subr.mxu1 %v5652_v15  ;;  %v11492_v61 = vadd.f32 %v3787_v25, %v3562_v34  ;;  %v5650_v25 = vld [vmem:[#allocation3 + $0x418] sm:$0xff]  ;;  %v8670_v34 = vld [vmem:[#allocation2 + $0x140] sm:$0xff] }
 0x30d   : > { %8500 = vmatpush3.msra.mxu1 %v5652_v15  ;;  %v7903_v24 = vpop.f32.mrf.mxu1 }
 0x30e   : > { %8382 = vmatmul.mubr.f32.gmra.mxu1 %v8668_v35  ;;  %v7986_v30 = vpop.f32.mrf.mxu0  ;;  %8465 = vmatmul.mubr.f32.gmra.mxu0 %v12609_v19  ;;  %v11495_v17 = vadd.f32 %v7983_v28, %v7903_v24  ;;  %v8671_v28 = vld [vmem:[#allocation2 + $0x150] sm:$0xff] }
 0x30f   : > { %8384 = vmatprep.mubr.f32.mxu1 %v8669_v27  ;;  %8467 = vmatprep.mubr.f32.mxu0 %v12610_v50  ;;  %v3572_v53 = vpop.f32.mrf.mxu1  ;;  %v11504_v27 = vld [vmem:[#allocation2 + $0x1a8] sm:$0x3] }
 0x310   : > { %12616 = vst [vmem:[#allocation43_spill] sm:$0xff] %v11495_v17  ;;  %v3807_v56 = vpop.f32.mrf.mxu0  ;;  %8501 = vmatprep.subr.mxu1 %v5651_v45  ;;  %v11498_v7 = vadd.f32 %v3797_v51, %v3572_v53  ;;  %v11508_v53 = vld [vmem:[#allocation2] sm:$0xff] }
 0x311   : > { %8502 = vmatpush3.msra.mxu1 %v5651_v45  ;;  %v7906_v15 = vpop.f32.mrf.mxu1  ;;  %v5649_v45 = vld [vmem:[#allocation3 + $0x410] sm:$0xff] }
 0x312   : > { %12617 = vst [vmem:[#allocation80_spill] sm:$0xff] %v11498_v7  ;;  %8385 = vmatmul.mubr.f32.gmra.mxu1 %v8670_v34  ;;  %v7989_v35 = vpop.f32.mrf.mxu0  ;;  %8468 = vmatmul.mubr.f32.gmra.mxu0 %v12611_v1  ;;  %v11501_v19 = vadd.f32 %v7986_v30, %v7906_v15  ;;  %v5358_v34 = vrot.slane %v11508_v53, 1  ;;  %v8673_v30 = vld [vmem:[#allocation2 + $0x158] sm:$0xff] }
 0x313   : > { %8387 = vmatprep.mubr.f32.mxu1 %v8671_v28  ;;  %8470 = vmatprep.mubr.f32.mxu0 %v12613_v29  ;;  %v3582_v50 = vpop.f32.mrf.mxu1  ;;  %v8674_v28 = vld [vmem:[#allocation2 + $0x168] sm:$0xff] }
 0x314   : > { %12618 = vst [vmem:[#allocation79_spill] sm:$0xff] %v11501_v19  ;;  %v3817_v24 = vpop.f32.mrf.mxu0  ;;  %8503 = vmatprep.subr.mxu1 %v5650_v25  ;;  %v11506_v51 = vadd.f32 %v3807_v56, %v3582_v50  ;;  %v5361_v56 = vrot.slane %v11504_v27, 1 }
 0x315   : > { %8504 = vmatpush3.msra.mxu1 %v5650_v25  ;;  %v7909_v1 = vpop.f32.mrf.mxu1 }
 0x316   : > { %12619 = vst [vmem:[#allocation10_spill] sm:$0xff] %v11506_v51  ;;  %8388 = vmatmul.mubr.f32.gmra.mxu1 %v8673_v30  ;;  %v7992_v15 = vpop.f32.mrf.mxu0  ;;  %8471 = vmatmul.mubr.f32.gmra.mxu0 %v12615_v4  ;;  %v11512_v29 = vadd.f32 %v7989_v35, %v7909_v1  ;;  %v5648_v51 = vld [vmem:[#allocation3 + $0x408] sm:$0xff]  ;;  %v8675_v30 = vld [vmem:[#allocation2 + $0x170] sm:$0xff] }
 0x317   : > { %8390 = vmatprep.mubr.f32.mxu1 %v8674_v28  ;;  %8473 = vmatprep.mubr.f32.mxu0 %v11423_v52  ;;  %v3592_v25 = vpop.f32.mrf.mxu1  ;;  %v5647_v4 = vld [vmem:[#allocation3 + $0x400] sm:$0xff]  ;;  %v5362_v52 = vsel %vm356_vm0, %v5358_v34, %v5361_v56 }
 0x318   : > { %v3827_v50 = vpop.f32.mrf.mxu0  ;;  %8505 = vmatprep.subr.mxu1 %v5649_v45  ;;  %v11516_v19 = vadd.f32 %v3817_v24, %v3592_v25 }
 0x319   : > { %8506 = vmatpush3.msra.mxu1 %v5649_v45  ;;  %v7912_v7 = vpop.f32.mrf.mxu1 }
 0x31a   : > { %8391 = vmatmul.mubr.f32.gmra.mxu1 %v8675_v30  ;;  %v7995_v17 = vpop.f32.mrf.mxu0  ;;  %8474 = vmatmul.mubr.f32.gmra.mxu0 %v11429_v20  ;;  %v11519_v35 = vadd.f32 %v7992_v15, %v7912_v7 }
 0x31b   : > { %8393 = vmatprep.mubr.f32.mxu1 %v11328_v44  ;;  %8507 = vmatprep.subr.mxu1 %v5648_v51  ;;  %v3602_v1 = vpop.f32.mrf.mxu1 }
 0x31c   : > { %v3837_v28 = vpop.f32.mrf.mxu0  ;;  %8508 = vmatpush3.msra.mxu1 %v5648_v51  ;;  %8476 = vmatprep.mubr.f32.mxu0 %v5358_v34  ;;  %v11523_v24 = vadd.f32 %v3827_v50, %v3602_v1 }
 0x31d   : > { %8509 = vmatprep.subr.mxu1 %v5647_v4  ;;  %v7915_v45 = vpop.f32.mrf.mxu1 }
 0x31e   : > { %8394 = vmatmul.mubr.f32.gmra.mxu1 %v11338_v21  ;;  %v7998_v25 = vpop.f32.mrf.mxu0  ;;  %8477 = vmatmul.mubr.f32.gmra.mxu0 %v5362_v52  ;;  %v11526_v20 = vadd.f32 %v7995_v17, %v7915_v45  ;;  %v3698_v52 = vadd.f32 %v11433_v5, %v11437_v12 }
 0x31f   : > { %8396 = vmatprep.mubr.f32.mxu1 %v11508_v53  ;;  %8510 = vmatpush3.msra.mxu1 %v5647_v4  ;;  %v3612_v44 = vpop.f32.mrf.mxu1 }
 0x320   : > { %v3847_v7 = vpop.f32.mrf.mxu0  ;;  %v11529_v15 = vadd.f32 %v3837_v28, %v3612_v44 }
 0x321   : > { %v7918_v56 = vpop.f32.mrf.mxu1 }
 0x322   : > { %8397 = vmatmul.mubr.f32.gmra.mxu1 %v11508_v53  ;;  %v8113_v51 = vpop.f32.mrf.mxu0  ;;  %v11532_v34 = vadd.f32 %v7998_v25, %v7918_v56 }
 0x323   : > { %8511 = vmatprep.mubr.f32.mxu1 %v11169_v40  ;;  %v3622_v21 = vpop.f32.mrf.mxu1 }
 0x324   : > { %v4325_v50 = vpop.f32.mrf.mxu0  ;;  %v11535_v30 = vadd.f32 %v3847_v7, %v3622_v21 }
 0x325   : > { %v8033_v17 = vpop.f32.mrf.mxu1 }
 0x326   : > { %8512 = vmatmul.mubr.f32.vlgmr.msra.gmra.mxu1 %v11178_v37  ;;  %v8116_v4 = vpop.f32.mrf.mxu0  ;;  %v4211_v1 = vadd.f32 %v8033_v17, %v11153_v33 }
 0x327   : > { %8514 = vmatprep.mubr.f32.mxu1 %v11182_v60  ;;  %v4051_v28 = vpop.f32.mrf.mxu1 }
 0x328   : > { %v4335_v45 = vpop.f32.mrf.mxu0  ;;  %v4210_v25 = vadd.f32 %v4051_v28, %v3698_v52  ;;  %v11542_v44 = vadd.f32 %v8113_v51, %v4211_v1 }
 0x32a   : > { %v8036_v40 = vpop.f32.mrf.mxu1  ;;  %8515 = vmatmul.mubr.f32.gmra.mxu1 %v11191_v54  ;;  %v8119_v7 = vpop.f32.mrf.mxu0  ;;  %v11547_v37 = vadd.f32 %v4325_v50, %v4210_v25 }
 0x32b   : > { %v4213_v56 = vadd.f32 %v8036_v40, %v11441_v22  ;;  %8517 = vmatprep.mubr.f32.mxu1 %v11195_v46 }
 0x32c   : > { %v4061_v5 = vpop.f32.mrf.mxu1  ;;  %v4345_v12 = vpop.f32.mrf.mxu0 }
 0x32d   : > { %v4212_v33 = vadd.f32 %v4061_v5, %v11444_v36  ;;  %v11550_v60 = vadd.f32 %v8116_v4, %v4213_v56 }
 0x32e   : > { %v8039_v21 = vpop.f32.mrf.mxu1  ;;  %8518 = vmatmul.mubr.f32.gmra.mxu1 %v11204_v55  ;;  %v8122_v51 = vpop.f32.mrf.mxu0 }
 0x32f   : > { %v4215_v17 = vadd.f32 %v8039_v21, %v11447_v9  ;;  %8520 = vmatprep.mubr.f32.mxu1 %v11208_v11  ;;  %v11555_v54 = vadd.f32 %v4335_v45, %v4212_v33 }
 0x330   : > { %v4071_v22 = vpop.f32.mrf.mxu1  ;;  %v4355_v46 = vpop.f32.mrf.mxu0 }
 0x331   : > { %v4214_v50 = vadd.f32 %v4071_v22, %v11450_v58  ;;  %v11558_v52 = vadd.f32 %v8119_v7, %v4215_v17 }
 0x332   : > { %v8042_v1 = vpop.f32.mrf.mxu1  ;;  %8521 = vmatmul.mubr.f32.gmra.mxu1 %v11217_v63  ;;  %v8125_v36 = vpop.f32.mrf.mxu0 }
 0x333   : > { %v4217_v4 = vadd.f32 %v8042_v1, %v11453_v49  ;;  %8523 = vmatprep.mubr.f32.mxu1 %v11221_v0  ;;  %v11563_v55 = vadd.f32 %v4345_v12, %v4214_v50 }
 0x334   : > { %v4081_v9 = vpop.f32.mrf.mxu1  ;;  %v4365_v11 = vpop.f32.mrf.mxu0 }
 0x335   : > { %v4216_v28 = vadd.f32 %v4081_v9, %v11456_v13  ;;  %v11566_v45 = vadd.f32 %v8122_v51, %v4217_v4 }
 0x336   : > { %v8045_v25 = vpop.f32.mrf.mxu1  ;;  %8524 = vmatmul.mubr.f32.gmra.mxu1 %v11230_v32  ;;  %v8128_v58 = vpop.f32.mrf.mxu0 }
 0x337   : > { %v4219_v40 = vadd.f32 %v8045_v25, %v11459_v41  ;;  %8526 = vmatprep.mubr.f32.mxu1 %v11234_v47  ;;  %v11571_v63 = vadd.f32 %v4355_v46, %v4216_v28 }
 0x338   : > { %v4091_v49 = vpop.f32.mrf.mxu1  ;;  %v4375_v0 = vpop.f32.mrf.mxu0 }
 0x339   : > { %v4218_v7 = vadd.f32 %v4091_v49, %v11462_v39  ;;  %v11574_v56 = vadd.f32 %v8125_v36, %v4219_v40 }
 0x33a   : > { %v8048_v5 = vpop.f32.mrf.mxu1  ;;  %8527 = vmatmul.mubr.f32.gmra.mxu1 %v11243_v23  ;;  %v8131_v13 = vpop.f32.mrf.mxu0 }
 0x33b   : > { %v4221_v12 = vadd.f32 %v8048_v5, %v11465_v18  ;;  %8529 = vmatprep.mubr.f32.mxu1 %v11247_v8  ;;  %v11579_v32 = vadd.f32 %v4365_v11, %v4218_v7 }
 0x33c   : > { %v4101_v41 = vpop.f32.mrf.mxu1  ;;  %v4385_v47 = vpop.f32.mrf.mxu0 }
 0x33d   : > { %v4220_v33 = vadd.f32 %v4101_v41, %v11468_v2  ;;  %v11582_v21 = vadd.f32 %v8128_v58, %v4221_v12  ;;  %v12622_v12 = vld [vmem:[#allocation43_spill] sm:$0xff] }
 0x33e   : > { %v8051_v51 = vpop.f32.mrf.mxu1  ;;  %8530 = vmatmul.mubr.f32.gmra.mxu1 %v11256_v26  ;;  %v8134_v39 = vpop.f32.mrf.mxu0 }
 0x33f   : > { %v4223_v17 = vadd.f32 %v8051_v51, %v11471_v59  ;;  %8532 = vmatprep.mubr.f32.mxu1 %v11260_v31  ;;  %v11587_v23 = vadd.f32 %v4375_v0, %v4220_v33  ;;  %v12624_v51 = vld [vmem:[#allocation80_spill] sm:$0xff] }
 0x340   : > { %v4111_v18 = vpop.f32.mrf.mxu1  ;;  %v4395_v8 = vpop.f32.mrf.mxu0 }
 0x341   : > { %v4222_v22 = vadd.f32 %v4111_v18, %v11474_v48  ;;  %v11590_v46 = vadd.f32 %v8131_v13, %v4223_v17 }
 0x342   : > { %v8054_v50 = vpop.f32.mrf.mxu1  ;;  %8533 = vmatmul.mubr.f32.gmra.mxu1 %v11269_v62  ;;  %v8137_v2 = vpop.f32.mrf.mxu0 }
 0x343   : > { %v4225_v1 = vadd.f32 %v8054_v50, %v11477_v43  ;;  %8535 = vmatprep.mubr.f32.mxu1 %v11273_v14  ;;  %v11595_v26 = vadd.f32 %v4385_v47, %v4222_v22  ;;  %v12626_v22 = vld [vmem:[#allocation79_spill] sm:$0xff] }
 0x344   : > { %v4121_v59 = vpop.f32.mrf.mxu1  ;;  %v4405_v31 = vpop.f32.mrf.mxu0 }
 0x345   : > { %v4224_v36 = vadd.f32 %v4121_v59, %v11480_v16  ;;  %v11598_v4 = vadd.f32 %v8134_v39, %v4225_v1 }
 0x346   : > { %v8057_v9 = vpop.f32.mrf.mxu1  ;;  %8536 = vmatmul.mubr.f32.gmra.mxu1 %v11282_v6  ;;  %v8140_v48 = vpop.f32.mrf.mxu0  ;;  %v12620_v6 = vld [vmem:[#allocation34_spill] sm:$0xff] }
 0x347   : > { %v4227_v11 = vadd.f32 %v8057_v9, %v11483_v3  ;;  %8538 = vmatprep.mubr.f32.mxu1 %v11286_v38  ;;  %v11603_v62 = vadd.f32 %v4395_v8, %v4224_v36  ;;  %v12628_v36 = vld [vmem:[#allocation10_spill] sm:$0xff] }
 0x348   : > { %v4131_v43 = vpop.f32.mrf.mxu1  ;;  %v4415_v14 = vpop.f32.mrf.mxu0 }
 0x349   : > { %v4226_v28 = vadd.f32 %v4131_v43, %v11486_v42  ;;  %v11606_v25 = vadd.f32 %v8137_v2, %v4227_v11  ;;  %v12621_v42 = vld [vmem:[#allocation35_spill] sm:$0xff]  ;;  %v12627_v2 = vld [vmem:[#allocation36_spill] sm:$0xff]  ;;  %v12629_v43 = vld [vmem:[#allocation37_spill] sm:$0xff] }
 0x34a   : > { %v8060_v58 = vpop.f32.mrf.mxu1  ;;  %8539 = vmatmul.mubr.f32.gmra.mxu1 %v11295_v57  ;;  %v8143_v16 = vpop.f32.mrf.mxu0  ;;  %v12623_v57 = vld [vmem:[#allocation9_spill] sm:$0xff] }
 0x34b   : > { %v4229_v40 = vadd.f32 %v8060_v58, %v11489_v10  ;;  %8541 = vmatprep.mubr.f32.mxu1 %v12620_v6  ;;  %v11611_v49 = vadd.f32 %v4405_v31, %v4226_v28  ;;  %v12630_v58 = vld [vmem:[#allocation77_spill] sm:$0xff] }
 0x34c   : > { %v4141_v3 = vpop.f32.mrf.mxu1  ;;  %v4425_v38 = vpop.f32.mrf.mxu0 }
 0x34d   : > { %v4228_v0 = vadd.f32 %v4141_v3, %v11492_v61  ;;  %v11614_v7 = vadd.f32 %v8140_v48, %v4229_v40  ;;  %v12625_v61 = vld [vmem:[#allocation78_spill] sm:$0xff]  ;;  %v5639_v40 = vrot.slane %v11508_v53, 2 }
 0x34e   : > { %v8063_v5 = vpop.f32.mrf.mxu1  ;;  %8542 = vmatmul.mubr.f32.gmra.mxu1 %v12621_v42  ;;  %v8146_v13 = vpop.f32.mrf.mxu0  ;;  %v12631_v42 = vld [vmem:[#allocation38_spill] sm:$0xff] }
 0x34f   : > { %v4231_v41 = vadd.f32 %v8063_v5, %v12622_v12  ;;  %8544 = vmatprep.mubr.f32.mxu1 %v12623_v57  ;;  %v11619_v47 = vadd.f32 %v4415_v14, %v4228_v0 }
 0x350   : > { %v4151_v10 = vpop.f32.mrf.mxu1  ;;  %v4435_v33 = vpop.f32.mrf.mxu0 }
 0x351   : > { %v4230_v39 = vadd.f32 %v4151_v10, %v12624_v51  ;;  %v11622_v17 = vadd.f32 %v8143_v16, %v4231_v41  ;;  %v12632_v41 = vld [vmem:[#allocation39_spill] sm:$0xff] }
 0x352   : > { %v8066_v18 = vpop.f32.mrf.mxu1  ;;  %8545 = vmatmul.mubr.f32.gmra.mxu1 %v12625_v61  ;;  %v8149_v8 = vpop.f32.mrf.mxu0 }
 0x353   : > { %v4233_v50 = vadd.f32 %v8066_v18, %v12626_v22  ;;  %8547 = vmatprep.mubr.f32.mxu1 %v12627_v2  ;;  %v11627_v1 = vadd.f32 %v4425_v38, %v4230_v39  ;;  %v12633_v39 = vld [vmem:[#allocation40_spill] sm:$0xff] }
 0x354   : > { %v4161_v59 = vpop.f32.mrf.mxu1  ;;  %v4445_v31 = vpop.f32.mrf.mxu0 }
 0x355   : > { %v4232_v9 = vadd.f32 %v4161_v59, %v12628_v36  ;;  %v11630_v48 = vadd.f32 %v8146_v13, %v4233_v50 }
 0x356   : > { %v8069_v11 = vpop.f32.mrf.mxu1  ;;  %8548 = vmatmul.mubr.f32.gmra.mxu1 %v12629_v43  ;;  %v8152_v14 = vpop.f32.mrf.mxu0 }
 0x357   : > { %v4235_v28 = vadd.f32 %v8069_v11, %v11512_v29  ;;  %8550 = vmatprep.mubr.f32.mxu1 %v12630_v58  ;;  %v11635_v16 = vadd.f32 %v4435_v33, %v4232_v9  ;;  %v5642_v29 = vrot.slane %v11504_v27, 2 }
 0x358   : > { %v4171_v6 = vpop.f32.mrf.mxu1  ;;  %v4455_v3 = vpop.f32.mrf.mxu0 }
 0x359   : > { %v4234_v38 = vadd.f32 %v4171_v6, %v11516_v19  ;;  %v11639_v0 = vadd.f32 %v8149_v8, %v4235_v28 }
 0x35a   : > { %v8072_v5 = vpop.f32.mrf.mxu1  ;;  %8551 = vmatmul.mubr.f32.gmra.mxu1 %v12631_v42  ;;  %v8155_v13 = vpop.f32.mrf.mxu0 }
 0x35b   : > { %v4237_v12 = vadd.f32 %v8072_v5, %v11519_v35  ;;  %8553 = vmatprep.mubr.f32.mxu1 %v12632_v41  ;;  %v11645_v57 = vadd.f32 %v4445_v31, %v4234_v38  ;;  %v5643_v35 = vsel %vm936_vm1, %v5639_v40, %v5642_v29 }
 0x35c   : > { %v4181_v10 = vpop.f32.mrf.mxu1  ;;  %v4465_v53 = vpop.f32.mrf.mxu0 }
 0x35d   : > { %v4236_v33 = vadd.f32 %v4181_v10, %v11523_v24  ;;  %v11648_v51 = vadd.f32 %v8152_v14, %v4237_v12 }
 0x35e   : > { %v8075_v19 = vpop.f32.mrf.mxu1  ;;  %8554 = vmatmul.mubr.f32.gmra.mxu1 %v12633_v39  ;;  %v8158_v18 = vpop.f32.mrf.mxu0 }
 0x35f   : > { %v4239_v61 = vadd.f32 %v8075_v19, %v11526_v20  ;;  %8556 = vmatprep.mubr.f32.mxu1 %v5639_v40  ;;  %v11653_v8 = vadd.f32 %v4455_v3, %v4236_v33 }
 0x360   : > { %v4191_v27 = vpop.f32.mrf.mxu1  ;;  %v4475_v22 = vpop.f32.mrf.mxu0 }
 0x361   : > { %v4238_v50 = vadd.f32 %v4191_v27, %v11529_v15  ;;  %v11656_v2 = vadd.f32 %v8155_v13, %v4239_v61 }
 0x362   : > { %v8078_v24 = vpop.f32.mrf.mxu1  ;;  %8557 = vmatmul.mubr.f32.gmra.mxu1 %v5643_v35  ;;  %v11658_v59 = vpop.f32.mrf.mxu0 }
 0x363   : > { %v4241_v31 = vadd.f32 %v8078_v24, %v11532_v34  ;;  %v11661_v36 = vadd.f32 %v4465_v53, %v4238_v50 }
 0x364   : > { %v4201_v20 = vpop.f32.mrf.mxu1  ;;  %v11663_v9 = vpop.f32.mrf.mxu0 }
 0x365   : > { %v4240_v11 = vadd.f32 %v4201_v20, %v11535_v30  ;;  %v11666_v43 = vadd.f32 %v8158_v18, %v4241_v31 }
 0x366   : > { %v8193_v14 = vpop.f32.mrf.mxu1  ;;  %v11668_v28 = vpop.f32.mrf.mxu0 }
 0x367   : > { %v11671_v15 = vadd.f32 %v8193_v14, %v11542_v44  ;;  %v11673_v58 = vadd.f32 %v4475_v22, %v4240_v11 }
 0x368   : > { %v4609_v40 = vpop.f32.mrf.mxu1  ;;  %v11675_v6 = vpop.f32.mrf.mxu0 }
 0x369   : > { %v11678_v34 = vadd.f32 %v4609_v40, %v11547_v37 }
 0x36a   : > { %v8196_v3 = vpop.f32.mrf.mxu1  ;;  %v11680_v38 = vpop.f32.mrf.mxu0 }
 0x36b   : > { %v11683_v30 = vadd.f32 %v8196_v3, %v11550_v60 }
 0x36c   : > { %v4619_v5 = vpop.f32.mrf.mxu1  ;;  %v11685_v42 = vpop.f32.mrf.mxu0 }
 0x36d   : > { %v11688_v44 = vadd.f32 %v4619_v5, %v11555_v54 }
 0x36e   : > { %v8199_v13 = vpop.f32.mrf.mxu1  ;;  %v11690_v12 = vpop.f32.mrf.mxu0 }
 0x36f   : > { %v11693_v41 = vadd.f32 %v8199_v13, %v11558_v52 }
 0x370   : > { %v4629_v37 = vpop.f32.mrf.mxu1  ;;  %v11695_v29 = vpop.f32.mrf.mxu0 }
 0x371   : > { %v11698_v10 = vadd.f32 %v4629_v37, %v11563_v55 }
 0x372   : > { %v8202_v60 = vpop.f32.mrf.mxu1  ;;  %v11700_v53 = vpop.f32.mrf.mxu0 }
 0x373   : > { %v11703_v33 = vadd.f32 %v8202_v60, %v11566_v45 }
 0x374   : > { %v4639_v54 = vpop.f32.mrf.mxu1  ;;  %v11705_v19 = vpop.f32.mrf.mxu0 }
 0x375   : > { %v11708_v39 = vadd.f32 %v4639_v54, %v11571_v63 }
 0x376   : > { %v8205_v52 = vpop.f32.mrf.mxu1  ;;  %v11710_v18 = vpop.f32.mrf.mxu0 }
 0x377   : > { %v11713_v61 = vadd.f32 %v8205_v52, %v11574_v56 }
 0x378   : > { %v4649_v55 = vpop.f32.mrf.mxu1  ;;  %v11715_v35 = vpop.f32.mrf.mxu0 }
 0x379   : > { %v11718_v27 = vadd.f32 %v4649_v55, %v11579_v32 }
 0x37a   : > { %v8208_v45 = vpop.f32.mrf.mxu1  ;;  %v11720_v22 = vpop.f32.mrf.mxu0 }
 0x37b   : > { %v11723_v50 = vadd.f32 %v8208_v45, %v11582_v21 }
 0x37c   : > { %v4659_v63 = vpop.f32.mrf.mxu1  ;;  %v11725_v24 = vpop.f32.mrf.mxu0 }
 0x37d   : > { %v11728_v31 = vadd.f32 %v4659_v63, %v11587_v23 }
 0x37e   : > { %v8211_v56 = vpop.f32.mrf.mxu1  ;;  %v11730_v20 = vpop.f32.mrf.mxu0 }
 0x37f   : > { %12634 = vst [vmem:[#allocation41_spill] sm:$0xff] %v11730_v20  ;;  %v11733_v11 = vadd.f32 %v8211_v56, %v11590_v46 }
 0x380   : > { %v4669_v32 = vpop.f32.mrf.mxu1  ;;  %v11735_v14 = vpop.f32.mrf.mxu0 }
 0x381   : > { %12635 = vst [vmem:[#allocation42_spill] sm:$0xff] %v11735_v14  ;;  %v11738_v40 = vadd.f32 %v4669_v32, %v11595_v26 }
 0x382   : > { %v8214_v21 = vpop.f32.mrf.mxu1  ;;  %v11740_v3 = vpop.f32.mrf.mxu0 }
 0x383   : > { %12636 = vst [vmem:[#allocation47_spill] sm:$0xff] %v11740_v3  ;;  %v11743_v5 = vadd.f32 %v8214_v21, %v11598_v4 }
 0x384   : > { %v4679_v23 = vpop.f32.mrf.mxu1  ;;  %v11745_v13 = vpop.f32.mrf.mxu0 }
 0x385   : > { %12637 = vst [vmem:[#allocation82_spill] sm:$0xff] %v11745_v13  ;;  %v11748_v37 = vadd.f32 %v4679_v23, %v11603_v62 }
 0x386   : > { %v8217_v46 = vpop.f32.mrf.mxu1  ;;  %v11750_v60 = vpop.f32.mrf.mxu0 }
 0x387   : > { %12638 = vst [vmem:[#allocation81_spill] sm:$0xff] %v11748_v37  ;;  %12639 = vst [vmem:[#allocation44_spill] sm:$0xff] %v11750_v60  ;;  %v11753_v54 = vadd.f32 %v8217_v46, %v11606_v25 }
 0x388   : > { %v4689_v26 = vpop.f32.mrf.mxu1  ;;  %v11755_v52 = vpop.f32.mrf.mxu0 }
 0x389   : > { %12640 = vst [vmem:[#allocation45_spill] sm:$0xff] %v11753_v54  ;;  %12641 = vst [vmem:[#allocation46_spill] sm:$0xff] %v11755_v52  ;;  %v11758_v55 = vadd.f32 %v4689_v26, %v11611_v49 }
 0x38a   : > { %v8220_v4 = vpop.f32.mrf.mxu1  ;;  %v11760_v45 = vpop.f32.mrf.mxu0 }
 0x38b   : > { %12642 = vst [vmem:[#allocation51_spill] sm:$0xff] %v11758_v55  ;;  %12643 = vst [vmem:[#allocation85_spill] sm:$0xff] %v11760_v45  ;;  %v11763_v63 = vadd.f32 %v8220_v4, %v11614_v7 }
 0x38c   : > { %v4699_v62 = vpop.f32.mrf.mxu1  ;;  %v11765_v56 = vpop.f32.mrf.mxu0 }
 0x38d   : > { %12644 = vst [vmem:[#allocation83_spill] sm:$0xff] %v11763_v63  ;;  %12645 = vst [vmem:[#allocation48_spill] sm:$0xff] %v11765_v56  ;;  %v11768_v32 = vadd.f32 %v4699_v62, %v11619_v47 }
 0x38e   : > { %v8223_v25 = vpop.f32.mrf.mxu1  ;;  %v11770_v21 = vpop.f32.mrf.mxu0 }
 0x38f   : > { %12646 = vst [vmem:[#allocation49_spill] sm:$0xff] %v11768_v32  ;;  %12647 = vst [vmem:[#allocation50_spill] sm:$0xff] %v11770_v21  ;;  %v11773_v23 = vadd.f32 %v8223_v25, %v11622_v17 }
 0x390   : > { %v4709_v49 = vpop.f32.mrf.mxu1  ;;  %v11775_v46 = vpop.f32.mrf.mxu0 }
 0x391   : > { %12648 = vst [vmem:[#allocation55_spill] sm:$0xff] %v11773_v23  ;;  %12649 = vst [vmem:[#allocation84_spill] sm:$0xff] %v11775_v46  ;;  %v11778_v26 = vadd.f32 %v4709_v49, %v11627_v1 }
 0x392   : > { %v8226_v7 = vpop.f32.mrf.mxu1  ;;  %v11780_v4 = vpop.f32.mrf.mxu0 }
 0x393   : > { %12650 = vst [vmem:[#allocation88_spill] sm:$0xff] %v11778_v26  ;;  %12651 = vst [vmem:[#allocation52_spill] sm:$0xff] %v11780_v4  ;;  %v11783_v56 = vadd.f32 %v8226_v7, %v11630_v48 }
 0x394   : > { %v4719_v47 = vpop.f32.mrf.mxu1  ;;  %v11785_v62 = vpop.f32.mrf.mxu0 }
 0x395   : > { %12652 = vst [vmem:[#allocation53_spill] sm:$0xff] %v11783_v56  ;;  %12653 = vst [vmem:[#allocation54_spill] sm:$0xff] %v11785_v62  ;;  %v11788_v21 = vadd.f32 %v4719_v47, %v11635_v16 }
 0x396   : > { %v8229_v17 = vpop.f32.mrf.mxu1  ;;  %v11790_v25 = vpop.f32.mrf.mxu0 }
 0x397   : > { %12654 = vst [vmem:[#allocation59_spill] sm:$0xff] %v11788_v21  ;;  %12655 = vst [vmem:[#allocation86_spill] sm:$0xff] %v11790_v25  ;;  %v11793_v46 = vadd.f32 %v8229_v17, %v11639_v0 }
 0x398   : > { %v4729_v1 = vpop.f32.mrf.mxu1  ;;  %v11795_v49 = vpop.f32.mrf.mxu0 }
 0x399   : > { %12656 = vst [vmem:[#allocation91_spill] sm:$0xff] %v11793_v46  ;;  %12657 = vst [vmem:[#allocation56_spill] sm:$0xff] %v11795_v49  ;;  %v11798_v4 = vadd.f32 %v4729_v1, %v11645_v57 }
 0x39a   : > { %v8232_v48 = vpop.f32.mrf.mxu1  ;;  %v11800_v7 = vpop.f32.mrf.mxu0 }
 0x39b   : > { %12658 = vst [vmem:[#allocation57_spill] sm:$0xff] %v11798_v4  ;;  %12659 = vst [vmem:[#allocation58_spill] sm:$0xff] %v11800_v7  ;;  %v11803_v62 = vadd.f32 %v8232_v48, %v11648_v51 }
 0x39c   : > { %v4739_v16 = vpop.f32.mrf.mxu1  ;;  %v11805_v47 = vpop.f32.mrf.mxu0 }
 0x39d   : > { %12660 = vst [vmem:[#allocation63_spill] sm:$0xff] %v11803_v62  ;;  %12661 = vst [vmem:[#allocation94_spill] sm:$0xff] %v11805_v47  ;;  %v11808_v25 = vadd.f32 %v4739_v16, %v11653_v8 }
 0x39e   : > { %v8235_v0 = vpop.f32.mrf.mxu1  ;;  %v11810_v17 = vpop.f32.mrf.mxu0 }
 0x39f   : > { %12662 = vst [vmem:[#allocation87_spill] sm:$0xff] %v11808_v25  ;;  %12663 = vst [vmem:[#allocation60_spill] sm:$0xff] %v11810_v17  ;;  %v11813_v49 = vadd.f32 %v8235_v0, %v11656_v2 }
 0x3a0   : > { %v4749_v57 = vpop.f32.mrf.mxu1  ;;  %v11818_v7 = vpop.f32.mrf.mxu0 }
 0x3a1   : > { %12664 = vst [vmem:[#allocation61_spill] sm:$0xff] %v11813_v49  ;;  %v11816_v1 = vadd.f32 %v4749_v57, %v11661_v36  ;;  %12666 = vst [vmem:[#allocation97_spill] sm:$0xff] %v11818_v7 }
 0x3a2   : > { %v8238_v51 = vpop.f32.mrf.mxu1  ;;  %v8433_v16 = vpop.f32.mrf.mxu0 }
 0x3a3   : > { %12665 = vst [vmem:[#allocation62_spill] sm:$0xff] %v11816_v1  ;;  %v11821_v48 = vadd.f32 %v8238_v51, %v11666_v43 }
 0x3a4   : > { %v4759_v47 = vpop.f32.mrf.mxu1  ;;  %v5448_v62 = vpop.f32.mrf.mxu0 }
 0x3a5   : > { %12667 = vst [vmem:[#allocation89_spill] sm:$0xff] %v11821_v48  ;;  %v11824_v8 = vadd.f32 %v4759_v47, %v11673_v58 }
 0x3a6   : > { %v8353_v25 = vpop.f32.mrf.mxu1  ;;  %v11826_v49 = vpop.f32.mrf.mxu0 }
 0x3a7   : > { %12668 = vst [vmem:[#allocation64_spill] sm:$0xff] %v11824_v8 }
 0x3a8   : > { %v5164_v17 = vpop.f32.mrf.mxu1  ;;  %v11830_v7 = vpop.f32.mrf.mxu0 }
 0x3aa   : > { %v8356_v2 = vpop.f32.mrf.mxu1  ;;  %v11836_v51 = vpop.f32.mrf.mxu0 }
 0x3ac   : > { %v5174_v0 = vpop.f32.mrf.mxu1  ;;  %v11842_v8 = vpop.f32.mrf.mxu0 }
 0x3ae   : > { %v8359_v36 = vpop.f32.mrf.mxu1  ;;  %v11848_v46 = vpop.f32.mrf.mxu0 }
 0x3b0   : > { %v11828_v57 = vpop.f32.mrf.mxu1  ;;  %v11854_v26 = vpop.f32.mrf.mxu0 }
 0x3b2   : > { %v11832_v1 = vpop.f32.mrf.mxu1  ;;  %v11860_v52 = vpop.f32.mrf.mxu0 }
 0x3b4   : > { %v11834_v43 = vpop.f32.mrf.mxu1  ;;  %v11866_v63 = vpop.f32.mrf.mxu0 }
 0x3b6   : > { %v11838_v58 = vpop.f32.mrf.mxu1  ;;  %v11872_v3 = vpop.f32.mrf.mxu0 }
 0x3b8   : > { %v11840_v47 = vpop.f32.mrf.mxu1 }
 0x3ba   : > { %v11844_v48 = vpop.f32.mrf.mxu1 }
 0x3bc   : > { %v11846_v4 = vpop.f32.mrf.mxu1 }
 0x3be   : > { %v11850_v21 = vpop.f32.mrf.mxu1 }
 0x3c0   : > { %v11852_v56 = vpop.f32.mrf.mxu1 }
 0x3c2   : > { %v11856_v45 = vpop.f32.mrf.mxu1 }
 0x3c3   : > { %12669 = vst [vmem:[#allocation90_spill] sm:$0xff] %v11856_v45  ;;  %v11878_v45 = vpop.f32.mrf.mxu0 }
 0x3c4   : > { %v11858_v23 = vpop.f32.mrf.mxu1  ;;  %12677 = vst [vmem:[#allocation95_spill] sm:$0xff] %v11878_v45 }
 0x3c5   : > { %12670 = vst [vmem:[#allocation100_spill] sm:$0xff] %v11858_v23 }
 0x3c6   : > { %v11862_v32 = vpop.f32.mrf.mxu1 }
 0x3c7   : > { %12671 = vst [vmem:[#allocation103_spill] sm:$0xff] %v11862_v32  ;;  %v11884_v32 = vpop.f32.mrf.mxu0 }
 0x3c8   : > { %v11864_v60 = vpop.f32.mrf.mxu1  ;;  %12680 = vst [vmem:[#allocation96_spill] sm:$0xff] %v11884_v32 }
 0x3c9   : > { %12672 = vst [vmem:[#allocation92_spill] sm:$0xff] %v11864_v60 }
 0x3ca   : > { %v11868_v13 = vpop.f32.mrf.mxu1 }
 0x3cb   : > { %12673 = vst [vmem:[#allocation67_spill] sm:$0xff] %v11868_v13 }
 0x3cc   : > { %v11870_v55 = vpop.f32.mrf.mxu1 }
 0x3cd   : > { %12674 = vst [vmem:[#allocation106_spill] sm:$0xff] %v11870_v55  ;;  %v11890_v55 = vpop.f32.mrf.mxu0 }
 0x3ce   : > { %v11874_v54 = vpop.f32.mrf.mxu1  ;;  %12683 = vst [vmem:[#allocation99_spill] sm:$0xff] %v11890_v55 }
 0x3cf   : > { %12675 = vst [vmem:[#allocation93_spill] sm:$0xff] %v11874_v54 }
 0x3d0   : > { %v11876_v14 = vpop.f32.mrf.mxu1 }
 0x3d1   : > { %12676 = vst [vmem:[#allocation109_spill] sm:$0xff] %v11876_v14  ;;  %v11896_v14 = vpop.f32.mrf.mxu0 }
 0x3d2   : > { %v11880_v23 = vpop.f32.mrf.mxu1  ;;  %12686 = vst [vmem:[#allocation102_spill] sm:$0xff] %v11896_v14 }
 0x3d3   : > { %12678 = vst [vmem:[#allocation65_spill] sm:$0xff] %v11880_v23 }
 0x3d4   : > { %v11882_v37 = vpop.f32.mrf.mxu1 }
 0x3d5   : > { %12679 = vst [vmem:[#allocation66_spill] sm:$0xff] %v11882_v37  ;;  %v5050_v37 = vadd.f32 %v11658_v59, %v11671_v15  ;;  %v5051_v59 = vadd.f32 %v11675_v6, %v11688_v44  ;;  %v5053_v6 = vadd.f32 %v11685_v42, %v11698_v10  ;;  %v5055_v10 = vadd.f32 %v11695_v29, %v11708_v39 }
 0x3d6   : > { %v11886_v60 = vpop.f32.mrf.mxu1 }
 0x3d7   : > { %12681 = vst [vmem:[#allocation98_spill] sm:$0xff] %v11886_v60  ;;  %v5324_v32 = vadd.f32 %v8353_v25, %v5050_v37  ;;  %v11906_v60 = vpop.f32.mrf.mxu0  ;;  %v5054_v37 = vadd.f32 %v11680_v38, %v11693_v41 }
 0x3d8   : > { %v11888_v13 = vpop.f32.mrf.mxu1 }
 0x3d9   : > { %12682 = vst [vmem:[#allocation68_spill] sm:$0xff] %v11888_v13  ;;  %v5049_v13 = vadd.f32 %v11663_v9, %v11678_v34  ;;  %v5608_v15 = vadd.f32 %v8433_v16, %v5324_v32  ;;  %v11919_v9 = vpop.f32.mrf.mxu0  ;;  %v5328_v25 = vadd.f32 %v8359_v36, %v5054_v37  ;;  %v5056_v16 = vadd.f32 %v11690_v12, %v11703_v33 }
 0x3da   : > { %v11892_v20 = vpop.f32.mrf.mxu1 }
 0x3db   : > { %12684 = vst [vmem:[#allocation101_spill] sm:$0xff] %v11892_v20  ;;  %v5323_v20 = vadd.f32 %v5164_v17, %v5049_v13  ;;  %v11924_v13 = vld [vmem:[%s12166_s4] ss:$0 sm:$0xff]  ;;  %v5327_v17 = vadd.f32 %v11828_v57, %v5053_v6  ;;  %v5060_v6 = vadd.f32 %v11710_v18, %v11723_v50 }
 0x3dc   : > { %v11894_v54 = vpop.f32.mrf.mxu1 }
 0x3dd   : > { %12685 = vst [vmem:[#allocation71_spill] sm:$0xff] %v11894_v54  ;;  %v5052_v54 = vadd.f32 %v11668_v28, %v11683_v30  ;;  %v5325_v28 = vadd.f32 %v5174_v0, %v5051_v59  ;;  %v5611_v39 = vadd.f32 %v11842_v8, %v5327_v17  ;;  %v5334_v17 = vadd.f32 %v11844_v48, %v5060_v6 }
 0x3de   : > { %v11898_v45 = vpop.f32.mrf.mxu1 }
 0x3df   : > { %12687 = vst [vmem:[#allocation104_spill] sm:$0xff] %v11898_v45  ;;  %v5326_v45 = vadd.f32 %v8356_v2, %v5052_v54  ;;  %v5607_v54 = vadd.f32 %v5448_v62, %v5323_v20  ;;  %v11935_v2 = vpop.f32.mrf.mxu0  ;;  %v5609_v42 = vadd.f32 %v11830_v7, %v5325_v28  ;;  %v5058_v7 = vadd.f32 %v11700_v53, %v11713_v61 }
 0x3e0   : > { %v11902_v23 = vpop.f32.mrf.mxu1 }
 0x3e1   : > { %v5610_v32 = vadd.f32 %v11826_v49, %v5326_v45  ;;  %v5612_v45 = vadd.f32 %v11836_v51, %v5328_v25  ;;  %v5330_v49 = vadd.f32 %v11832_v1, %v5056_v16  ;;  %v5329_v1 = vadd.f32 %v11834_v43, %v5055_v10 }
 0x3e2   : > { %v11908_v55 = vpop.f32.mrf.mxu1  ;;  %v5332_v28 = vadd.f32 %v11838_v58, %v5058_v7 }
 0x3e3   : > { %v5614_v43 = vadd.f32 %v11848_v46, %v5330_v49 }
 0x3e4   : > { %v11912_v14 = vpop.f32.mrf.mxu1 }
 0x3e6   : > { %v8513_v34 = vpop.f32.mrf.mxu1 }
 0x3e7   : > { %v5889_v30 = vadd.f32 %v8513_v34, %v5608_v15  ;;  %v11949_v15 = vpop.f32.mrf.mxu0 }
 0x3e8   : > { %v5729_v44 = vpop.f32.mrf.mxu1 }
 0x3e9   : > { %v5928_v38 = vadd.f32 %v11924_v13, %v5889_v30  ;;  %v5888_v41 = vadd.f32 %v5729_v44, %v5607_v54  ;;  %v5057_v30 = vadd.f32 %v11705_v19, %v11718_v27  ;;  %v11964_v44 = vpop.f32.mrf.mxu0 }
 0x3ea   : > { %v8516_v0 = vpop.f32.mrf.mxu1 }
 0x3eb   : > { %v5960_v59 = vmax.f32 %v5928_v38, 0.0  ;;  %v5927_v20 = vadd.f32 %v11924_v13, %v5888_v41  ;;  %v5891_v62 = vadd.f32 %v8516_v0, %v5610_v32  ;;  %v5331_v25 = vadd.f32 %v11840_v47, %v5057_v30 }
 0x3ec   : > { %v5739_v36 = vpop.f32.mrf.mxu1  ;;  %v5613_v41 = vadd.f32 %v11854_v26, %v5329_v1  ;;  %v5059_v32 = vadd.f32 %v11715_v35, %v11728_v31  ;;  %v5616_v47 = vadd.f32 %v11860_v52, %v5332_v28  ;;  %v5062_v0 = vadd.f32 %v11720_v22, %v11733_v11 }
 0x3ed   : > { %5992 = vst [vmem:[%s11943_s7 + $0x8] sm:$0xff] %v5960_v59  ;;  %v5959_v12 = vmax.f32 %v5927_v20, 0.0  ;;  %v5930_v33 = vadd.f32 %v11924_v13, %v5891_v62  ;;  %v5890_v57 = vadd.f32 %v5739_v36, %v5609_v42  ;;  %v11977_v59 = vpop.f32.mrf.mxu0  ;;  %v5615_v20 = vadd.f32 %v11866_v63, %v5331_v25  ;;  %v12696_v25 = vld [vmem:[#allocation99_spill] sm:$0xff] }
 0x3ee   : > { %v8519_v29 = vpop.f32.mrf.mxu1  ;;  %v5333_v35 = vadd.f32 %v11846_v4, %v5059_v32  ;;  %v5336_v62 = vadd.f32 %v11850_v21, %v5062_v0  ;;  %v5061_v42 = vadd.f32 %v11725_v24, %v11738_v40  ;;  %v5618_v4 = vadd.f32 %v11872_v3, %v5334_v17  ;;  %v12698_v32 = vld [vmem:[#allocation103_spill] sm:$0xff]  ;;  %v12700_v17 = vld [vmem:[#allocation82_spill] sm:$0xff] }
 0x3ef   : > { %5991 = vst [vmem:[%s11943_s7] sm:$0xff] %v5959_v12  ;;  %v5962_v51 = vmax.f32 %v5930_v33, 0.0  ;;  %v5929_v37 = vadd.f32 %v11924_v13, %v5890_v57  ;;  %v5893_v34 = vadd.f32 %v8519_v29, %v5612_v45  ;;  %v12688_v45 = vld [vmem:[#allocation41_spill] sm:$0xff]  ;;  %v11992_v12 = vpop.f32.mrf.mxu0  ;;  %v12689_v57 = vld [vmem:[#allocation95_spill] sm:$0xff] }
 0x3f0   : > { %v5749_v54 = vpop.f32.mrf.mxu1  ;;  %v5335_v36 = vadd.f32 %v11852_v56, %v5061_v42  ;;  %v5064_v49 = vadd.f32 %v12688_v45, %v11743_v5  ;;  %v5617_v7 = vadd.f32 %v12689_v57, %v5333_v35  ;;  %v12690_v29 = vld [vmem:[#allocation81_spill] sm:$0xff] }
 0x3f1   : > { %5994 = vst [vmem:[%s11943_s7 + $0x18] sm:$0xff] %v5962_v51  ;;  %v5961_v53 = vmax.f32 %v5929_v37, 0.0  ;;  %v5932_v61 = vadd.f32 %v11924_v13, %v5893_v34  ;;  %v5892_v8 = vadd.f32 %v5749_v54, %v5611_v39  ;;  %v12691_v39 = vld [vmem:[#allocation42_spill] sm:$0xff]  ;;  %v12692_v51 = vld [vmem:[#allocation96_spill] sm:$0xff]  ;;  %v12694_v54 = vld [vmem:[#allocation45_spill] sm:$0xff] }
 0x3f2   : > { %v8522_v58 = vpop.f32.mrf.mxu1  ;;  %v5063_v1 = vadd.f32 %v12691_v39, %v12690_v29  ;;  %v5620_v56 = vadd.f32 %v12692_v51, %v5336_v62  ;;  %v12693_v37 = vld [vmem:[#allocation90_spill] sm:$0xff]  ;;  %v5619_v6 = vadd.f32 %v12696_v25, %v5335_v36  ;;  %v12704_v62 = vld [vmem:[#allocation44_spill] sm:$0xff]  ;;  %v12705_v45 = vld [vmem:[#allocation49_spill] sm:$0xff] }
 0x3f3   : > { %5993 = vst [vmem:[%s11943_s7 + $0x10] sm:$0xff] %v5961_v53  ;;  %v5964_v38 = vmax.f32 %v5932_v61, 0.0  ;;  %v5931_v19 = vadd.f32 %v11924_v13, %v5892_v8  ;;  %v5895_v27 = vadd.f32 %v8522_v58, %v5614_v43  ;;  %v5338_v34 = vadd.f32 %v12693_v37, %v5064_v49  ;;  %v12695_v53 = vld [vmem:[#allocation47_spill] sm:$0xff]  ;;  %v12005_v8 = vpop.f32.mrf.mxu0  ;;  %v12697_v58 = vld [vmem:[#allocation100_spill] sm:$0xff]  ;;  %v12706_v49 = vld [vmem:[#allocation46_spill] sm:$0xff] }
 0x3f4   : > { %v5759_v46 = vpop.f32.mrf.mxu1  ;;  %v5066_v61 = vadd.f32 %v12695_v53, %v12694_v54  ;;  %v12711_v54 = vld [vmem:[#allocation93_spill] sm:$0xff] }
 0x3f5   : > { %5996 = vst [vmem:[%s11943_s7 + $0x28] sm:$0xff] %v5964_v38  ;;  %v5963_v18 = vmax.f32 %v5931_v19, 0.0  ;;  %v5934_v50 = vadd.f32 %v11924_v13, %v5895_v27  ;;  %v5894_v16 = vadd.f32 %v5759_v46, %v5613_v41  ;;  %v5337_v38 = vadd.f32 %v12697_v58, %v5063_v1  ;;  %v12708_v1 = vld [vmem:[#allocation55_spill] sm:$0xff] }
 0x3f6   : > { %v8525_v26 = vpop.f32.mrf.mxu1  ;;  %v5340_v46 = vadd.f32 %v12698_v32, %v5066_v61  ;;  %v12712_v61 = vld [vmem:[#allocation88_spill] sm:$0xff]  ;;  %v12715_v32 = vld [vmem:[#allocation53_spill] sm:$0xff] }
 0x3f7   : > { %5995 = vst [vmem:[%s11943_s7 + $0x20] sm:$0xff] %v5963_v18  ;;  %v5966_v31 = vmax.f32 %v5934_v50, 0.0  ;;  %v5933_v52 = vadd.f32 %v11924_v13, %v5894_v16  ;;  %v5897_v48 = vadd.f32 %v8525_v26, %v5616_v47  ;;  %v12699_v47 = vld [vmem:[#allocation51_spill] sm:$0xff]  ;;  %v5621_v36 = vadd.f32 %v11906_v60, %v5337_v38 }
 0x3f8   : > { %v5769_v10 = vpop.f32.mrf.mxu1  ;;  %v5065_v18 = vadd.f32 %v12700_v17, %v12699_v47 }
 0x3f9   : > { %5998 = vst [vmem:[%s11943_s7 + $0x38] sm:$0xff] %v5966_v31  ;;  %v5965_v22 = vmax.f32 %v5933_v52, 0.0  ;;  %v5936_v11 = vadd.f32 %v11924_v13, %v5897_v48  ;;  %v5896_v63 = vadd.f32 %v5769_v10, %v5615_v20  ;;  %v12701_v20 = vld [vmem:[#allocation102_spill] sm:$0xff]  ;;  %v12702_v31 = vld [vmem:[#allocation92_spill] sm:$0xff]  ;;  %v12703_v48 = vld [vmem:[#allocation83_spill] sm:$0xff]  ;;  %v12020_v10 = vpop.f32.mrf.mxu0 }
 0x3fa   : > { %v8528_v21 = vpop.f32.mrf.mxu1  ;;  %v5622_v35 = vadd.f32 %v12701_v20, %v5338_v34  ;;  %v5339_v52 = vadd.f32 %v12702_v31, %v5065_v18  ;;  %v5068_v42 = vadd.f32 %v12704_v62, %v12703_v48  ;;  %v12710_v34 = vld [vmem:[#allocation106_spill] sm:$0xff]  ;;  %v12717_v20 = vld [vmem:[#allocation59_spill] sm:$0xff]  ;;  %v12719_v48 = vld [vmem:[#allocation65_spill] sm:$0xff] }
 0x3fb   : > { %5997 = vst [vmem:[%s11943_s7 + $0x30] sm:$0xff] %v5965_v22  ;;  %v5968_v33 = vmax.f32 %v5936_v11, 0.0  ;;  %v5935_v24 = vadd.f32 %v11924_v13, %v5896_v63  ;;  %v5899_v40 = vadd.f32 %v8528_v21, %v5618_v4  ;;  %v5067_v21 = vadd.f32 %v12706_v49, %v12705_v45 }
 0x3fc   : > { %v5779_v3 = vpop.f32.mrf.mxu1  ;;  %v5623_v60 = vadd.f32 %v11935_v2, %v5339_v52 }
 0x3fd   : > { %6000 = vst [vmem:[%s11943_s7 + $0x48] sm:$0xff] %v5968_v33  ;;  %v5967_v5 = vmax.f32 %v5935_v24, 0.0  ;;  %v5938_v28 = vadd.f32 %v11924_v13, %v5899_v40  ;;  %v5898_v30 = vadd.f32 %v5779_v3, %v5617_v7  ;;  %v5624_v24 = vadd.f32 %v11919_v9, %v5340_v46  ;;  %v12707_v40 = vld [vmem:[#allocation67_spill] sm:$0xff]  ;;  %v12709_v3 = vld [vmem:[#allocation85_spill] sm:$0xff]  ;;  %v12716_v46 = vld [vmem:[#allocation50_spill] sm:$0xff] }
 0x3fe   : > { %v8531_v43 = vpop.f32.mrf.mxu1  ;;  %v5342_v57 = vadd.f32 %v12707_v40, %v5068_v42  ;;  %v5070_v51 = vadd.f32 %v12709_v3, %v12708_v1  ;;  %v5072_v47 = vadd.f32 %v12716_v46, %v12715_v32 }
 0x3ff   : > { %5999 = vst [vmem:[%s11943_s7 + $0x40] sm:$0xff] %v5967_v5  ;;  %v5970_v19 = vmax.f32 %v5938_v28, 0.0  ;;  %v5937_v27 = vadd.f32 %v11924_v13, %v5898_v30  ;;  %v5901_v41 = vadd.f32 %v8531_v43, %v5620_v56  ;;  %v8469_v56 = vpop.f32.mrf.mxu0  ;;  %v5341_v5 = vadd.f32 %v12710_v34, %v5067_v21  ;;  %v12713_v43 = vld [vmem:[#allocation48_spill] sm:$0xff]  ;;  %v12722_v21 = vld [vmem:[#allocation66_spill] sm:$0xff] }
 0x400   : > { %v5789_v50 = vpop.f32.mrf.mxu1  ;;  %v5344_v53 = vadd.f32 %v12711_v54, %v5070_v51  ;;  %v5069_v25 = vadd.f32 %v12713_v43, %v12712_v61  ;;  %v5346_v62 = vadd.f32 %v12719_v48, %v5072_v47  ;;  %v12726_v34 = vld [vmem:[#allocation68_spill] sm:$0xff] }
 0x401   : > { %6002 = vst [vmem:[%s11943_s7 + $0x58] sm:$0xff] %v5970_v19  ;;  %v5969_v16 = vmax.f32 %v5937_v27, 0.0  ;;  %v5940_v0 = vadd.f32 %v11924_v13, %v5901_v41  ;;  %v5900_v26 = vadd.f32 %v5789_v50, %v5619_v6  ;;  %v5626_v19 = vadd.f32 %v11949_v15, %v5342_v57  ;;  %v12714_v27 = vld [vmem:[#allocation109_spill] sm:$0xff]  ;;  %v5568_v17 = vpop.f32.mrf.mxu0  ;;  %v12723_v57 = vld [vmem:[#allocation98_spill] sm:$0xff] }
 0x402   : > { %v8534_v22 = vpop.f32.mrf.mxu1  ;;  %v5343_v41 = vadd.f32 %v12714_v27, %v5069_v25  ;;  %v5628_v15 = vadd.f32 %v11977_v59, %v5344_v53  ;;  %v12731_v27 = vld [vmem:[#allocation101_spill] sm:$0xff] }
 0x403   : > { %6001 = vst [vmem:[%s11943_s7 + $0x50] sm:$0xff] %v5969_v16  ;;  %v5972_v11 = vmax.f32 %v5940_v0, 0.0  ;;  %v5939_v63 = vadd.f32 %v11924_v13, %v5900_v26  ;;  %v5903_v4 = vadd.f32 %v8534_v22, %v5622_v35  ;;  %v5625_v26 = vadd.f32 %v11964_v44, %v5341_v5  ;;  %v12718_v35 = vld [vmem:[#allocation84_spill] sm:$0xff]  ;;  %v8472_v45 = vpop.f32.mrf.mxu0 }
 0x404   : > { %v5799_v33 = vpop.f32.mrf.mxu1  ;;  %v5071_v31 = vadd.f32 %v12718_v35, %v12717_v20  ;;  %v5627_v44 = vadd.f32 %v11992_v12, %v5343_v41 }
 0x405   : > { %6004 = vst [vmem:[%s11943_s7 + $0x68] sm:$0xff] %v5972_v11  ;;  %v5971_v7 = vmax.f32 %v5939_v63, 0.0  ;;  %v5942_v29 = vadd.f32 %v11924_v13, %v5903_v4  ;;  %v5902_v39 = vadd.f32 %v5799_v33, %v5621_v36  ;;  %v12720_v63 = vld [vmem:[#allocation91_spill] sm:$0xff]  ;;  %v12721_v4 = vld [vmem:[#allocation52_spill] sm:$0xff] }
 0x406   : > { %v8537_v37 = vpop.f32.mrf.mxu1  ;;  %v5074_v36 = vadd.f32 %v12721_v4, %v12720_v63  ;;  %v5345_v33 = vadd.f32 %v12722_v21, %v5071_v31  ;;  %v12738_v21 = vld [vmem:[#allocation89_spill] sm:$0xff] }
 0x407   : > { %6003 = vst [vmem:[%s11943_s7 + $0x60] sm:$0xff] %v5971_v7  ;;  %v5974_v9 = vmax.f32 %v5942_v29, 0.0  ;;  %v5941_v28 = vadd.f32 %v11924_v13, %v5902_v39  ;;  %v5905_v30 = vadd.f32 %v8537_v37, %v5624_v24  ;;  %v12724_v29 = vld [vmem:[#allocation57_spill] sm:$0xff]  ;;  %v12725_v39 = vld [vmem:[#allocation54_spill] sm:$0xff] }
 0x408   : > { %v5809_v6 = vpop.f32.mrf.mxu1  ;;  %v5348_v7 = vadd.f32 %v12723_v57, %v5074_v36  ;;  %v5073_v1 = vadd.f32 %v12725_v39, %v12724_v29  ;;  %v12740_v39 = vld [vmem:[#allocation64_spill] sm:$0xff] }
 0x409   : > { %6006 = vst [vmem:[%s11943_s7 + $0x78] sm:$0xff] %v5974_v9  ;;  %v5973_v58 = vmax.f32 %v5941_v28, 0.0  ;;  %v5944_v38 = vadd.f32 %v11924_v13, %v5905_v30  ;;  %v5904_v2 = vadd.f32 %v5809_v6, %v5623_v60  ;;  %v5630_v60 = vadd.f32 %v12005_v8, %v5346_v62  ;;  %v5578_v9 = vpop.f32.mrf.mxu0  ;;  %v12727_v28 = vld [vmem:[#allocation63_spill] sm:$0xff]  ;;  %v12728_v30 = vld [vmem:[#allocation86_spill] sm:$0xff] }
 0x40a   : > { %v8540_v18 = vpop.f32.mrf.mxu1  ;;  %v5347_v5 = vadd.f32 %v12726_v34, %v5073_v1  ;;  %v5076_v54 = vadd.f32 %v12728_v30, %v12727_v28  ;;  %v5629_v6 = vadd.f32 %v12020_v10, %v5345_v33  ;;  %v5632_v8 = vadd.f32 %v8469_v56, %v5348_v7  ;;  %v12734_v10 = vld [vmem:[#allocation71_spill] sm:$0xff]  ;;  %v12736_v62 = vld [vmem:[#allocation62_spill] sm:$0xff]  ;;  %v12739_v33 = vld [vmem:[#allocation60_spill] sm:$0xff] }
 0x40b   : > { %6005 = vst [vmem:[%s11943_s7 + $0x70] sm:$0xff] %v5973_v58  ;;  %v5976_v50 = vmax.f32 %v5944_v38, 0.0  ;;  %v5943_v16 = vadd.f32 %v11924_v13, %v5904_v2  ;;  %v5907_v0 = vadd.f32 %v8540_v18, %v5626_v19  ;;  %v12729_v58 = vld [vmem:[#allocation87_spill] sm:$0xff]  ;;  %v12730_v38 = vld [vmem:[#allocation56_spill] sm:$0xff]  ;;  %v8475_v18 = vpop.f32.mrf.mxu0  ;;  %v12741_v1 = vld [vmem:[#allocation97_spill] sm:$0xff] }
 0x40c   : > { %v5819_v52 = vpop.f32.mrf.mxu1  ;;  %v5075_v2 = vadd.f32 %v12730_v38, %v12729_v58  ;;  %v5350_v41 = vadd.f32 %v12731_v27, %v5076_v54  ;;  %v5631_v20 = vadd.f32 %v5568_v17, %v5347_v5 }
 0x40d   : > { %6008 = vst [vmem:[%s11943_s7 + $0x88] sm:$0xff] %v5976_v50  ;;  %v5975_v42 = vmax.f32 %v5943_v16, 0.0  ;;  %v5946_v22 = vadd.f32 %v11924_v13, %v5907_v0  ;;  %v5906_v11 = vadd.f32 %v5819_v52, %v5625_v26  ;;  %v12732_v50 = vld [vmem:[#allocation61_spill] sm:$0xff]  ;;  %v12733_v16 = vld [vmem:[#allocation58_spill] sm:$0xff] }
 0x40e   : > { %v8543_v49 = vpop.f32.mrf.mxu1  ;;  %v5078_v0 = vadd.f32 %v12733_v16, %v12732_v50  ;;  %v5349_v35 = vadd.f32 %v12734_v10, %v5075_v2  ;;  %v5634_v17 = vadd.f32 %v8472_v45, %v5350_v41 }
 0x40f   : > { %6007 = vst [vmem:[%s11943_s7 + $0x80] sm:$0xff] %v5975_v42  ;;  %v5978_v59 = vmax.f32 %v5946_v22, 0.0  ;;  %v5945_v24 = vadd.f32 %v11924_v13, %v5906_v11  ;;  %v5909_v40 = vadd.f32 %v8543_v49, %v5628_v15  ;;  %v12735_v15 = vld [vmem:[#allocation104_spill] sm:$0xff]  ;;  %v12737_v42 = vld [vmem:[#allocation94_spill] sm:$0xff]  ;;  %v5588_v49 = vpop.f32.mrf.mxu0 }
 0x410   : > { %v5829_v3 = vpop.f32.mrf.mxu1  ;;  %v5352_v48 = vadd.f32 %v12735_v15, %v5078_v0  ;;  %v5077_v22 = vadd.f32 %v12737_v42, %v12736_v62  ;;  %v5633_v29 = vadd.f32 %v5578_v9, %v5349_v35 }
 0x411   : > { %6010 = vst [vmem:[%s11943_s7 + $0x98] sm:$0xff] %v5978_v59  ;;  %v5977_v51 = vmax.f32 %v5945_v24, 0.0  ;;  %v5948_v37 = vadd.f32 %v11924_v13, %v5909_v40  ;;  %v5908_v12 = vadd.f32 %v5829_v3, %v5627_v44  ;;  %v5080_v59 = vadd.f32 %v12739_v33, %v12738_v21 }
 0x412   : > { %v8546_v53 = vpop.f32.mrf.mxu1  ;;  %v5351_v44 = vadd.f32 %v11902_v23, %v5077_v22  ;;  %v5079_v3 = vadd.f32 %v12741_v1, %v12740_v39  ;;  %v5636_v45 = vadd.f32 %v8475_v18, %v5352_v48 }
 0x413   : > { %6009 = vst [vmem:[%s11943_s7 + $0x90] sm:$0xff] %v5977_v51  ;;  %v5980_v61 = vmax.f32 %v5948_v37, 0.0  ;;  %v5947_v43 = vadd.f32 %v11924_v13, %v5908_v12  ;;  %v5911_v25 = vadd.f32 %v8546_v53, %v5630_v60  ;;  %v8478_v51 = vpop.f32.mrf.mxu0  ;;  %v5354_v23 = vadd.f32 %v11908_v55, %v5080_v59 }
 0x414   : > { %v5839_v19 = vpop.f32.mrf.mxu1  ;;  %v5635_v28 = vadd.f32 %v5588_v49, %v5351_v44  ;;  %v5353_v30 = vadd.f32 %v11912_v14, %v5079_v3 }
 0x415   : > { %6012 = vst [vmem:[%s11943_s7 + $0xa8] sm:$0xff] %v5980_v61  ;;  %v5979_v32 = vmax.f32 %v5947_v43, 0.0  ;;  %v5950_v46 = vadd.f32 %v11924_v13, %v5911_v25  ;;  %v5910_v47 = vadd.f32 %v5839_v19, %v5629_v6  ;;  %v5598_v61 = vpop.f32.mrf.mxu0  ;;  %v5638_v25 = vadd.f32 %v8478_v51, %v5354_v23 }
 0x416   : > { %v8549_v26 = vpop.f32.mrf.mxu1  ;;  %v5637_v2 = vadd.f32 %v5598_v61, %v5353_v30 }
 0x417   : > { %6011 = vst [vmem:[%s11943_s7 + $0xa0] sm:$0xff] %v5979_v32  ;;  %v5982_v31 = vmax.f32 %v5950_v46, 0.0  ;;  %v5949_v56 = vadd.f32 %v11924_v13, %v5910_v47  ;;  %v5913_v52 = vadd.f32 %v8549_v26, %v5632_v8 }
 0x418   : > { %v5849_v11 = vpop.f32.mrf.mxu1 }
 0x419   : > { %6014 = vst [vmem:[%s11943_s7 + $0xb8] sm:$0xff] %v5982_v31  ;;  %v5981_v63 = vmax.f32 %v5949_v56, 0.0  ;;  %v5952_v4 = vadd.f32 %v11924_v13, %v5913_v52  ;;  %v5912_v36 = vadd.f32 %v5849_v11, %v5631_v20 }
 0x41a   : > { %v8552_v24 = vpop.f32.mrf.mxu1 }
 0x41b   : > { %6013 = vst [vmem:[%s11943_s7 + $0xb0] sm:$0xff] %v5981_v63  ;;  %v5984_v40 = vmax.f32 %v5952_v4, 0.0  ;;  %v5951_v57 = vadd.f32 %v11924_v13, %v5912_v36  ;;  %v5915_v7 = vadd.f32 %v8552_v24, %v5634_v17 }
 0x41c   : > { %v5859_v37 = vpop.f32.mrf.mxu1 }
 0x41d   : > { %6016 = vst [vmem:[%s11943_s7 + $0xc8] sm:$0xff] %v5984_v40  ;;  %v5983_v12 = vmax.f32 %v5951_v57, 0.0  ;;  %v5954_v60 = vadd.f32 %v11924_v13, %v5915_v7  ;;  %v5914_v34 = vadd.f32 %v5859_v37, %v5633_v29 }
 0x41e   : > { %v8555_v5 = vpop.f32.mrf.mxu1 }
 0x41f   : > { %6015 = vst [vmem:[%s11943_s7 + $0xc0] sm:$0xff] %v5983_v12  ;;  %v5986_v9 = vmax.f32 %v5954_v60, 0.0  ;;  %v5953_v54 = vadd.f32 %v11924_v13, %v5914_v34  ;;  %v5917_v53 = vadd.f32 %v8555_v5, %v5636_v45 }
 0x420   : > { %v5869_v43 = vpop.f32.mrf.mxu1 }
 0x421   : > { %6018 = vst [vmem:[%s11943_s7 + $0xd8] sm:$0xff] %v5986_v9  ;;  %v5985_v55 = vmax.f32 %v5953_v54, 0.0  ;;  %v5956_v6 = vadd.f32 %v11924_v13, %v5917_v53  ;;  %v5916_v58 = vadd.f32 %v5869_v43, %v5635_v28 }
 0x422   : > { %v8558_v38 = vpop.f32.mrf.mxu1 }
 0x423   : > { %6017 = vst [vmem:[%s11943_s7 + $0xd0] sm:$0xff] %v5985_v55  ;;  %v5988_v14 = vmax.f32 %v5956_v6, 0.0  ;;  %v5955_v19 = vadd.f32 %v11924_v13, %v5916_v58  ;;  %v5919_v8 = vadd.f32 %v8558_v38, %v5638_v25 }
 0x424   : > { %v5879_v27 = vpop.f32.mrf.mxu1 }
 0x425   : > { %6020 = vst [vmem:[%s11943_s7 + $0xe8] sm:$0xff] %v5988_v14  ;;  %v5987_v41 = vmax.f32 %v5955_v19, 0.0  ;;  %v5958_v32 = vadd.f32 %v11924_v13, %v5919_v8  ;;  %v5918_v46 = vadd.f32 %v5879_v27, %v5637_v2 }
 0x427   : > { %6019 = vst [vmem:[%s11943_s7 + $0xe0] sm:$0xff] %v5987_v41  ;;  %v5990_v47 = vmax.f32 %v5958_v32, 0.0  ;;  %v5957_v18 = vadd.f32 %v11924_v13, %v5918_v46 }
 0x429   : > { %6022 = vst [vmem:[%s11943_s7 + $0xf8] sm:$0xff] %v5990_v47  ;;  %v5989_v50 = vmax.f32 %v5957_v18, 0.0 }
 0x42b   : > { %6021 = vst [vmem:[%s11943_s7 + $0xf0] sm:$0xff] %v5989_v50 }
 0x42c   : > { %8715 = shalt.err (!%p8712_p0)
}
 0x42d   : > { %s8716_s13 = scalar_lea.hbm %s12114_s12, 4096  ;;  %s8720_s23 = scalar_lea.hbm %s12167_s5, 8192 }
 0x42e   : > { %p8717_p1 = scmp.ne.s32.totalorder %s12114_s12, %s8716_s13  ;;  %p8721_p4 = scmp.lt.s32.totalorder %s12114_s12, %s12167_s5 }
 0x42f   : > { %p8722_p7 = scmp.lt.s32.totalorder %s8720_s23, %s8716_s13 }
 0x430   : > { %p8718_p2 = pnand %p8717_p1, %p8843_p5 }
 0x431   : > { %p8723_p6 = por %p8722_p7, %p8721_p4 }
 0x432   : > { %p8719_p3 = pneg %p8718_p2 }
 0x434   : > { %p8724_p8 = pnand %p8723_p6, %p8719_p3 }
 0x436   : > { %8727 = shalt.err (!%p8724_p8)
}
 0x437   : > { %s8773_s7 = smov 128   ;;  %s8774_s8 = smov 8  }
 0x438   : > { %8564 = dma.vmem_to_hbm [thread:$0]  (%p8843_p5), %s12116_s10, 4096, %s12114_s12, %s12122_s22, %s8773_s7, %s8773_s7, %s8774_s8  }
 0x439 PF: > { %p8576_p9 = scmp.ge.s32.totalorder %s8766_s21, 2  ;;  %s6052_s9 = sand.u32 1, %s8754_s18  }
 0x43a   : > { %p12742_p10 = scmp.ne.s32.totalorder %s12285_s29, 0  ;;  %s6053_s11 = scalar_lea.sflag [#allocation5], %s6052_s9 }
 0x43c   : > { %p8571_p11 = pnand %p8576_p9, %p12742_p10 }
 0x43e   : > { %p8572_p12 = pneg %p8571_p11 }
 0x440   : > { %8749 = dma.done.wait (%p8572_p12), %s6053_s11, 4096  }
 0x441   : > { %8751 = vsyncadd (%p8572_p12), %s6053_s11, 4294963200  ;;  %p16_p13 = scmp.ge.s32.totalorder %s8830_s24, 4   ;;  %s12743_s18 = smov %s8758_s19 }
 0x442   : > { %s12744_s19 = smov %s8762_s20  ;;  %s12745_s20 = smov %s8841_s27 }
 0x443   : > { %s12746_s21 = smov %s8830_s24  ;;  %18 = sbr.rel (!%p16_p13) target bundleno = 4 (0x4), region = 97 }
 0x448   :  { %6058 = vsyncpa [#allocation4], 1 }
 0x449   :  { %6060 = vsyncpa [#allocation4 + $0x1], 1 }
 0x44a   :  { %6061 = vsyncpa [#allocation5], 1 }
 0x44b   :  { %6063 = vsyncpa [#allocation5 + $0x1], 1 }

</bundles_post_ra>
